<compile_context>
chip_gen: v7x
topology: tpu7x:2x2x1
jax: 0.10.0
libtpu: 0.0.40
codegen_flags: <defaults>
</compile_context>

<pallas_src>
import jax
import jax.numpy as jnp
from jax.experimental import pallas as pl
from jax.experimental.pallas import tpu as pltpu

LATENT_DIM = 100
LATENT_PAD = 128                    # 100 -> 128, aligned contraction dim
IMG_SIZE = 28
CHANNELS = 1
HIDDEN = (128, 256, 512, 1024)
OUT_DIM = IMG_SIZE * IMG_SIZE       # 784
OUT_PAD = 896                       # 7 * 128, lane-dense output
BN_EPS = 1e-5
LEAK = 0.2


def _leaky_relu(h):
    # single VPU max instead of compare + select
    return jnp.maximum(h, LEAK * h)


def _batchnorm_train(h, gamma, beta):
    # Fused single-pass BatchNorm1d (training mode, biased variance), fp32.
    n = jnp.float32(h.shape[0])
    s1 = jnp.sum(h, axis=0, keepdims=True)
    s2 = jnp.sum(h * h, axis=0, keepdims=True)
    mean = s1 / n
    var = s2 / n - mean * mean
    scale = gamma * jax.lax.rsqrt(var + BN_EPS)   # rsqrt -> EUP (free slot)
    shift = beta - mean * scale
    return h * scale + shift


def generator_kernel(noise_ref,
                     w1_ref, b1_ref,
                     w2_ref, b2_ref, g2_ref, be2_ref,
                     w3_ref, b3_ref, g3_ref, be3_ref,
                     w4_ref, b4_ref, g4_ref, be4_ref,
                     w5_ref, b5_ref,
                     out_ref):
    def dense(x, w_ref, b_ref):
        # bf16 operands on the MXU, fp32 accumulation, fp32 bias add.
        return jnp.dot(x.astype(jnp.bfloat16), w_ref[...],
                       preferred_element_type=jnp.float32) + b_ref[...]

    x = noise_ref[...]

    # Block 1: Linear -> LeakyReLU
    h = _leaky_relu(dense(x, w1_ref, b1_ref))

    # Blocks 2..4: Linear -> BatchNorm -> LeakyReLU
    h = _leaky_relu(_batchnorm_train(dense(h, w2_ref, b2_ref),
                                     g2_ref[...], be2_ref[...]))
    h = _leaky_relu(_batchnorm_train(dense(h, w3_ref, b3_ref),
                                     g3_ref[...], be3_ref[...]))
    h = _leaky_relu(_batchnorm_train(dense(h, w4_ref, b4_ref),
                                     g4_ref[...], be4_ref[...]))

    # Output head: Linear -> Tanh  (padded columns are zero -> tanh(0)=0)
    out_ref[...] = jnp.tanh(dense(h, w5_ref, b5_ref))


def make_params(key):
    """Deterministic synthetic parameters (shapes match the PyTorch module)."""
    dims = (LATENT_DIM,) + HIDDEN + (OUT_DIM,)
    keys = jax.random.split(key, len(dims) - 1)
    params = []
    for i, (din, dout) in enumerate(zip(dims[:-1], dims[1:])):
        kw, kb = jax.random.split(keys[i])
        bound = 1.0 / (float(din) ** 0.5)
        w = jax.random.uniform(kw, (din, dout), jnp.float32, -bound, bound)
        b = jax.random.uniform(kb, (1, dout), jnp.float32, -bound, bound)
        params.append((w, b))

    # BatchNorm affine params for hidden layers 2..4 (PyTorch default: 1 / 0).
    bn_params = [(jnp.ones((1, d), jnp.float32), jnp.zeros((1, d), jnp.float32))
                 for d in HIDDEN[1:]]
    return params, bn_params


def _pack_params(params, bn_params):
    """Pad for lane alignment and cast weights to bf16 (halves weight DMA)."""
    (w1, b1), (w2, b2), (w3, b3), (w4, b4), (w5, b5) = params
    (g2, be2), (g3, be3), (g4, be4) = bn_params

    # Zero-pad the latent contraction dim 100 -> 128 (exact math).
    w1p = jnp.pad(w1, ((0, LATENT_PAD - LATENT_DIM), (0, 0)))
    # Zero-pad the output dim 784 -> 896 (sliced off in the wrapper).
    w5p = jnp.pad(w5, ((0, 0), (0, OUT_PAD - OUT_DIM)))
    b5p = jnp.pad(b5, ((0, 0), (0, OUT_PAD - OUT_DIM)))

    bf16 = lambda w: w.astype(jnp.bfloat16)
    return (bf16(w1p), b1,
            bf16(w2), b2, g2, be2,
            bf16(w3), b3, g3, be3,
            bf16(w4), b4, g4, be4,
            bf16(w5p), b5p)


def generator_forward(noise, params, bn_params):
    B = noise.shape[0]
    packed = _pack_params(params, bn_params)
    noise_p = jnp.pad(noise, ((0, 0), (0, LATENT_PAD - LATENT_DIM)))

    args = (noise_p,) + packed

    # Cost estimate: 5 matmuls; traffic dominated by bf16 weights (~3.2 MB).
    weight_elems = (LATENT_PAD * 128 + 128 * 256 + 256 * 512
                    + 512 * 1024 + 1024 * OUT_PAD)
    flops = 2 * B * weight_elems
    bytes_accessed = (2 * weight_elems                                   # bf16 weights
                      + 4 * (128 + 256 + 512 + 1024 + OUT_PAD)           # fp32 biases
                      + 4 * 2 * (256 + 512 + 1024)                       # BN gamma/beta
                      + 4 * B * LATENT_PAD + 4 * B * OUT_PAD)            # noise + output
    transcendentals = B * OUT_PAD + 3 * (256 + 512 + 1024)

    vmem = pltpu.MemorySpace.VMEM
    flat = pl.pallas_call(
        generator_kernel,
        out_shape=jax.ShapeDtypeStruct((B, OUT_PAD), jnp.float32),
        in_specs=[pl.BlockSpec(memory_space=vmem) for _ in args],
        out_specs=pl.BlockSpec(memory_space=vmem),
        cost_estimate=pl.CostEstimate(flops=flops,
                                      transcendentals=transcendentals,
                                      bytes_accessed=bytes_accessed),
    )(*args)

    # Drop the lane padding, then match PyTorch's img.view(B, C, H, W) (NCHW).
    return flat[:, :OUT_DIM].reshape(B, CHANNELS, IMG_SIZE, IMG_SIZE)


if __name__ == "__main__":
    key = jax.random.PRNGKey(0)
    k_noise, k_params = jax.random.split(key)

    B = 8  # small batch (BatchNorm needs batch > 1)
    noise = jax.random.normal(k_noise, (B, LATENT_DIM), jnp.float32)

    params, bn_params = make_params(k_params)

    img = generator_forward(noise, params, bn_params)
    img = jax.block_until_ready(img)

    assert img.shape == (B, CHANNELS, IMG_SIZE, IMG_SIZE), img.shape
    assert img.dtype == jnp.float32
    assert bool(jnp.all(jnp.isfinite(img)))
    assert bool(jnp.all(jnp.abs(img) <= 1.0))   # tanh output range
    print("KERNEL_OK")
</pallas_src>

<mosaic_0001>
module attributes {stable_mosaic.version = 11 : i64} {
  func.func @generator_kernel(%arg0: memref<8x128xf32, #tpu.memory_space<vmem>>, %arg1: memref<128x128xbf16, #tpu.memory_space<vmem>>, %arg2: memref<1x128xf32, #tpu.memory_space<vmem>>, %arg3: memref<128x256xbf16, #tpu.memory_space<vmem>>, %arg4: memref<1x256xf32, #tpu.memory_space<vmem>>, %arg5: memref<1x256xf32, #tpu.memory_space<vmem>>, %arg6: memref<1x256xf32, #tpu.memory_space<vmem>>, %arg7: memref<256x512xbf16, #tpu.memory_space<vmem>>, %arg8: memref<1x512xf32, #tpu.memory_space<vmem>>, %arg9: memref<1x512xf32, #tpu.memory_space<vmem>>, %arg10: memref<1x512xf32, #tpu.memory_space<vmem>>, %arg11: memref<512x1024xbf16, #tpu.memory_space<vmem>>, %arg12: memref<1x1024xf32, #tpu.memory_space<vmem>>, %arg13: memref<1x1024xf32, #tpu.memory_space<vmem>>, %arg14: memref<1x1024xf32, #tpu.memory_space<vmem>>, %arg15: memref<1024x896xbf16, #tpu.memory_space<vmem>>, %arg16: memref<1x896xf32, #tpu.memory_space<vmem>>, %arg17: memref<8x896xf32, #tpu.memory_space<vmem>>) attributes {dimension_semantics = [], scalar_prefetch = 0 : i64, scratch_operands = 0 : i64, tpu.core_type = #tpu.core_type<tc>} {
    %c0 = arith.constant 0 : index
    %c0_0 = arith.constant 0 : index
    %0 = vector.load %arg0[%c0, %c0_0] : memref<8x128xf32, #tpu.memory_space<vmem>>, vector<8x128xf32>
    %1 = arith.truncf %0 : vector<8x128xf32> to vector<8x128xbf16>
    %c0_1 = arith.constant 0 : index
    %c0_2 = arith.constant 0 : index
    %2 = vector.load %arg1[%c0_1, %c0_2] : memref<128x128xbf16, #tpu.memory_space<vmem>>, vector<128x128xbf16>
    %cst = arith.constant dense<0.000000e+00> : vector<8x128xf32>
    %3 = tpu.matmul %1, %2, %cst {dimension_numbers = #tpu.dot_dimension_numbers<[1], [0], [0], [1], [0, 0, 1, 1], [], []>} : vector<8x128xbf16>, vector<128x128xbf16>, vector<8x128xf32> -> vector<8x128xf32>
    %c0_3 = arith.constant 0 : index
    %c0_4 = arith.constant 0 : index
    %4 = vector.load %arg2[%c0_3, %c0_4] : memref<1x128xf32, #tpu.memory_space<vmem>>, vector<1x128xf32>
    %5 = vector.broadcast %4 : vector<1x128xf32> to vector<8x128xf32>
    %6 = arith.addf %3, %5 : vector<8x128xf32>
    %cst_5 = arith.constant 2.000000e-01 : f32
    %7 = vector.broadcast %cst_5 : f32 to vector<8x128xf32>
    %8 = arith.mulf %7, %6 : vector<8x128xf32>
    %9 = arith.maximumf %6, %8 : vector<8x128xf32>
    %10 = arith.truncf %9 : vector<8x128xf32> to vector<8x128xbf16>
    %c0_6 = arith.constant 0 : index
    %c0_7 = arith.constant 0 : index
    %11 = vector.load %arg3[%c0_6, %c0_7] : memref<128x256xbf16, #tpu.memory_space<vmem>>, vector<128x256xbf16>
    %cst_8 = arith.constant dense<0.000000e+00> : vector<8x256xf32>
    %12 = tpu.matmul %10, %11, %cst_8 {dimension_numbers = #tpu.dot_dimension_numbers<[1], [0], [0], [1], [0, 0, 1, 1], [], []>} : vector<8x128xbf16>, vector<128x256xbf16>, vector<8x256xf32> -> vector<8x256xf32>
    %c0_9 = arith.constant 0 : index
    %c0_10 = arith.constant 0 : index
    %13 = vector.load %arg4[%c0_9, %c0_10] : memref<1x256xf32, #tpu.memory_space<vmem>>, vector<1x256xf32>
    %14 = vector.broadcast %13 : vector<1x256xf32> to vector<8x256xf32>
    %15 = arith.addf %12, %14 : vector<8x256xf32>
    %c0_11 = arith.constant 0 : index
    %c0_12 = arith.constant 0 : index
    %16 = vector.load %arg5[%c0_11, %c0_12] : memref<1x256xf32, #tpu.memory_space<vmem>>, vector<1x256xf32>
    %c0_13 = arith.constant 0 : index
    %c0_14 = arith.constant 0 : index
    %17 = vector.load %arg6[%c0_13, %c0_14] : memref<1x256xf32, #tpu.memory_space<vmem>>, vector<1x256xf32>
    %cst_15 = arith.constant dense<0.000000e+00> : vector<256xf32>
    %18 = vector.multi_reduction <add>, %15, %cst_15 [0] : vector<8x256xf32> to vector<256xf32>
    %19 = vector.shape_cast %18 : vector<256xf32> to vector<1x256xf32>
    %20 = arith.mulf %15, %15 : vector<8x256xf32>
    %cst_16 = arith.constant dense<0.000000e+00> : vector<256xf32>
    %21 = vector.multi_reduction <add>, %20, %cst_16 [0] : vector<8x256xf32> to vector<256xf32>
    %22 = vector.shape_cast %21 : vector<256xf32> to vector<1x256xf32>
    %cst_17 = arith.constant 8.000000e+00 : f32
    %23 = vector.broadcast %cst_17 : f32 to vector<1x256xf32>
    %24 = arith.divf %19, %23 : vector<1x256xf32>
    %cst_18 = arith.constant 8.000000e+00 : f32
    %25 = vector.broadcast %cst_18 : f32 to vector<1x256xf32>
    %26 = arith.divf %22, %25 : vector<1x256xf32>
    %27 = arith.mulf %24, %24 : vector<1x256xf32>
    %28 = arith.subf %26, %27 : vector<1x256xf32>
    %cst_19 = arith.constant 9.99999974E-6 : f32
    %29 = vector.broadcast %cst_19 : f32 to vector<1x256xf32>
    %30 = arith.addf %28, %29 : vector<1x256xf32>
    %31 = math.rsqrt %30 : vector<1x256xf32>
    %32 = arith.mulf %16, %31 : vector<1x256xf32>
    %33 = arith.mulf %24, %32 : vector<1x256xf32>
    %34 = arith.subf %17, %33 : vector<1x256xf32>
    %35 = vector.broadcast %32 : vector<1x256xf32> to vector<8x256xf32>
    %36 = arith.mulf %15, %35 : vector<8x256xf32>
    %37 = vector.broadcast %34 : vector<1x256xf32> to vector<8x256xf32>
    %38 = arith.addf %36, %37 : vector<8x256xf32>
    %cst_20 = arith.constant 2.000000e-01 : f32
    %39 = vector.broadcast %cst_20 : f32 to vector<8x256xf32>
    %40 = arith.mulf %39, %38 : vector<8x256xf32>
    %41 = arith.maximumf %38, %40 : vector<8x256xf32>
    %42 = arith.truncf %41 : vector<8x256xf32> to vector<8x256xbf16>
    %c0_21 = arith.constant 0 : index
    %c0_22 = arith.constant 0 : index
    %43 = vector.load %arg7[%c0_21, %c0_22] : memref<256x512xbf16, #tpu.memory_space<vmem>>, vector<256x512xbf16>
    %cst_23 = arith.constant dense<0.000000e+00> : vector<8x512xf32>
    %44 = tpu.matmul %42, %43, %cst_23 {dimension_numbers = #tpu.dot_dimension_numbers<[1], [0], [0], [1], [0, 0, 1, 1], [], []>} : vector<8x256xbf16>, vector<256x512xbf16>, vector<8x512xf32> -> vector<8x512xf32>
    %c0_24 = arith.constant 0 : index
    %c0_25 = arith.constant 0 : index
    %45 = vector.load %arg8[%c0_24, %c0_25] : memref<1x512xf32, #tpu.memory_space<vmem>>, vector<1x512xf32>
    %46 = vector.broadcast %45 : vector<1x512xf32> to vector<8x512xf32>
    %47 = arith.addf %44, %46 : vector<8x512xf32>
    %c0_26 = arith.constant 0 : index
    %c0_27 = arith.constant 0 : index
    %48 = vector.load %arg9[%c0_26, %c0_27] : memref<1x512xf32, #tpu.memory_space<vmem>>, vector<1x512xf32>
    %c0_28 = arith.constant 0 : index
    %c0_29 = arith.constant 0 : index
    %49 = vector.load %arg10[%c0_28, %c0_29] : memref<1x512xf32, #tpu.memory_space<vmem>>, vector<1x512xf32>
    %cst_30 = arith.constant dense<0.000000e+00> : vector<512xf32>
    %50 = vector.multi_reduction <add>, %47, %cst_30 [0] : vector<8x512xf32> to vector<512xf32>
    %51 = vector.shape_cast %50 : vector<512xf32> to vector<1x512xf32>
    %52 = arith.mulf %47, %47 : vector<8x512xf32>
    %cst_31 = arith.constant dense<0.000000e+00> : vector<512xf32>
    %53 = vector.multi_reduction <add>, %52, %cst_31 [0] : vector<8x512xf32> to vector<512xf32>
    %54 = vector.shape_cast %53 : vector<512xf32> to vector<1x512xf32>
    %cst_32 = arith.constant 8.000000e+00 : f32
    %55 = vector.broadcast %cst_32 : f32 to vector<1x512xf32>
    %56 = arith.divf %51, %55 : vector<1x512xf32>
    %cst_33 = arith.constant 8.000000e+00 : f32
    %57 = vector.broadcast %cst_33 : f32 to vector<1x512xf32>
    %58 = arith.divf %54, %57 : vector<1x512xf32>
    %59 = arith.mulf %56, %56 : vector<1x512xf32>
    %60 = arith.subf %58, %59 : vector<1x512xf32>
    %cst_34 = arith.constant 9.99999974E-6 : f32
    %61 = vector.broadcast %cst_34 : f32 to vector<1x512xf32>
    %62 = arith.addf %60, %61 : vector<1x512xf32>
    %63 = math.rsqrt %62 : vector<1x512xf32>
    %64 = arith.mulf %48, %63 : vector<1x512xf32>
    %65 = arith.mulf %56, %64 : vector<1x512xf32>
    %66 = arith.subf %49, %65 : vector<1x512xf32>
    %67 = vector.broadcast %64 : vector<1x512xf32> to vector<8x512xf32>
    %68 = arith.mulf %47, %67 : vector<8x512xf32>
    %69 = vector.broadcast %66 : vector<1x512xf32> to vector<8x512xf32>
    %70 = arith.addf %68, %69 : vector<8x512xf32>
    %cst_35 = arith.constant 2.000000e-01 : f32
    %71 = vector.broadcast %cst_35 : f32 to vector<8x512xf32>
    %72 = arith.mulf %71, %70 : vector<8x512xf32>
    %73 = arith.maximumf %70, %72 : vector<8x512xf32>
    %74 = arith.truncf %73 : vector<8x512xf32> to vector<8x512xbf16>
    %c0_36 = arith.constant 0 : index
    %c0_37 = arith.constant 0 : index
    %75 = vector.load %arg11[%c0_36, %c0_37] : memref<512x1024xbf16, #tpu.memory_space<vmem>>, vector<512x1024xbf16>
    %cst_38 = arith.constant dense<0.000000e+00> : vector<8x1024xf32>
    %76 = tpu.matmul %74, %75, %cst_38 {dimension_numbers = #tpu.dot_dimension_numbers<[1], [0], [0], [1], [0, 0, 1, 1], [], []>} : vector<8x512xbf16>, vector<512x1024xbf16>, vector<8x1024xf32> -> vector<8x1024xf32>
    %c0_39 = arith.constant 0 : index
    %c0_40 = arith.constant 0 : index
    %77 = vector.load %arg12[%c0_39, %c0_40] : memref<1x1024xf32, #tpu.memory_space<vmem>>, vector<1x1024xf32>
    %78 = vector.broadcast %77 : vector<1x1024xf32> to vector<8x1024xf32>
    %79 = arith.addf %76, %78 : vector<8x1024xf32>
    %c0_41 = arith.constant 0 : index
    %c0_42 = arith.constant 0 : index
    %80 = vector.load %arg13[%c0_41, %c0_42] : memref<1x1024xf32, #tpu.memory_space<vmem>>, vector<1x1024xf32>
    %c0_43 = arith.constant 0 : index
    %c0_44 = arith.constant 0 : index
    %81 = vector.load %arg14[%c0_43, %c0_44] : memref<1x1024xf32, #tpu.memory_space<vmem>>, vector<1x1024xf32>
    %cst_45 = arith.constant dense<0.000000e+00> : vector<1024xf32>
    %82 = vector.multi_reduction <add>, %79, %cst_45 [0] : vector<8x1024xf32> to vector<1024xf32>
    %83 = vector.shape_cast %82 : vector<1024xf32> to vector<1x1024xf32>
    %84 = arith.mulf %79, %79 : vector<8x1024xf32>
    %cst_46 = arith.constant dense<0.000000e+00> : vector<1024xf32>
    %85 = vector.multi_reduction <add>, %84, %cst_46 [0] : vector<8x1024xf32> to vector<1024xf32>
    %86 = vector.shape_cast %85 : vector<1024xf32> to vector<1x1024xf32>
    %cst_47 = arith.constant 8.000000e+00 : f32
    %87 = vector.broadcast %cst_47 : f32 to vector<1x1024xf32>
    %88 = arith.divf %83, %87 : vector<1x1024xf32>
    %cst_48 = arith.constant 8.000000e+00 : f32
    %89 = vector.broadcast %cst_48 : f32 to vector<1x1024xf32>
    %90 = arith.divf %86, %89 : vector<1x1024xf32>
    %91 = arith.mulf %88, %88 : vector<1x1024xf32>
    %92 = arith.subf %90, %91 : vector<1x1024xf32>
    %cst_49 = arith.constant 9.99999974E-6 : f32
    %93 = vector.broadcast %cst_49 : f32 to vector<1x1024xf32>
    %94 = arith.addf %92, %93 : vector<1x1024xf32>
    %95 = math.rsqrt %94 : vector<1x1024xf32>
    %96 = arith.mulf %80, %95 : vector<1x1024xf32>
    %97 = arith.mulf %88, %96 : vector<1x1024xf32>
    %98 = arith.subf %81, %97 : vector<1x1024xf32>
    %99 = vector.broadcast %96 : vector<1x1024xf32> to vector<8x1024xf32>
    %100 = arith.mulf %79, %99 : vector<8x1024xf32>
    %101 = vector.broadcast %98 : vector<1x1024xf32> to vector<8x1024xf32>
    %102 = arith.addf %100, %101 : vector<8x1024xf32>
    %cst_50 = arith.constant 2.000000e-01 : f32
    %103 = vector.broadcast %cst_50 : f32 to vector<8x1024xf32>
    %104 = arith.mulf %103, %102 : vector<8x1024xf32>
    %105 = arith.maximumf %102, %104 : vector<8x1024xf32>
    %106 = arith.truncf %105 : vector<8x1024xf32> to vector<8x1024xbf16>
    %c0_51 = arith.constant 0 : index
    %c0_52 = arith.constant 0 : index
    %107 = vector.load %arg15[%c0_51, %c0_52] : memref<1024x896xbf16, #tpu.memory_space<vmem>>, vector<1024x896xbf16>
    %cst_53 = arith.constant dense<0.000000e+00> : vector<8x896xf32>
    %108 = tpu.matmul %106, %107, %cst_53 {dimension_numbers = #tpu.dot_dimension_numbers<[1], [0], [0], [1], [0, 0, 1, 1], [], []>} : vector<8x1024xbf16>, vector<1024x896xbf16>, vector<8x896xf32> -> vector<8x896xf32>
    %c0_54 = arith.constant 0 : index
    %c0_55 = arith.constant 0 : index
    %109 = vector.load %arg16[%c0_54, %c0_55] : memref<1x896xf32, #tpu.memory_space<vmem>>, vector<1x896xf32>
    %110 = vector.broadcast %109 : vector<1x896xf32> to vector<8x896xf32>
    %111 = arith.addf %108, %110 : vector<8x896xf32>
    %112 = math.tanh %111 : vector<8x896xf32>
    %c0_56 = arith.constant 0 : index
    %c0_57 = arith.constant 0 : index
    %113 = vector.load %arg17[%c0_56, %c0_57] : memref<8x896xf32, #tpu.memory_space<vmem>>, vector<8x896xf32>
    tpu.vector_store %arg17[%c0_56, %c0_57], %112 {strides = array<i32>} : memref<8x896xf32, #tpu.memory_space<vmem>>, vector<8x896xf32>,
    return
  }
}

</mosaic_0001>

<bundles_post_ra>
// kernel: tpu_custom_call.1
= control target key start
LH: loop header
LB: loop body
LE: loop exit
PB: predicated region body
PF: predicated region fallthrough
CT: control target
= control target key end

     0   :  { %s10140_s0 = inlined_call_operand.hbm [shape: f32[8,128], index: 0, kind: input, shape index: {}]   ;;  %s10141_s1 = inlined_call_operand.hbm [shape: bf16[128,128], index: 1, kind: input, shape index: {}]   ;;  %s10142_s2 = inlined_call_operand.hbm [shape: f32[1,128], index: 2, kind: input, shape index: {}]   ;;  %s10143_s3 = inlined_call_operand.hbm [shape: bf16[128,256], index: 3, kind: input, shape index: {}]   ;;  %s10144_s4 = inlined_call_operand.hbm [shape: f32[1,256], index: 4, kind: input, shape index: {}]   ;;  %s10145_s5 = inlined_call_operand.hbm [shape: f32[1,256], index: 5, kind: input, shape index: {}]   ;;  %s10146_s6 = inlined_call_operand.hbm [shape: f32[1,256], index: 6, kind: input, shape index: {}]   ;;  %s10147_s7 = inlined_call_operand.hbm [shape: bf16[256,512], index: 7, kind: input, shape index: {}]   ;;  %s10148_s8 = inlined_call_operand.hbm [shape: f32[1,512], index: 8, kind: input, shape index: {}]   ;;  %s10149_s9 = inlined_call_operand.hbm [shape: f32[1,512], index: 9, kind: input, shape index: {}]   ;;  %s10150_s10 = inlined_call_operand.hbm [shape: f32[1,512], index: 10, kind: input, shape index: {}]   ;;  %s10151_s11 = inlined_call_operand.hbm [shape: bf16[512,1024], index: 11, kind: input, shape index: {}]   ;;  %s10152_s12 = inlined_call_operand.hbm [shape: f32[1,1024], index: 12, kind: input, shape index: {}]   ;;  %s10153_s13 = inlined_call_operand.hbm [shape: f32[1,1024], index: 13, kind: input, shape index: {}]   ;;  %s10154_s14 = inlined_call_operand.hbm [shape: f32[1,1024], index: 14, kind: input, shape index: {}]   ;;  %s10155_s15 = inlined_call_operand.hbm [shape: bf16[1024,896], index: 15, kind: input, shape index: {}]   ;;  %s10156_s16 = inlined_call_operand.hbm [shape: f32[1,896], index: 16, kind: input, shape index: {}]   ;;  %s10157_s17 = inlined_call_operand.hbm [shape: f32[8,896], index: 17, kind: output, shape index: {}]  }
   0x1   :  { %10161 = sst [smem:[#allocation40_spill]] %s10140_s0 }
   0x2   :  { %10162 = sst [smem:[#allocation41_spill]] %s10141_s1 }
   0x3   :  { %10163 = sst [smem:[#allocation42_spill]] %s10157_s17 }
   0x4   :  { %22 = vsyncpa [#allocation3], 0 }
   0x5   :  { %23 = vsyncpa [#allocation6], 0 }
   0x6   :  { %24 = vsyncpa [#allocation9], 0 }
   0x7   :  { %25 = vsyncpa [#allocation12], 0 }
   0x8   :  { %26 = vsyncpa [#allocation15], 0 }
   0x9   :  { %27 = vsyncpa [#allocation18], 0 }
   0xa   :  { %28 = vsyncpa [#allocation21], 0 }
   0xb   :  { %29 = vsyncpa [#allocation24], 0 }
   0xc   :  { %30 = vsyncpa [#allocation27], 0 }
   0xd   :  { %31 = vsyncpa [#allocation4], 0  ;;  %s9418_s24 = smov [#allocation5]   ;;  %s10164_s28 = sld [smem:[#allocation41_spill]] }
   0xe   :  { %s47_s25 = sshll.u32 %s9418_s24, 4  ;;  %s48_s25 = int_to_ptr.vmem [resolvable:$true] %s47_s25 }
  0x13   :  { %s9002_s29 = scalar_lea.hbm %s10164_s28, 1024 }
  0x14   :  { %p9003_p0 = scmp.ne.s32.totalorder %s10164_s28, %s9002_s29  ;;  %p9006_p1 = scmp.lt.u32.totalorder %s9002_s29, %s10164_s28 }
  0x16   :  { %p9008_p2 = pnand %p9006_p1, %p9003_p0 }
  0x18   :  { %9011 = shalt.err (!%p9008_p2)
}
  0x19   :  { %s9012_s1 = scalar_lea.vmem %s48_s25, 1024  ;;  %p9017_p4 = scmp.lt.s32.totalorder %s48_s25, %s48_s25 }
  0x1a   :  { %p9013_p3 = scmp.ne.s32.totalorder %s48_s25, %s9012_s1  ;;  %p9018_p5 = scmp.lt.s32.totalorder %s9012_s1, %s9012_s1 }
  0x1c   :  { %p9019_p6 = por %p9018_p5, %p9017_p4 }
  0x1e   :  { %p9020_p7 = pnand %p9019_p6, %p9013_p3 }
  0x20   :  { %9023 = shalt.err (!%p9020_p7)
}
  0x21   :  { %s9419_s20 = smov 64   ;;  %s9420_s21 = smov 4  }
  0x22   :  { %53 = dma.hbm_to_vmem [thread:$0]  %s10164_s28, 1024, %s48_s25, [#allocation6], %s9419_s20, %s9419_s20, %s9420_s21  }
  0x23   :  { %s9421_s24 = smov [#allocation8]   ;;  %s9024_s0 = scalar_lea.hbm %s10143_s3, 2048 }
  0x24   :  { %s69_s26 = sshll.u32 %s9421_s24, 4  ;;  %p9025_p8 = scmp.ne.s32.totalorder %s10143_s3, %s9024_s0  ;;  %s70_s26 = int_to_ptr.vmem [resolvable:$true] %s69_s26 }
  0x25   :  { %p9028_p9 = scmp.lt.u32.totalorder %s9024_s0, %s10143_s3 }
  0x27   :  { %p9030_p10 = pnand %p9028_p9, %p9025_p8 }
  0x29   :  { %9033 = shalt.err (!%p9030_p10)
}
  0x2a   :  { %s9034_s17 = scalar_lea.vmem %s70_s26, 2048  ;;  %p9039_p12 = scmp.lt.s32.totalorder %s70_s26, %s70_s26 }
  0x2b   :  { %p9035_p11 = scmp.ne.s32.totalorder %s70_s26, %s9034_s17  ;;  %p9040_p13 = scmp.lt.s32.totalorder %s9034_s17, %s9034_s17 }
  0x2d   :  { %p9041_p0 = por %p9040_p13, %p9039_p12 }
  0x2f   :  { %p9042_p1 = pnand %p9041_p0, %p9035_p11 }
  0x31   :  { %9045 = shalt.err (!%p9042_p1)
}
  0x32   :  { %s9422_s25 = smov 128   ;;  %s9423_s28 = smov 8  }
  0x33   :  { %75 = dma.hbm_to_vmem [thread:$0]  %s10143_s3, 2048, %s70_s26, [#allocation9], %s9422_s25, %s9422_s25, %s9423_s28  }
  0x34   :  { %s9424_s22 = smov [#allocation11]   ;;  %s9425_s24 = smov [#allocation14]  }
  0x35   :  { %s92_s23 = sshll.u32 %s9424_s22, 4  ;;  %s111_s27 = sshll.u32 %s9425_s24, 4  ;;  %s93_s23 = int_to_ptr.vmem [resolvable:$true] %s92_s23  ;;  %s9564_s27 = int_to_ptr.vmem [resolvable:$true] %s111_s27 }
  0x36   :  { %s9046_s17 = scalar_lea.hbm %s10145_s5, 32 }
  0x37   :  { %p9047_p2 = scmp.ne.s32.totalorder %s10145_s5, %s9046_s17  ;;  %p9050_p3 = scmp.lt.u32.totalorder %s9046_s17, %s10145_s5 }
  0x39   :  { %p9052_p4 = pnand %p9050_p3, %p9047_p2 }
  0x3b   :  { %9055 = shalt.err (!%p9052_p4)
}
  0x3c   :  { %s9056_s3 = scalar_lea.vmem %s93_s23, 32  ;;  %p9061_p6 = scmp.lt.s32.totalorder %s93_s23, %s93_s23 }
  0x3d   :  { %p9057_p5 = scmp.ne.s32.totalorder %s93_s23, %s9056_s3  ;;  %p9062_p7 = scmp.lt.s32.totalorder %s9056_s3, %s9056_s3 }
  0x3f   :  { %p9063_p8 = por %p9062_p7, %p9061_p6 }
  0x41   :  { %p9064_p9 = pnand %p9063_p8, %p9057_p5 }
  0x43   :  { %9067 = shalt.err (!%p9064_p9)
}
  0x44   :  { %95 = dma.hbm_to_vmem [thread:$0]  %s10145_s5, 32, %s93_s23, [#allocation12]  }
  0x45   :  { %s9068_s21 = scalar_lea.hbm %s10147_s7, 8192 }
  0x46   :  { %p9069_p10 = scmp.ne.s32.totalorder %s10147_s7, %s9068_s21  ;;  %p9072_p11 = scmp.lt.u32.totalorder %s9068_s21, %s10147_s7 }
  0x48   :  { %p9074_p12 = pnand %p9072_p11, %p9069_p10 }
  0x4a   :  { %9077 = shalt.err (!%p9074_p12)
}
  0x4b   :  { %s9078_s17 = scalar_lea.vmem %s9564_s27, 8192  ;;  %p9083_p0 = scmp.lt.s32.totalorder %s9564_s27, %s9564_s27 }
  0x4c   :  { %p9079_p13 = scmp.ne.s32.totalorder %s9564_s27, %s9078_s17  ;;  %p9084_p1 = scmp.lt.s32.totalorder %s9078_s17, %s9078_s17 }
  0x4e   :  { %p9085_p2 = por %p9084_p1, %p9083_p0 }
  0x50   :  { %p9086_p3 = pnand %p9085_p2, %p9079_p13 }
  0x52   :  { %9089 = shalt.err (!%p9086_p3)
}
  0x53   :  { %s9426_s5 = smov 256   ;;  %s9427_s23 = smov 16  }
  0x54   :  { %117 = dma.hbm_to_vmem [thread:$0]  %s10147_s7, 8192, %s9564_s27, [#allocation15], %s9426_s5, %s9426_s5, %s9427_s23  }
  0x55   :  { %s9428_s19 = smov [#allocation17]   ;;  %s9429_s3 = smov [#allocation20]  }
  0x56   :  { %s134_s1 = sshll.u32 %s9428_s19, 4  ;;  %s153_s26 = sshll.u32 %s9429_s3, 4  ;;  %s135_s1 = int_to_ptr.vmem [resolvable:$true] %s134_s1  ;;  %s9595_s26 = int_to_ptr.vmem [resolvable:$true] %s153_s26 }
  0x57   :  { %s9090_s20 = scalar_lea.hbm %s10149_s9, 64 }
  0x58   :  { %p9091_p4 = scmp.ne.s32.totalorder %s10149_s9, %s9090_s20  ;;  %p9094_p5 = scmp.lt.u32.totalorder %s9090_s20, %s10149_s9 }
  0x5a   :  { %p9096_p6 = pnand %p9094_p5, %p9091_p4 }
  0x5c   :  { %9099 = shalt.err (!%p9096_p6)
}
  0x5d   :  { %s9100_s7 = scalar_lea.vmem %s135_s1, 64  ;;  %p9105_p8 = scmp.lt.s32.totalorder %s135_s1, %s135_s1 }
  0x5e   :  { %p9101_p7 = scmp.ne.s32.totalorder %s135_s1, %s9100_s7  ;;  %p9106_p9 = scmp.lt.s32.totalorder %s9100_s7, %s9100_s7 }
  0x60   :  { %p9107_p10 = por %p9106_p9, %p9105_p8 }
  0x62   :  { %p9108_p11 = pnand %p9107_p10, %p9101_p7 }
  0x64   :  { %9111 = shalt.err (!%p9108_p11)
}
  0x65   :  { %137 = dma.hbm_to_vmem [thread:$0]  %s10149_s9, 64, %s135_s1, [#allocation18]  }
  0x66   :  { %s9112_s23 = scalar_lea.hbm %s10151_s11, 32768 }
  0x67   :  { %p9113_p12 = scmp.ne.s32.totalorder %s10151_s11, %s9112_s23  ;;  %p9116_p13 = scmp.lt.u32.totalorder %s9112_s23, %s10151_s11 }
  0x69   :  { %p9118_p0 = pnand %p9116_p13, %p9113_p12 }
  0x6b   :  { %9121 = shalt.err (!%p9118_p0)
}
  0x6c   :  { %s9122_s25 = scalar_lea.vmem %s9595_s26, 32768  ;;  %p9127_p2 = scmp.lt.s32.totalorder %s9595_s26, %s9595_s26 }
  0x6d   :  { %p9123_p1 = scmp.ne.s32.totalorder %s9595_s26, %s9122_s25  ;;  %p9128_p3 = scmp.lt.s32.totalorder %s9122_s25, %s9122_s25 }
  0x6f   :  { %p9129_p4 = por %p9128_p3, %p9127_p2 }
  0x71   :  { %p9130_p5 = pnand %p9129_p4, %p9123_p1 }
  0x73   :  { %9133 = shalt.err (!%p9130_p5)
}
  0x74   :  { %s9430_s9 = smov 512   ;;  %s9431_s1 = smov 32  }
  0x75   :  { %159 = dma.hbm_to_vmem [thread:$0]  %s10151_s11, 32768, %s9595_s26, [#allocation21], %s9430_s9, %s9430_s9, %s9431_s1  }
  0x76   :  { %s9432_s21 = smov [#allocation23]   ;;  %s9433_s24 = smov [#allocation26]  }
  0x77   :  { %s176_s22 = sshll.u32 %s9432_s21, 4  ;;  %s195_s29 = sshll.u32 %s9433_s24, 4  ;;  %s177_s22 = int_to_ptr.vmem [resolvable:$true] %s176_s22  ;;  %s9626_s29 = int_to_ptr.vmem [resolvable:$true] %s195_s29 }
  0x78   :  { %s9134_s0 = scalar_lea.hbm %s10153_s13, 128 }
  0x79   :  { %p9135_p6 = scmp.ne.s32.totalorder %s10153_s13, %s9134_s0  ;;  %p9138_p7 = scmp.lt.u32.totalorder %s9134_s0, %s10153_s13 }
  0x7b   :  { %p9140_p8 = pnand %p9138_p7, %p9135_p6 }
  0x7d   :  { %9143 = shalt.err (!%p9140_p8)
}
  0x7e   :  { %s9144_s11 = scalar_lea.vmem %s177_s22, 128  ;;  %p9149_p10 = scmp.lt.s32.totalorder %s177_s22, %s177_s22 }
  0x7f   :  { %p9145_p9 = scmp.ne.s32.totalorder %s177_s22, %s9144_s11  ;;  %p9150_p11 = scmp.lt.s32.totalorder %s9144_s11, %s9144_s11 }
  0x81   :  { %p9151_p12 = por %p9150_p11, %p9149_p10 }
  0x83   :  { %p9152_p13 = pnand %p9151_p12, %p9145_p9 }
  0x85   :  { %9155 = shalt.err (!%p9152_p13)
}
  0x86   :  { %179 = dma.hbm_to_vmem [thread:$0]  %s10153_s13, 128, %s177_s22, [#allocation24]  }
  0x87   :  { %s9156_s25 = scalar_lea.hbm %s10155_s15, 57344 }
  0x88   :  { %p9157_p0 = scmp.ne.s32.totalorder %s10155_s15, %s9156_s25  ;;  %p9160_p1 = scmp.lt.u32.totalorder %s9156_s25, %s10155_s15 }
  0x8a   :  { %p9162_p2 = pnand %p9160_p1, %p9157_p0 }
  0x8c   :  { %9165 = shalt.err (!%p9162_p2)
}
  0x8d   :  { %s9166_s21 = scalar_lea.vmem %s9626_s29, 57344  ;;  %p9171_p4 = scmp.lt.s32.totalorder %s9626_s29, %s9626_s29 }
  0x8e   :  { %p9167_p3 = scmp.ne.s32.totalorder %s9626_s29, %s9166_s21  ;;  %p9172_p5 = scmp.lt.s32.totalorder %s9166_s21, %s9166_s21 }
  0x90   :  { %p9173_p6 = por %p9172_p5, %p9171_p4 }
  0x92   :  { %p9174_p7 = pnand %p9173_p6, %p9167_p3 }
  0x94   :  { %9177 = shalt.err (!%p9174_p7)
}
  0x95   :  { %s9434_s13 = smov 448   ;;  %s9435_s22 = smov 28  }
  0x96   :  { %201 = dma.hbm_to_vmem [thread:$0]  %s10155_s15, 57344, %s9626_s29, [#allocation27], %s9434_s13, %s9434_s13, %s9435_s22  }
  0x97   :  { %s9436_s27 = smov [#allocation2]   ;;  %s9437_s17 = smov [#allocation7]  }
  0x98   :  { %s38_s0 = sshll.u32 %s9436_s27, 4  ;;  %s60_s5 = sshll.u32 %s9437_s17, 4  ;;  %s39_s0 = int_to_ptr.vmem [resolvable:$true] %s38_s0  ;;  %s61_s5 = int_to_ptr.vmem [resolvable:$true] %s60_s5 }
  0x99   :  { %s10165_s11 = sld [smem:[#allocation40_spill]] }
  0x9f   :  { %s9178_s26 = scalar_lea.hbm %s10165_s11, 128 }
  0xa0   :  { %p9179_p8 = scmp.ne.s32.totalorder %s10165_s11, %s9178_s26  ;;  %p9182_p9 = scmp.lt.u32.totalorder %s9178_s26, %s10165_s11 }
  0xa2   :  { %p9184_p10 = pnand %p9182_p9, %p9179_p8 }
  0xa4   :  { %9187 = shalt.err (!%p9184_p10)
}
  0xa5   :  { %s9188_s15 = scalar_lea.vmem %s39_s0, 128  ;;  %p9193_p12 = scmp.lt.s32.totalorder %s39_s0, %s39_s0 }
  0xa6   :  { %p9189_p11 = scmp.ne.s32.totalorder %s39_s0, %s9188_s15  ;;  %p9194_p13 = scmp.lt.s32.totalorder %s9188_s15, %s9188_s15 }
  0xa8   :  { %p9195_p0 = por %p9194_p13, %p9193_p12 }
  0xaa   :  { %p9196_p1 = pnand %p9195_p0, %p9189_p11 }
  0xac   :  { %9199 = shalt.err (!%p9196_p1)
}
  0xad   :  { %41 = dma.hbm_to_vmem [thread:$0]  %s10165_s11, 128, %s39_s0, [#allocation3]  }
  0xae   :  { %s9200_s20 = scalar_lea.hbm %s10142_s2, 16 }
  0xaf   :  { %p9201_p2 = scmp.ne.s32.totalorder %s10142_s2, %s9200_s20  ;;  %p9204_p3 = scmp.lt.u32.totalorder %s9200_s20, %s10142_s2 }
  0xb1   :  { %p9206_p4 = pnand %p9204_p3, %p9201_p2 }
  0xb3   :  { %9209 = shalt.err (!%p9206_p4)
}
  0xb4   :  { %s9210_s7 = scalar_lea.vmem %s61_s5, 16  ;;  %s9214_s27 = scalar_lea.vmem %s61_s5, 32 }
  0xb5   :  { %p9211_p5 = scmp.ne.s32.totalorder %s61_s5, %s9210_s7  ;;  %p9215_p6 = scmp.lt.s32.totalorder %s61_s5, %s61_s5 }
  0xb6   :  { %p9216_p7 = scmp.lt.s32.totalorder %s9214_s27, %s9210_s7 }
  0xb8   :  { %p9217_p8 = por %p9216_p7, %p9215_p6 }
  0xba   :  { %p9218_p9 = pnand %p9217_p8, %p9211_p5 }
  0xbc   :  { %9221 = shalt.err (!%p9218_p9)
}
  0xbd   :  { %63 = dma.hbm_to_vmem [thread:$0]  %s10142_s2, 16, %s61_s5, [#allocation6]  }
  0xbe   :  { %s9438_s23 = smov [#allocation10]   ;;  %s9439_s11 = smov [#allocation13]  }
  0xbf   :  { %s82_s30 = sshll.u32 %s9438_s23, 4  ;;  %s102_s26 = sshll.u32 %s9439_s11, 4  ;;  %s83_s30 = int_to_ptr.vmem [resolvable:$true] %s82_s30  ;;  %s103_s26 = int_to_ptr.vmem [resolvable:$true] %s102_s26 }
  0xc0   :  { %s9222_s3 = scalar_lea.hbm %s10144_s4, 32 }
  0xc1   :  { %p9223_p10 = scmp.ne.s32.totalorder %s10144_s4, %s9222_s3  ;;  %p9226_p11 = scmp.lt.u32.totalorder %s9222_s3, %s10144_s4 }
  0xc3   :  { %p9228_p12 = pnand %p9226_p11, %p9223_p10 }
  0xc5   :  { %9231 = shalt.err (!%p9228_p12)
}
  0xc6   :  { %s9232_s2 = scalar_lea.vmem %s83_s30, 32  ;;  %p9237_p0 = scmp.lt.s32.totalorder %s83_s30, %s83_s30 }
  0xc7   :  { %p9233_p13 = scmp.ne.s32.totalorder %s83_s30, %s9232_s2  ;;  %p9238_p1 = scmp.lt.s32.totalorder %s9232_s2, %s9232_s2 }
  0xc9   :  { %p9239_p2 = por %p9238_p1, %p9237_p0 }
  0xcb   :  { %p9240_p3 = pnand %p9239_p2, %p9233_p13 }
  0xcd   :  { %9243 = shalt.err (!%p9240_p3)
}
  0xce   :  { %85 = dma.hbm_to_vmem [thread:$0]  %s10144_s4, 32, %s83_s30, [#allocation9]  }
  0xcf   :  { %s9244_s21 = scalar_lea.hbm %s10146_s6, 32 }
  0xd0   :  { %p9245_p4 = scmp.ne.s32.totalorder %s10146_s6, %s9244_s21  ;;  %p9248_p5 = scmp.lt.u32.totalorder %s9244_s21, %s10146_s6 }
  0xd2   :  { %p9250_p6 = pnand %p9248_p5, %p9245_p4 }
  0xd4   :  { %9253 = shalt.err (!%p9250_p6)
}
  0xd5   :  { %s9254_s27 = scalar_lea.vmem %s103_s26, 32  ;;  %p9259_p8 = scmp.lt.s32.totalorder %s103_s26, %s103_s26 }
  0xd6   :  { %p9255_p7 = scmp.ne.s32.totalorder %s103_s26, %s9254_s27  ;;  %p9260_p9 = scmp.lt.s32.totalorder %s9254_s27, %s9254_s27 }
  0xd8   :  { %p9261_p10 = por %p9260_p9, %p9259_p8 }
  0xda   :  { %p9262_p11 = pnand %p9261_p10, %p9255_p7 }
  0xdc   :  { %9265 = shalt.err (!%p9262_p11)
}
  0xdd   :  { %105 = dma.hbm_to_vmem [thread:$0]  %s10146_s6, 32, %s103_s26, [#allocation12]  }
  0xde   :  { %s9440_s17 = smov [#allocation16]   ;;  %s9441_s30 = smov [#allocation19]  }
  0xdf   :  { %s124_s23 = sshll.u32 %s9440_s17, 4  ;;  %s144_s11 = sshll.u32 %s9441_s30, 4  ;;  %s125_s23 = int_to_ptr.vmem [resolvable:$true] %s124_s23  ;;  %s145_s11 = int_to_ptr.vmem [resolvable:$true] %s144_s11 }
  0xe0   :  { %s9266_s3 = scalar_lea.hbm %s10148_s8, 64 }
  0xe1   :  { %p9267_p12 = scmp.ne.s32.totalorder %s10148_s8, %s9266_s3  ;;  %p9270_p13 = scmp.lt.u32.totalorder %s9266_s3, %s10148_s8 }
  0xe3   :  { %p9272_p0 = pnand %p9270_p13, %p9267_p12 }
  0xe5   :  { %9275 = shalt.err (!%p9272_p0)
}
  0xe6   :  { %s9276_s6 = scalar_lea.vmem %s125_s23, 64  ;;  %p9281_p2 = scmp.lt.s32.totalorder %s125_s23, %s125_s23 }
  0xe7   :  { %p9277_p1 = scmp.ne.s32.totalorder %s125_s23, %s9276_s6  ;;  %p9282_p3 = scmp.lt.s32.totalorder %s9276_s6, %s9276_s6 }
  0xe9   :  { %p9283_p4 = por %p9282_p3, %p9281_p2 }
  0xeb   :  { %p9284_p5 = pnand %p9283_p4, %p9277_p1 }
  0xed   :  { %9287 = shalt.err (!%p9284_p5)
}
  0xee   :  { %127 = dma.hbm_to_vmem [thread:$0]  %s10148_s8, 64, %s125_s23, [#allocation15]  }
  0xef   :  { %s9288_s28 = scalar_lea.hbm %s10150_s10, 64 }
  0xf0   :  { %p9289_p6 = scmp.ne.s32.totalorder %s10150_s10, %s9288_s28  ;;  %p9292_p7 = scmp.lt.u32.totalorder %s9288_s28, %s10150_s10 }
  0xf2   :  { %p9294_p8 = pnand %p9292_p7, %p9289_p6 }
  0xf4   :  { %9297 = shalt.err (!%p9294_p8)
}
  0xf5   :  { %s9298_s24 = scalar_lea.vmem %s145_s11, 64  ;;  %p9303_p10 = scmp.lt.s32.totalorder %s145_s11, %s145_s11 }
  0xf6   :  { %p9299_p9 = scmp.ne.s32.totalorder %s145_s11, %s9298_s24  ;;  %p9304_p11 = scmp.lt.s32.totalorder %s9298_s24, %s9298_s24 }
  0xf8   :  { %p9305_p12 = por %p9304_p11, %p9303_p10 }
  0xfa   :  { %p9306_p13 = pnand %p9305_p12, %p9299_p9 }
  0xfc   :  { %9309 = shalt.err (!%p9306_p13)
}
  0xfd   :  { %147 = dma.hbm_to_vmem [thread:$0]  %s10150_s10, 64, %s145_s11, [#allocation18]  }
  0xfe   :  { %s9442_s27 = smov [#allocation22]   ;;  %s9443_s0 = smov [#allocation25]  }
  0xff   :  { %s166_s4 = sshll.u32 %s9442_s27, 4  ;;  %s186_s17 = sshll.u32 %s9443_s0, 4  ;;  %s167_s4 = int_to_ptr.vmem [resolvable:$true] %s166_s4  ;;  %s187_s17 = int_to_ptr.vmem [resolvable:$true] %s186_s17 }
 0x100   :  { %s9310_s18 = scalar_lea.hbm %s10152_s12, 128 }
 0x101   :  { %p9311_p0 = scmp.ne.s32.totalorder %s10152_s12, %s9310_s18  ;;  %p9314_p1 = scmp.lt.u32.totalorder %s9310_s18, %s10152_s12 }
 0x103   :  { %p9316_p2 = pnand %p9314_p1, %p9311_p0 }
 0x105   :  { %9319 = shalt.err (!%p9316_p2)
}
 0x106   :  { %s9320_s10 = scalar_lea.vmem %s167_s4, 128  ;;  %p9325_p4 = scmp.lt.s32.totalorder %s167_s4, %s167_s4 }
 0x107   :  { %p9321_p3 = scmp.ne.s32.totalorder %s167_s4, %s9320_s10  ;;  %p9326_p5 = scmp.lt.s32.totalorder %s9320_s10, %s9320_s10 }
 0x109   :  { %p9327_p6 = por %p9326_p5, %p9325_p4 }
 0x10b   :  { %p9328_p7 = pnand %p9327_p6, %p9321_p3 }
 0x10d   :  { %9331 = shalt.err (!%p9328_p7)
}
 0x10e   :  { %169 = dma.hbm_to_vmem [thread:$0]  %s10152_s12, 128, %s167_s4, [#allocation21]  }
 0x10f   :  { %s9332_s26 = scalar_lea.hbm %s10154_s14, 128 }
 0x110   :  { %p9333_p8 = scmp.ne.s32.totalorder %s10154_s14, %s9332_s26  ;;  %p9336_p9 = scmp.lt.u32.totalorder %s9332_s26, %s10154_s14 }
 0x112   :  { %p9338_p10 = pnand %p9336_p9, %p9333_p8 }
 0x114   :  { %9341 = shalt.err (!%p9338_p10)
}
 0x115   :  { %s9342_s20 = scalar_lea.vmem %s187_s17, 128  ;;  %p9347_p12 = scmp.lt.s32.totalorder %s187_s17, %s187_s17 }
 0x116   :  { %p9343_p11 = scmp.ne.s32.totalorder %s187_s17, %s9342_s20  ;;  %p9348_p13 = scmp.lt.s32.totalorder %s9342_s20, %s9342_s20 }
 0x118   :  { %p9349_p0 = por %p9348_p13, %p9347_p12 }
 0x11a   :  { %p9350_p1 = pnand %p9349_p0, %p9343_p11 }
 0x11c   :  { %9353 = shalt.err (!%p9350_p1)
}
 0x11d   :  { %189 = dma.hbm_to_vmem [thread:$0]  %s10154_s14, 128, %s187_s17, [#allocation24]  }
 0x11e   :  { %s9444_s13 = smov [#allocation28]   ;;  %s9354_s7 = scalar_lea.hbm %s10156_s16, 112 }
 0x11f   :  { %s208_s22 = sshll.u32 %s9444_s13, 4  ;;  %p9355_p2 = scmp.ne.s32.totalorder %s10156_s16, %s9354_s7  ;;  %s209_s22 = int_to_ptr.vmem [resolvable:$true] %s208_s22 }
 0x120   :  { %p9358_p3 = scmp.lt.u32.totalorder %s9354_s7, %s10156_s16 }
 0x122   :  { %p9360_p4 = pnand %p9358_p3, %p9355_p2 }
 0x124   :  { %9363 = shalt.err (!%p9360_p4)
}
 0x125   :  { %s9364_s30 = scalar_lea.vmem %s209_s22, 112  ;;  %s9368_s14 = scalar_lea.vmem %s209_s22, 128 }
 0x126   :  { %p9365_p5 = scmp.ne.s32.totalorder %s209_s22, %s9364_s30  ;;  %p9369_p6 = scmp.lt.s32.totalorder %s209_s22, %s209_s22 }
 0x127   :  { %p9370_p7 = scmp.lt.s32.totalorder %s9368_s14, %s9364_s30 }
 0x129   :  { %p9371_p8 = por %p9370_p7, %p9369_p6 }
 0x12b   :  { %p9372_p9 = pnand %p9371_p8, %p9365_p5 }
 0x12d   :  { %9375 = shalt.err (!%p9372_p9)
}
 0x12e   :  { %211 = dma.hbm_to_vmem [thread:$0]  %s10156_s16, 112, %s209_s22, [#allocation27]  }
 0x12f   :  { %9398 = dma.done.wait [#allocation3], 128  }
 0x130   :  { %9399 = vsyncadd [#allocation3], 4294967168 }
 0x131   :  { %9400 = dma.done.wait [#allocation6], 1040  }
 0x132   :  { %9401 = vsyncadd [#allocation6], 4294966256 }
 0x133   :  { %9402 = dma.done.wait [#allocation9], 2080  }
 0x134   :  { %9403 = vsyncadd [#allocation9], 4294965216 }
 0x135   :  { %9404 = dma.done.wait [#allocation12], 64  }
 0x136   :  { %9405 = vsyncadd [#allocation12], 4294967232 }
 0x137   :  { %9406 = dma.done.wait [#allocation15], 8256  }
 0x138   :  { %9407 = vsyncadd [#allocation15], 4294959040 }
 0x139   :  { %9408 = dma.done.wait [#allocation18], 128  }
 0x13a   :  { %9409 = vsyncadd [#allocation18], 4294967168 }
 0x13b   :  { %9410 = dma.done.wait [#allocation21], 32896  }
 0x13c   :  { %9411 = vsyncadd [#allocation21], 4294934400 }
 0x13d   :  { %9412 = dma.done.wait [#allocation24], 256  }
 0x13e   :  { %9413 = vsyncadd [#allocation24], 4294967040 }
 0x13f   :  { %9414 = dma.done.wait [#allocation27], 57456  }
 0x140   :  { %9415 = vsyncadd [#allocation27], 4294909840  ;;  %v9445_v0 = vmov 0.0   ;;  %vm9446_vm0 = vmmov 0   ;;  %v8192_v1 = vld [vmem:[#allocation5] sm:$0xff]   ;;  %v8193_v2 = vld [vmem:[#allocation5 + $0x8] sm:$0xff]  }
 0x141   :  { %8074 = vmatprep.subr.bf16.mxu0 %v9445_v0  ;;  %8090 = vmatprep.mubr.msk.bf16.mxu0 %vm9446_vm0, %v9445_v0  ;;  %v8194_v3 = vld [vmem:[#allocation5 + $0x10] sm:$0xff]   ;;  %v8202_v5 = vld [vmem:[#allocation8] ss:$8 sps:$4 sm:$0xff]   ;;  %v8195_v6 = vld [vmem:[#allocation5 + $0x18] sm:$0xff]   ;;  %v9447_v27 = vmov 0   ;;  %s9449_s16 = smov [#allocation29]  }
 0x142   :  { %8075 = vmatpush3.bf16.msra.mxu0 %v8192_v1  ;;  %v8200_v4 = vld [vmem:[#allocation8 + $0x4] ss:$8 sps:$4 sm:$0xff]   ;;  %v8203_v7 = vld [vmem:[#allocation8 + $0x14] ss:$8 sps:$4 sm:$0xff]   ;;  %v8205_v8 = vld [vmem:[#allocation8 + $0x10] ss:$8 sps:$4 sm:$0xff]   ;;  %520 = vmatprep.mubr.bf16.mxu1 %v9447_v27 }
 0x143   :  { %8076 = vmatprep.subr.bf16.mxu0 %v9445_v0  ;;  %488 = vmatprep.subr.bf16.mxu1 %v8200_v4  ;;  %v8206_v9 = vld [vmem:[#allocation8 + $0x24] ss:$8 sps:$4 sm:$0xff]   ;;  %v8208_v12 = vld [vmem:[#allocation8 + $0x20] ss:$8 sps:$4 sm:$0xff]   ;;  %v8209_v13 = vld [vmem:[#allocation8 + $0x34] ss:$8 sps:$4 sm:$0xff]  }
 0x144   :  { %489 = vmatpush1.bf16.msra.mxu1 %v8202_v5  ;;  %v8196_v10 = vld [vmem:[#allocation5 + $0x20] sm:$0xff]   ;;  %v8197_v11 = vld [vmem:[#allocation5 + $0x28] sm:$0xff]   ;;  %v8211_v14 = vld [vmem:[#allocation8 + $0x30] ss:$8 sps:$4 sm:$0xff]   ;;  %s7167_s19 = sshll.u32 %s9449_s16, 4  ;;  %s7168_s19 = int_to_ptr.vmem [resolvable:$true] %s7167_s19 }
 0x145   :  { %490 = vmatprep.subr.bf16.mxu1 %v8203_v7  ;;  %v8212_v15 = vld [vmem:[#allocation8 + $0x44] ss:$8 sps:$4 sm:$0xff]   ;;  %v8214_v17 = vld [vmem:[#allocation8 + $0x40] ss:$8 sps:$4 sm:$0xff]   ;;  %v8215_v18 = vld [vmem:[#allocation8 + $0x54] ss:$8 sps:$4 sm:$0xff]   ;;  %p9381_p11 = scmp.lt.s32.totalorder %s7168_s19, %s7168_s19 }
 0x146   :  { %8077 = vmatpush3.bf16.msra.mxu0 %v8193_v2  ;;  %v8198_v16 = vld [vmem:[#allocation5 + $0x30] sm:$0xff]   ;;  %v8199_v19 = vld [vmem:[#allocation5 + $0x38] sm:$0xff]   ;;  %v8220_v24 = vld [vmem:[#allocation8 + $0x60] ss:$8 sps:$4 sm:$0xff]   ;;  %s9376_s3 = scalar_lea.vmem %s7168_s19, 896 }
 0x147   :  { %8078 = vmatprep.subr.bf16.mxu0 %v9445_v0  ;;  %v264_v20 = vld [vmem:[#allocation2] sm:$0xff]  ;;  %v8218_v23 = vld [vmem:[#allocation8 + $0x64] ss:$8 sps:$4 sm:$0xff]   ;;  %v7184_v28 = vld [vmem:[#allocation7] ss:$0 sm:$0xff]  ;;  %p9377_p10 = scmp.ne.s32.totalorder %s7168_s19, %s9376_s3  ;;  %p9382_p12 = scmp.lt.s32.totalorder %s9376_s3, %s9376_s3 }
 0x148   :  { %491 = vmatpush1.bf16.msra.mxu1 %v8205_v8  ;;  %v8217_v21 = vld [vmem:[#allocation8 + $0x50] ss:$8 sps:$4 sm:$0xff]   ;;  %v265_v22 = vpack.c.bf16 %v264_v20, %v264_v20  ;;  %v8221_v25 = vld [vmem:[#allocation8 + $0x74] ss:$8 sps:$4 sm:$0xff]  }
 0x149   :  { %492 = vmatprep.subr.bf16.mxu1 %v8206_v9  ;;  %v8223_v26 = vld [vmem:[#allocation8 + $0x70] ss:$8 sps:$4 sm:$0xff]   ;;  %v396_v9 = vld [vmem:[#allocation10] sm:$0x3]  ;;  %p9383_p13 = por %p9382_p12, %p9381_p11 }
 0x14a   :  { %8079 = vmatpush3.bf16.msra.mxu0 %v8194_v3  ;;  %v8226_v37 = vld [vmem:[#allocation14 + $0x4] ss:$16 sps:$4 sm:$0xff]   ;;  %v8224_v38 = vld [vmem:[#allocation14] ss:$16 sps:$4 sm:$0xff]   ;;  %v8274_v5 = vld [vmem:[#allocation14 + $0xc] ss:$16 sps:$4 sm:$0xff]  }
 0x14b   :  { %8080 = vmatprep.subr.bf16.mxu0 %v9445_v0  ;;  %v8229_v39 = vld [vmem:[#allocation14 + $0x24] ss:$16 sps:$4 sm:$0xff]   ;;  %v8227_v40 = vld [vmem:[#allocation14 + $0x20] ss:$16 sps:$4 sm:$0xff]   ;;  %p9384_p0 = pnand %p9383_p13, %p9377_p10 }
 0x14c   :  { %493 = vmatpush1.bf16.msra.mxu1 %v8208_v12  ;;  %v8232_v41 = vld [vmem:[#allocation14 + $0x44] ss:$16 sps:$4 sm:$0xff]   ;;  %v8230_v42 = vld [vmem:[#allocation14 + $0x40] ss:$16 sps:$4 sm:$0xff]  }
 0x14d   :  { %494 = vmatprep.subr.bf16.mxu1 %v8209_v13  ;;  %v8235_v43 = vld [vmem:[#allocation14 + $0x64] ss:$16 sps:$4 sm:$0xff]   ;;  %v8233_v44 = vld [vmem:[#allocation14 + $0x60] ss:$16 sps:$4 sm:$0xff]  }
 0x14e   :  { %8081 = vmatpush3.bf16.msra.mxu0 %v8195_v6  ;;  %v8238_v45 = vld [vmem:[#allocation14 + $0x84] ss:$16 sps:$4 sm:$0xff]   ;;  %v8236_v46 = vld [vmem:[#allocation14 + $0x80] ss:$16 sps:$4 sm:$0xff]   ;;  %v398_v6 = vlaneseq }
 0x14f   :  { %8082 = vmatprep.subr.bf16.mxu0 %v9445_v0  ;;  %v8241_v47 = vld [vmem:[#allocation14 + $0xa4] ss:$16 sps:$4 sm:$0xff]   ;;  %v8239_v48 = vld [vmem:[#allocation14 + $0xa0] ss:$16 sps:$4 sm:$0xff]  }
 0x150   :  { %495 = vmatpush1.bf16.msra.mxu1 %v8211_v14  ;;  %v8244_v49 = vld [vmem:[#allocation14 + $0xc4] ss:$16 sps:$4 sm:$0xff]   ;;  %v8242_v50 = vld [vmem:[#allocation14 + $0xc0] ss:$16 sps:$4 sm:$0xff]   ;;  %v9765_v7 = vshrl.u32 %v398_v6, 7 }
 0x151   :  { %496 = vmatprep.subr.bf16.mxu1 %v8212_v15  ;;  %v8247_v51 = vld [vmem:[#allocation14 + $0xe4] ss:$16 sps:$4 sm:$0xff]   ;;  %v8245_v52 = vld [vmem:[#allocation14 + $0xe0] ss:$16 sps:$4 sm:$0xff]  }
 0x152   :  { %8083 = vmatpush3.bf16.msra.mxu0 %v8196_v10  ;;  %v8250_v53 = vld [vmem:[#allocation14 + $0x104] ss:$16 sps:$4 sm:$0xff]   ;;  %v8248_v54 = vld [vmem:[#allocation14 + $0x100] ss:$16 sps:$4 sm:$0xff]   ;;  %v9768_v8 = vsub.s32 0, %v9765_v7  ;;  %v9771_v10 = vsub.s32 1, %v9765_v7 }
 0x153   :  { %8084 = vmatprep.subr.bf16.mxu0 %v9445_v0  ;;  %v8253_v55 = vld [vmem:[#allocation14 + $0x124] ss:$16 sps:$4 sm:$0xff]   ;;  %v8251_v56 = vld [vmem:[#allocation14 + $0x120] ss:$16 sps:$4 sm:$0xff]  }
 0x154   :  { %497 = vmatpush1.bf16.msra.mxu1 %v8214_v17  ;;  %v8256_v57 = vld [vmem:[#allocation14 + $0x144] ss:$16 sps:$4 sm:$0xff]   ;;  %v8254_v58 = vld [vmem:[#allocation14 + $0x140] ss:$16 sps:$4 sm:$0xff]   ;;  %v405_v12 = vrot.slane %v396_v9, %v9771_v10 }
 0x155   :  { %498 = vmatprep.subr.bf16.mxu1 %v8215_v18  ;;  %v8259_v59 = vld [vmem:[#allocation14 + $0x164] ss:$16 sps:$4 sm:$0xff]   ;;  %v8257_v60 = vld [vmem:[#allocation14 + $0x160] ss:$16 sps:$4 sm:$0xff]  }
 0x156   :  { %8085 = vmatpush3.bf16.msra.mxu0 %v8197_v11  ;;  %v8262_v61 = vld [vmem:[#allocation14 + $0x184] ss:$16 sps:$4 sm:$0xff]   ;;  %v8260_v62 = vld [vmem:[#allocation14 + $0x180] ss:$16 sps:$4 sm:$0xff]   ;;  %v401_v11 = vrot.slane %v396_v9, %v9768_v8 }
 0x157   :  { %8086 = vmatprep.subr.bf16.mxu0 %v9445_v0  ;;  %v8265_v63 = vld [vmem:[#allocation14 + $0x1a4] ss:$16 sps:$4 sm:$0xff]   ;;  %v8266_v2 = vld [vmem:[#allocation14 + $0x1c0] ss:$16 sps:$4 sm:$0xff]  }
 0x158   :  { %499 = vmatpush1.bf16.msra.mxu1 %v8217_v21  ;;  %v8268_v1 = vld [vmem:[#allocation14 + $0x1c4] ss:$16 sps:$4 sm:$0xff]   ;;  %v8269_v4 = vld [vmem:[#allocation14 + $0x1e0] ss:$16 sps:$4 sm:$0xff]  }
 0x159   :  { %500 = vmatprep.subr.bf16.mxu1 %v8218_v23  ;;  %v8271_v3 = vld [vmem:[#allocation14 + $0x1e4] ss:$16 sps:$4 sm:$0xff]  }
 0x15a   :  { %8087 = vmatpush3.bf16.msra.mxu0 %v8198_v16 }
 0x15b   :  { %8088 = vmatprep.subr.bf16.mxu0 %v9445_v0  ;;  %v8263_v0 = vld [vmem:[#allocation14 + $0x1a0] ss:$16 sps:$4 sm:$0xff]  }
 0x15c   :  { %501 = vmatpush1.bf16.msra.mxu1 %v8220_v24 }
 0x15d   :  { %502 = vmatprep.subr.bf16.mxu1 %v8221_v25 }
 0x15e   :  { %8089 = vmatpush3.bf16.msra.mxu0 %v8199_v19 }
 0x160   :  { %503 = vmatpush1.bf16.msra.mxu1 %v8223_v26 }
 0x161   :  { %8091 = vmatmul.mubr.bf16.vlgmr.msra.gmra.mrb[0].mxu0 %v265_v22  ;;  %1048 = vmatprep.subr.bf16.mxu1 %v8226_v37 }
 0x234   :  { %v371_v29 = vpop.f32.mrb[0].mxu0 }
 0x235   :  { %v372_v30 = vadd.f32 %v7184_v28, %v371_v29  ;;  %v8092_v31 = vpop.f32.mrb[1].mxu0 }
 0x236   :  { %v374_v32 = vpop.f32.mrb[2].mxu0 }
 0x237   :  { %v377_v33 = vmul.f32 0.2, %v372_v30  ;;  %v8093_v34 = vpop.f32.mrb[3].mxu0 }
 0x239   :  { %v378_v35 = vmax.f32 %v372_v30, %v377_v33 }
 0x23b   :  { %v379_v36 = vpack.c.bf16 %v378_v35, %v378_v35 }
 0x23d   :  { %521 = vmatmul.mubr.bf16.vlgmr.msra.gmra.mrb[0].mxu1 %v379_v36 }
 0x23e   :  { %1049 = vmatpush1.bf16.msra.mxu1 %v8224_v38 }
 0x23f   :  { %1050 = vmatprep.subr.bf16.mxu1 %v8229_v39 }
 0x242   :  { %1051 = vmatpush1.bf16.msra.mxu1 %v8227_v40 }
 0x243   :  { %1052 = vmatprep.subr.bf16.mxu1 %v8232_v41 }
 0x246   :  { %1053 = vmatpush1.bf16.msra.mxu1 %v8230_v42 }
 0x247   :  { %1054 = vmatprep.subr.bf16.mxu1 %v8235_v43 }
 0x24a   :  { %1055 = vmatpush1.bf16.msra.mxu1 %v8233_v44 }
 0x24b   :  { %1056 = vmatprep.subr.bf16.mxu1 %v8238_v45 }
 0x24e   :  { %1057 = vmatpush1.bf16.msra.mxu1 %v8236_v46 }
 0x24f   :  { %1058 = vmatprep.subr.bf16.mxu1 %v8241_v47 }
 0x252   :  { %1059 = vmatpush1.bf16.msra.mxu1 %v8239_v48 }
 0x253   :  { %1060 = vmatprep.subr.bf16.mxu1 %v8244_v49 }
 0x256   :  { %1061 = vmatpush1.bf16.msra.mxu1 %v8242_v50 }
 0x257   :  { %1062 = vmatprep.subr.bf16.mxu1 %v8247_v51 }
 0x25a   :  { %1063 = vmatpush1.bf16.msra.mxu1 %v8245_v52 }
 0x25b   :  { %1064 = vmatprep.subr.bf16.mxu1 %v8250_v53 }
 0x25e   :  { %1065 = vmatpush1.bf16.msra.mxu1 %v8248_v54 }
 0x25f   :  { %1066 = vmatprep.subr.bf16.mxu1 %v8253_v55  ;;  %v9448_v55 = vmov 1966171168  }
 0x262   :  { %1067 = vmatpush1.bf16.msra.mxu1 %v8251_v56  ;;  %v574_v56 = vunpack.c.l.s4 %v9448_v55  ;;  %v8319_v55 = vld [vmem:[#allocation14 + $0x1ec] ss:$16 sps:$4 sm:$0xff]  }
 0x263   :  { %1068 = vmatprep.subr.bf16.mxu1 %v8256_v57 }
 0x264   :  { %v575_v57 = vunpack.c.0.s8 %v574_v56  ;;  %v8317_v56 = vld [vmem:[#allocation14 + $0x1e8] ss:$16 sps:$4 sm:$0xff]  }
 0x266   :  { %1069 = vmatpush1.bf16.msra.mxu1 %v8254_v58 }
 0x267   :  { %1070 = vmatprep.subr.bf16.mxu1 %v8259_v59  ;;  %v9776_v59 = vsub.s32 %v575_v57, %v9765_v7  ;;  %v1334_v57 = vld [vmem:[#allocation20] sm:$0xff] }
 0x26a   :  { %1071 = vmatpush1.bf16.msra.mxu1 %v8257_v60 }
 0x26b   :  { %1072 = vmatprep.subr.bf16.mxu1 %v8262_v61 }
 0x26e   :  { %1073 = vmatpush1.bf16.msra.mxu1 %v8260_v62 }
 0x26f   :  { %1074 = vmatprep.subr.bf16.mxu1 %v8265_v63  ;;  %v529_v63 = vld [vmem:[#allocation11] sm:$0x3] }
 0x272   :  { %1075 = vmatpush1.bf16.msra.mxu1 %v8263_v0 }
 0x273   :  { %1076 = vmatprep.subr.bf16.mxu1 %v8268_v1 }
 0x276   :  { %1077 = vmatpush1.bf16.msra.mxu1 %v8266_v2 }
 0x277   :  { %1078 = vmatprep.subr.bf16.mxu1 %v8271_v3 }
 0x27a   :  { %1079 = vmatpush1.bf16.msra.mxu1 %v8269_v4 }
 0x27b   :  { %1089 = vmatprep.subr.bf16.mxu1 %v8274_v5 }
 0x310   :  { %v522_v13 = vpop.f32.mrb[0].mxu1 }
 0x311   :  { %v523_v14 = vadd.f32 %v522_v13, %v401_v11  ;;  %v524_v15 = vpop.f32.mrb[1].mxu1  ;;  %v530_v13 = vld [vmem:[#allocation13] sm:$0x3] }
 0x312   :  { %v525_v16 = vadd.f32 %v524_v15, %v405_v12  ;;  %v526_v17 = vpop.f32.mrb[2].mxu1 }
 0x313   :  { %v531_v18 = vrot.slane %v523_v14, 4  ;;  %v543_v19 = vmul.f32 %v523_v14, %v523_v14  ;;  %v527_v20 = vpop.f32.mrb[3].mxu1 }
 0x314   :  { %v537_v21 = vrot.slane %v525_v16, 4  ;;  %v544_v22 = vmul.f32 %v525_v16, %v525_v16 }
 0x315   :  { %v532_v23 = vadd.f32 %v531_v18, %v523_v14  ;;  %v545_v24 = vrot.slane %v543_v19, 4 }
 0x316   :  { %v538_v25 = vadd.f32 %v537_v21, %v525_v16  ;;  %v551_v26 = vrot.slane %v544_v22, 4 }
 0x317   :  { %v533_v27 = vrot.slane %v532_v23, 2  ;;  %v546_v28 = vadd.f32 %v545_v24, %v543_v19 }
 0x318   :  { %v539_v29 = vrot.slane %v538_v25, 2  ;;  %v552_v30 = vadd.f32 %v551_v26, %v544_v22 }
 0x319   :  { %v534_v31 = vadd.f32 %v533_v27, %v532_v23  ;;  %v547_v32 = vrot.slane %v546_v28, 2  ;;  %v8277_v27 = vld [vmem:[#allocation14 + $0x2c] ss:$16 sps:$4 sm:$0xff]  }
 0x31a   :  { %v540_v33 = vadd.f32 %v539_v29, %v538_v25  ;;  %v553_v34 = vrot.slane %v552_v30, 2  ;;  %v8280_v29 = vld [vmem:[#allocation14 + $0x4c] ss:$16 sps:$4 sm:$0xff]  }
 0x31b   :  { %v535_v35 = vrot.slane %v534_v31, 1  ;;  %v548_v36 = vadd.f32 %v547_v32, %v546_v28  ;;  %v8275_v28 = vld [vmem:[#allocation14 + $0x28] ss:$16 sps:$4 sm:$0xff]  }
 0x31c   :  { %v541_v37 = vrot.slane %v540_v33, 1  ;;  %v554_v38 = vadd.f32 %v553_v34, %v552_v30  ;;  %v8278_v30 = vld [vmem:[#allocation14 + $0x48] ss:$16 sps:$4 sm:$0xff]  }
 0x31d   :  { %v536_v39 = vadd.f32 %v535_v35, %v534_v31  ;;  %v549_v40 = vrot.slane %v548_v36, 1  ;;  %v8283_v31 = vld [vmem:[#allocation14 + $0x6c] ss:$16 sps:$4 sm:$0xff]   ;;  %v8281_v32 = vld [vmem:[#allocation14 + $0x68] ss:$16 sps:$4 sm:$0xff]  }
 0x31e   :  { %v542_v41 = vadd.f32 %v541_v37, %v540_v33  ;;  %v555_v42 = vrot.slane %v554_v38, 1  ;;  %v8286_v33 = vld [vmem:[#allocation14 + $0x8c] ss:$16 sps:$4 sm:$0xff]   ;;  %v8284_v34 = vld [vmem:[#allocation14 + $0x88] ss:$16 sps:$4 sm:$0xff]  }
 0x31f   :  { %v550_v43 = vadd.f32 %v549_v40, %v548_v36  ;;  %v558_v44 = vmul.f32 0.125, %v536_v39  ;;  %v8289_v35 = vld [vmem:[#allocation14 + $0xac] ss:$16 sps:$4 sm:$0xff]   ;;  %v8287_v36 = vld [vmem:[#allocation14 + $0xa8] ss:$16 sps:$4 sm:$0xff]  }
 0x320   :  { %v556_v45 = vadd.f32 %v555_v42, %v554_v38  ;;  %v559_v46 = vmul.f32 0.125, %v542_v41  ;;  %v8292_v37 = vld [vmem:[#allocation14 + $0xcc] ss:$16 sps:$4 sm:$0xff]   ;;  %v8290_v38 = vld [vmem:[#allocation14 + $0xc8] ss:$16 sps:$4 sm:$0xff]  }
 0x321   :  { %v560_v47 = vmul.f32 0.125, %v550_v43  ;;  %v562_v48 = vmul.f32 %v558_v44, %v558_v44  ;;  %v8295_v39 = vld [vmem:[#allocation14 + $0xec] ss:$16 sps:$4 sm:$0xff]   ;;  %v8293_v40 = vld [vmem:[#allocation14 + $0xe8] ss:$16 sps:$4 sm:$0xff]  }
 0x322   :  { %v561_v49 = vmul.f32 0.125, %v556_v45  ;;  %v563_v50 = vmul.f32 %v559_v46, %v559_v46  ;;  %v8298_v41 = vld [vmem:[#allocation14 + $0x10c] ss:$16 sps:$4 sm:$0xff]   ;;  %v8296_v42 = vld [vmem:[#allocation14 + $0x108] ss:$16 sps:$4 sm:$0xff]  }
 0x323   :  { %v564_v51 = vsub.f32 %v560_v47, %v562_v48  ;;  %v8301_v43 = vld [vmem:[#allocation14 + $0x12c] ss:$16 sps:$4 sm:$0xff]   ;;  %v8305_v48 = vld [vmem:[#allocation14 + $0x168] ss:$16 sps:$4 sm:$0xff]  }
 0x324   :  { %v565_v52 = vsub.f32 %v561_v49, %v563_v50  ;;  %v8304_v45 = vld [vmem:[#allocation14 + $0x14c] ss:$16 sps:$4 sm:$0xff]   ;;  %v8308_v50 = vld [vmem:[#allocation14 + $0x188] ss:$16 sps:$4 sm:$0xff]  }
 0x325   :  { %v566_v53 = vadd.f32 1e-05, %v564_v51  ;;  %v8307_v47 = vld [vmem:[#allocation14 + $0x16c] ss:$16 sps:$4 sm:$0xff]  }
 0x326   :  { %v567_v54 = vadd.f32 1e-05, %v565_v52  ;;  %v8310_v49 = vld [vmem:[#allocation14 + $0x18c] ss:$16 sps:$4 sm:$0xff]   ;;  %v8311_v52 = vld [vmem:[#allocation14 + $0x1a8] ss:$16 sps:$4 sm:$0xff]  }
 0x327   :  { %8960 = vrsqrt.f32 %v566_v53  ;;  %v8313_v51 = vld [vmem:[#allocation14 + $0x1ac] ss:$16 sps:$4 sm:$0xff]  }
 0x328   :  { %8962 = vrsqrt.f32 %v567_v54  ;;  %v8316_v53 = vld [vmem:[#allocation14 + $0x1cc] ss:$16 sps:$4 sm:$0xff]   ;;  %v8314_v54 = vld [vmem:[#allocation14 + $0x1c8] ss:$16 sps:$4 sm:$0xff]  }
 0x331   :  { %v8961_v58 = vpop.eup %8960 }
 0x332   :  { %v8963_v60 = vpop.eup %8962 }
 0x333   :  { %v572_v61 = vcombine.low %v8961_v58, %v8963_v60  ;;  %v1338_v58 = vld [vmem:[#allocation20 + $0x20] sm:$0xff]  ;;  %v1335_v60 = vld [vmem:[#allocation20 + $0x8] sm:$0xff] }
 0x335   :  { %v579_v62 = vrot.slane %v572_v61, %v9776_v59  ;;  %v7274_v61 = vcombine.high %v1334_v57, %v1338_v58 }
 0x337   :  { %v586_v0 = vrot.slane %v579_v62, %v9776_v59  ;;  %v1339_v62 = vld [vmem:[#allocation20 + $0x28] sm:$0xff]  ;;  %2912 = vmatprep.subr.bf16.mxu0 %v7274_v61 }
 0x339   :  { %v588_v1 = vmul.f32 %v586_v0, %v529_v63  ;;  %v7273_v63 = vcombine.low %v1334_v57, %v1338_v58  ;;  %v7275_v0 = vcombine.low %v1335_v60, %v1339_v62  ;;  %v1395_v57 = vld [vmem:[#allocation20 + $0x1e8] sm:$0xff] }
 0x33b   :  { %v593_v2 = vrot.slane %v588_v1, %v9768_v8  ;;  %v597_v3 = vrot.slane %v588_v1, %v9771_v10  ;;  %v7276_v1 = vcombine.high %v1335_v60, %v1339_v62  ;;  %2913 = vmatpush1.bf16.msra.mxu0 %v7273_v63  ;;  %v1398_v62 = vld [vmem:[#allocation20 + $0x200] sm:$0xff] }
 0x33c   :  { %v1402_v63 = vld [vmem:[#allocation20 + $0x220] sm:$0xff] }
 0x33d   :  { %v600_v4 = vmul.f32 %v593_v2, %v558_v44  ;;  %v601_v5 = vmul.f32 %v597_v3, %v559_v46  ;;  %v622_v6 = vmul.f32 %v597_v3, %v525_v16  ;;  %v621_v9 = vmul.f32 %v593_v2, %v523_v14  ;;  %v8272_v16 = vld [vmem:[#allocation14 + $0x8] ss:$16 sps:$4 sm:$0xff]   ;;  %v1342_v2 = vld [vmem:[#allocation20 + $0x40] sm:$0xff] }
 0x33e   :  { %v8299_v44 = vld [vmem:[#allocation14 + $0x128] ss:$16 sps:$4 sm:$0xff]   ;;  %v1346_v3 = vld [vmem:[#allocation20 + $0x60] sm:$0xff] }
 0x33f   :  { %v604_v11 = vcombine.low %v600_v4, %v601_v5  ;;  %v8302_v46 = vld [vmem:[#allocation14 + $0x148] ss:$16 sps:$4 sm:$0xff]   ;;  %v7282_v5 = vcombine.high %v1342_v2, %v1346_v3 }
 0x340   :  { %v1343_v4 = vld [vmem:[#allocation20 + $0x48] sm:$0xff] }
 0x341   :  { %v611_v12 = vrot.slane %v604_v11, %v9776_v59  ;;  %2914 = vmatprep.subr.bf16.mxu0 %v7282_v5 }
 0x343   :  { %v618_v15 = vrot.slane %v611_v12, %v9776_v59 }
 0x345   :  { %v620_v17 = vsub.f32 %v530_v13, %v618_v15  ;;  %v1350_v13 = vld [vmem:[#allocation20 + $0x80] sm:$0xff] }
 0x346   :  { %v1354_v15 = vld [vmem:[#allocation20 + $0xa0] sm:$0xff] }
 0x347   :  { %v631_v18 = vrot.slane %v620_v17, %v9771_v10  ;;  %v627_v19 = vrot.slane %v620_v17, %v9768_v8  ;;  %v1351_v17 = vld [vmem:[#allocation20 + $0x88] sm:$0xff] }
 0x349   :  { %v635_v20 = vadd.f32 %v631_v18, %v622_v6  ;;  %v634_v21 = vadd.f32 %v627_v19, %v621_v9  ;;  %v1347_v6 = vld [vmem:[#allocation20 + $0x68] sm:$0xff]  ;;  %v7281_v9 = vcombine.low %v1342_v2, %v1346_v3  ;;  %v7290_v18 = vcombine.high %v1350_v13, %v1354_v15 }
 0x34a   :  { %v7283_v11 = vcombine.low %v1343_v4, %v1347_v6  ;;  %v7284_v12 = vcombine.high %v1343_v4, %v1347_v6  ;;  %v1355_v19 = vld [vmem:[#allocation20 + $0xa8] sm:$0xff]  ;;  %v7337_v3 = vcombine.low %v1398_v62, %v1402_v63  ;;  %v1406_v6 = vld [vmem:[#allocation20 + $0x240] sm:$0xff] }
 0x34b   :  { %v637_v22 = vmul.f32 0.2, %v635_v20  ;;  %v636_v23 = vmul.f32 0.2, %v634_v21  ;;  %2915 = vmatpush1.bf16.msra.mxu0 %v7281_v9  ;;  %v1403_v2 = vld [vmem:[#allocation20 + $0x228] sm:$0xff]  ;;  %v1410_v9 = vld [vmem:[#allocation20 + $0x260] sm:$0xff] }
 0x34c   :  { %2916 = vmatprep.subr.bf16.mxu0 %v7290_v18 }
 0x34d   :  { %v639_v24 = vmax.f32 %v635_v20, %v637_v22  ;;  %v638_v25 = vmax.f32 %v634_v21, %v636_v23  ;;  %v7289_v20 = vcombine.low %v1350_v13, %v1354_v15  ;;  %v7291_v21 = vcombine.low %v1351_v17, %v1355_v19  ;;  %v1358_v23 = vld [vmem:[#allocation20 + $0xc0] sm:$0xff]  ;;  %v1411_v13 = vld [vmem:[#allocation20 + $0x268] sm:$0xff] }
 0x34e   :  { %v7292_v22 = vcombine.high %v1351_v17, %v1355_v19  ;;  %v7345_v15 = vcombine.low %v1406_v6, %v1410_v9  ;;  %v1414_v19 = vld [vmem:[#allocation20 + $0x280] sm:$0xff] }
 0x34f   :  { %v641_v26 = vpack.c.bf16 %v639_v24, %v639_v24  ;;  %v9786_v14 = vpack.c.bf16 %v638_v25, %v638_v25  ;;  %2917 = vmatpush1.bf16.msra.mxu0 %v7289_v20  ;;  %v1362_v24 = vld [vmem:[#allocation20 + $0xe0] sm:$0xff]  ;;  %v1359_v25 = vld [vmem:[#allocation20 + $0xc8] sm:$0xff] }
 0x350   :  { %v1418_v20 = vld [vmem:[#allocation20 + $0x2a0] sm:$0xff] }
 0x351   :  { %1080 = vmatprep.mubr.bf16.mxu1 %v641_v26 }
 0x352   :  { %1081 = vmatmul.mubr.bf16.vlgmr.msra.gmra.mrb[4].mxu1 %v9786_v14 }
 0x353   :  { %1090 = vmatpush1.bf16.msra.mxu1 %v8272_v16  ;;  %1121 = vmatprep.mubr.bf16.mxu1 %v641_v26  ;;  %v7298_v26 = vcombine.high %v1358_v23, %v1362_v24  ;;  %v1363_v16 = vld [vmem:[#allocation20 + $0xe8] sm:$0xff] }
 0x354   :  { %1091 = vmatprep.subr.bf16.mxu1 %v8277_v27  ;;  %v7299_v27 = vcombine.low %v1359_v25, %v1363_v16 }
 0x355   :  { %2918 = vmatprep.subr.bf16.mxu0 %v7298_v26 }
 0x357   :  { %1092 = vmatpush1.bf16.msra.mxu1 %v8275_v28  ;;  %v7300_v28 = vcombine.high %v1359_v25, %v1363_v16  ;;  %v1422_v16 = vld [vmem:[#allocation20 + $0x2c0] sm:$0xff] }
 0x358   :  { %1093 = vmatprep.subr.bf16.mxu1 %v8280_v29  ;;  %v1366_v29 = vld [vmem:[#allocation20 + $0x100] sm:$0xff] }
 0x35b   :  { %1094 = vmatpush1.bf16.msra.mxu1 %v8278_v30  ;;  %v1370_v30 = vld [vmem:[#allocation20 + $0x120] sm:$0xff] }
 0x35c   :  { %1095 = vmatprep.subr.bf16.mxu1 %v8283_v31  ;;  %v1367_v31 = vld [vmem:[#allocation20 + $0x108] sm:$0xff] }
 0x35f   :  { %1096 = vmatpush1.bf16.msra.mxu1 %v8281_v32  ;;  %v7306_v32 = vcombine.high %v1366_v29, %v1370_v30 }
 0x360   :  { %1097 = vmatprep.subr.bf16.mxu1 %v8286_v33  ;;  %v1371_v33 = vld [vmem:[#allocation20 + $0x128] sm:$0xff] }
 0x363   :  { %1098 = vmatpush1.bf16.msra.mxu1 %v8284_v34  ;;  %v7305_v34 = vcombine.low %v1366_v29, %v1370_v30  ;;  %v1427_v29 = vld [vmem:[#allocation20 + $0x2e8] sm:$0xff] }
 0x364   :  { %1099 = vmatprep.subr.bf16.mxu1 %v8289_v35  ;;  %v7307_v35 = vcombine.low %v1367_v31, %v1371_v33 }
 0x367   :  { %1100 = vmatpush1.bf16.msra.mxu1 %v8287_v36  ;;  %v7308_v36 = vcombine.high %v1367_v31, %v1371_v33  ;;  %v1430_v33 = vld [vmem:[#allocation20 + $0x300] sm:$0xff] }
 0x368   :  { %1101 = vmatprep.subr.bf16.mxu1 %v8292_v37  ;;  %v1374_v37 = vld [vmem:[#allocation20 + $0x140] sm:$0xff] }
 0x36b   :  { %1102 = vmatpush1.bf16.msra.mxu1 %v8290_v38  ;;  %v1378_v38 = vld [vmem:[#allocation20 + $0x160] sm:$0xff] }
 0x36c   :  { %1103 = vmatprep.subr.bf16.mxu1 %v8295_v39  ;;  %v1375_v39 = vld [vmem:[#allocation20 + $0x148] sm:$0xff] }
 0x36f   :  { %1104 = vmatpush1.bf16.msra.mxu1 %v8293_v40  ;;  %v7314_v40 = vcombine.high %v1374_v37, %v1378_v38 }
 0x370   :  { %1105 = vmatprep.subr.bf16.mxu1 %v8298_v41  ;;  %v1379_v41 = vld [vmem:[#allocation20 + $0x168] sm:$0xff] }
 0x373   :  { %1106 = vmatpush1.bf16.msra.mxu1 %v8296_v42  ;;  %v7313_v42 = vcombine.low %v1374_v37, %v1378_v38  ;;  %v1435_v38 = vld [vmem:[#allocation20 + $0x328] sm:$0xff] }
 0x374   :  { %1107 = vmatprep.subr.bf16.mxu1 %v8301_v43  ;;  %v7315_v43 = vcombine.low %v1375_v39, %v1379_v41 }
 0x377   :  { %1108 = vmatpush1.bf16.msra.mxu1 %v8299_v44  ;;  %v7316_v44 = vcombine.high %v1375_v39, %v1379_v41  ;;  %v1438_v39 = vld [vmem:[#allocation20 + $0x340] sm:$0xff] }
 0x378   :  { %1109 = vmatprep.subr.bf16.mxu1 %v8304_v45  ;;  %v1382_v45 = vld [vmem:[#allocation20 + $0x180] sm:$0xff] }
 0x37b   :  { %1110 = vmatpush1.bf16.msra.mxu1 %v8302_v46  ;;  %v1386_v46 = vld [vmem:[#allocation20 + $0x1a0] sm:$0xff] }
 0x37c   :  { %1111 = vmatprep.subr.bf16.mxu1 %v8307_v47  ;;  %v1383_v47 = vld [vmem:[#allocation20 + $0x188] sm:$0xff] }
 0x37f   :  { %1112 = vmatpush1.bf16.msra.mxu1 %v8305_v48  ;;  %v7322_v48 = vcombine.high %v1382_v45, %v1386_v46 }
 0x380   :  { %1113 = vmatprep.subr.bf16.mxu1 %v8310_v49  ;;  %v1387_v49 = vld [vmem:[#allocation20 + $0x1a8] sm:$0xff] }
 0x383   :  { %1114 = vmatpush1.bf16.msra.mxu1 %v8308_v50  ;;  %v7321_v50 = vcombine.low %v1382_v45, %v1386_v46  ;;  %v1443_v45 = vld [vmem:[#allocation20 + $0x368] sm:$0xff]  ;;  %v1446_v46 = vld [vmem:[#allocation20 + $0x380] sm:$0xff] }
 0x384   :  { %1115 = vmatprep.subr.bf16.mxu1 %v8313_v51  ;;  %v7323_v51 = vcombine.low %v1383_v47, %v1387_v49 }
 0x387   :  { %1116 = vmatpush1.bf16.msra.mxu1 %v8311_v52  ;;  %v7324_v52 = vcombine.high %v1383_v47, %v1387_v49  ;;  %v1447_v49 = vld [vmem:[#allocation20 + $0x388] sm:$0xff] }
 0x388   :  { %1117 = vmatprep.subr.bf16.mxu1 %v8316_v53  ;;  %v1390_v53 = vld [vmem:[#allocation20 + $0x1c0] sm:$0xff] }
 0x38b   :  { %1118 = vmatpush1.bf16.msra.mxu1 %v8314_v54  ;;  %v1394_v54 = vld [vmem:[#allocation20 + $0x1e0] sm:$0xff] }
 0x38c   :  { %1119 = vmatprep.subr.bf16.mxu1 %v8319_v55  ;;  %v1391_v55 = vld [vmem:[#allocation20 + $0x1c8] sm:$0xff]  ;;  %v7329_v58 = vcombine.low %v1390_v53, %v1394_v54 }
 0x38d   :  { %v7331_v60 = vcombine.low %v1391_v55, %v1395_v57  ;;  %v7332_v61 = vcombine.high %v1391_v55, %v1395_v57  ;;  %v1454_v55 = vld [vmem:[#allocation20 + $0x3c0] sm:$0xff]  ;;  %v1455_v57 = vld [vmem:[#allocation20 + $0x3c8] sm:$0xff] }
 0x38f   :  { %1120 = vmatpush1.bf16.msra.mxu1 %v8317_v56  ;;  %v7330_v56 = vcombine.high %v1390_v53, %v1394_v54 }
 0x390   :  { %2994 = vmatprep.subr.bf16.mxu1 %v7276_v1  ;;  %v7338_v1 = vcombine.high %v1398_v62, %v1402_v63 }
 0x392   :  { %1122 = vmatmul.mubr.bf16.vlgmr.msra.gmra.mrb[8].mxu1 %v9786_v14  ;;  %v7297_v14 = vcombine.low %v1358_v23, %v1362_v24  ;;  %v1419_v23 = vld [vmem:[#allocation20 + $0x2a8] sm:$0xff]  ;;  %v7353_v24 = vcombine.low %v1414_v19, %v1418_v20 }
 0x393   :  { %2995 = vmatpush1.bf16.msra.mxu1 %v7275_v0  ;;  %v1399_v0 = vld [vmem:[#allocation20 + $0x208] sm:$0xff] }
 0x394   :  { %2996 = vmatprep.subr.bf16.mxu1 %v7284_v12  ;;  %2919 = vmatpush1.bf16.msra.mxu0 %v7297_v14  ;;  %v7339_v4 = vcombine.low %v1399_v0, %v1403_v2  ;;  %v7340_v5 = vcombine.high %v1399_v0, %v1403_v2  ;;  %v7346_v12 = vcombine.high %v1406_v6, %v1410_v9  ;;  %v1426_v14 = vld [vmem:[#allocation20 + $0x2e0] sm:$0xff] }
 0x395   :  { %2920 = vmatprep.subr.bf16.mxu0 %v7306_v32  ;;  %v7361_v30 = vcombine.low %v1422_v16, %v1426_v14 }
 0x397   :  { %2997 = vmatpush1.bf16.msra.mxu1 %v7283_v11  ;;  %v1407_v11 = vld [vmem:[#allocation20 + $0x248] sm:$0xff] }
 0x398   :  { %2998 = vmatprep.subr.bf16.mxu1 %v7292_v22  ;;  %2921 = vmatpush1.bf16.msra.mxu0 %v7305_v34  ;;  %v7347_v17 = vcombine.low %v1407_v11, %v1411_v13  ;;  %v7348_v18 = vcombine.high %v1407_v11, %v1411_v13  ;;  %v7354_v22 = vcombine.high %v1414_v19, %v1418_v20  ;;  %v1434_v34 = vld [vmem:[#allocation20 + $0x320] sm:$0xff]  ;;  %v9807_v20 = vld [vmem:[#allocation20 + $0x408] sm:$0xff] }
 0x399   :  { %2922 = vmatprep.subr.bf16.mxu0 %v7314_v40  ;;  %v7370_v37 = vcombine.high %v1430_v33, %v1434_v34  ;;  %v1442_v40 = vld [vmem:[#allocation20 + $0x360] sm:$0xff] }
 0x39a   :  { %v9805_v19 = vld [vmem:[#allocation20 + $0x420] sm:$0xff] }
 0x39b   :  { %2999 = vmatpush1.bf16.msra.mxu1 %v7291_v21  ;;  %v1415_v21 = vld [vmem:[#allocation20 + $0x288] sm:$0xff] }
 0x39c   :  { %3000 = vmatprep.subr.bf16.mxu1 %v7300_v28  ;;  %2923 = vmatpush1.bf16.msra.mxu0 %v7313_v42  ;;  %v7355_v25 = vcombine.low %v1415_v21, %v1419_v23  ;;  %v7356_v26 = vcombine.high %v1415_v21, %v1419_v23  ;;  %v7362_v28 = vcombine.high %v1422_v16, %v1426_v14 }
 0x39d   :  { %2924 = vmatprep.subr.bf16.mxu0 %v7322_v48  ;;  %v1450_v48 = vld [vmem:[#allocation20 + $0x3a0] sm:$0xff] }
 0x39e   :  { %v7386_v53 = vcombine.high %v1446_v46, %v1450_v48 }
 0x39f   :  { %3001 = vmatpush1.bf16.msra.mxu1 %v7299_v27  ;;  %v1423_v27 = vld [vmem:[#allocation20 + $0x2c8] sm:$0xff] }
 0x3a0   :  { %3002 = vmatprep.subr.bf16.mxu1 %v7308_v36  ;;  %2925 = vmatpush1.bf16.msra.mxu0 %v7321_v50  ;;  %v7363_v31 = vcombine.low %v1423_v27, %v1427_v29  ;;  %v7364_v32 = vcombine.high %v1423_v27, %v1427_v29  ;;  %v7369_v36 = vcombine.low %v1430_v33, %v1434_v34  ;;  %v1451_v50 = vld [vmem:[#allocation20 + $0x3a8] sm:$0xff] }
 0x3a1   :  { %2926 = vmatprep.subr.bf16.mxu0 %v7330_v56  ;;  %v7388_v54 = vcombine.high %v1447_v49, %v1451_v50  ;;  %v1458_v56 = vld [vmem:[#allocation20 + $0x3e0] sm:$0xff]  ;;  %v7387_v62 = vcombine.low %v1447_v49, %v1451_v50 }
 0x3a2   :  { %v7394_v63 = vcombine.high %v1454_v55, %v1458_v56 }
 0x3a3   :  { %3003 = vmatpush1.bf16.msra.mxu1 %v7307_v35  ;;  %v1431_v35 = vld [vmem:[#allocation20 + $0x308] sm:$0xff] }
 0x3a4   :  { %3004 = vmatprep.subr.bf16.mxu1 %v7316_v44  ;;  %2927 = vmatpush1.bf16.msra.mxu0 %v7329_v58  ;;  %v7371_v41 = vcombine.low %v1431_v35, %v1435_v38  ;;  %v7372_v42 = vcombine.high %v1431_v35, %v1435_v38  ;;  %v1439_v44 = vld [vmem:[#allocation20 + $0x348] sm:$0xff] }
 0x3a5   :  { %2928 = vmatprep.subr.bf16.mxu0 %v7338_v1  ;;  %v7380_v47 = vcombine.high %v1439_v44, %v1443_v45  ;;  %v1459_v58 = vld [vmem:[#allocation20 + $0x3e8] sm:$0xff] }
 0x3a6   :  { %v7396_v0 = vcombine.high %v1455_v57, %v1459_v58 }
 0x3a7   :  { %3005 = vmatpush1.bf16.msra.mxu1 %v7315_v43  ;;  %v7378_v43 = vcombine.high %v1438_v39, %v1442_v40 }
 0x3a8   :  { %3006 = vmatprep.subr.bf16.mxu1 %v7324_v52  ;;  %2929 = vmatpush1.bf16.msra.mxu0 %v7337_v3  ;;  %v7379_v52 = vcombine.low %v1439_v44, %v1443_v45  ;;  %v7393_v3 = vcombine.low %v1454_v55, %v1458_v56 }
 0x3a9   :  { %2930 = vmatprep.subr.bf16.mxu0 %v7346_v12 }
 0x3ab   :  { %3007 = vmatpush1.bf16.msra.mxu1 %v7323_v51  ;;  %v7377_v51 = vcombine.low %v1438_v39, %v1442_v40 }
 0x3ac   :  { %3008 = vmatprep.subr.bf16.mxu1 %v7332_v61  ;;  %2931 = vmatpush1.bf16.msra.mxu0 %v7345_v15  ;;  %v7385_v61 = vcombine.low %v1446_v46, %v1450_v48 }
 0x3ad   :  { %2932 = vmatprep.subr.bf16.mxu0 %v7354_v22 }
 0x3af   :  { %3009 = vmatpush1.bf16.msra.mxu1 %v7331_v60  ;;  %v9790_v60 = vld [vmem:[#allocation16] sm:$0xf] }
 0x3b0   :  { %3010 = vmatprep.subr.bf16.mxu1 %v7340_v5  ;;  %2933 = vmatpush1.bf16.msra.mxu0 %v7353_v24  ;;  %v711_v1 = vrot.slane %v9790_v60, %v9768_v8  ;;  %v715_v2 = vrot.slane %v9790_v60, %v9771_v10  ;;  %v9814_v24 = vld [vmem:[#allocation20 + $0x428] sm:$0xff] }
 0x3b1   :  { %2934 = vmatprep.subr.bf16.mxu0 %v7362_v28  ;;  %v7403_v14 = vcombine.low %v9807_v20, %v9814_v24  ;;  %v7404_v29 = vcombine.high %v9807_v20, %v9814_v24 }
 0x3b3   :  { %3011 = vmatpush1.bf16.msra.mxu1 %v7339_v4  ;;  %v7395_v4 = vcombine.low %v1455_v57, %v1459_v58 }
 0x3b4   :  { %3012 = vmatprep.subr.bf16.mxu1 %v7348_v18  ;;  %2935 = vmatpush1.bf16.msra.mxu0 %v7361_v30  ;;  %v9803_v18 = vld [vmem:[#allocation20 + $0x400] sm:$0xff] }
 0x3b5   :  { %2936 = vmatprep.subr.bf16.mxu0 %v7370_v37  ;;  %v7402_v23 = vcombine.high %v9803_v18, %v9805_v19  ;;  %v7401_v16 = vcombine.low %v9803_v18, %v9805_v19 }
 0x3b7   :  { %3013 = vmatpush1.bf16.msra.mxu1 %v7347_v17 }
 0x3b8   :  { %3014 = vmatprep.subr.bf16.mxu1 %v7356_v26  ;;  %2937 = vmatpush1.bf16.msra.mxu0 %v7369_v36 }
 0x3b9   :  { %2938 = vmatprep.subr.bf16.mxu0 %v7378_v43 }
 0x3bb   :  { %3015 = vmatpush1.bf16.msra.mxu1 %v7355_v25 }
 0x3bc   :  { %3016 = vmatprep.subr.bf16.mxu1 %v7364_v32  ;;  %2939 = vmatpush1.bf16.msra.mxu0 %v7377_v51 }
 0x3bd   :  { %2940 = vmatprep.subr.bf16.mxu0 %v7386_v53 }
 0x3bf   :  { %3017 = vmatpush1.bf16.msra.mxu1 %v7363_v31 }
 0x3c0   :  { %3018 = vmatprep.subr.bf16.mxu1 %v7372_v42  ;;  %2941 = vmatpush1.bf16.msra.mxu0 %v7385_v61 }
 0x3c1   :  { %2942 = vmatprep.subr.bf16.mxu0 %v7394_v63  ;;  %v9833_v63 = vsub.s32 2, %v9765_v7 }
 0x3c3   :  { %3019 = vmatpush1.bf16.msra.mxu1 %v7371_v41 }
 0x3c4   :  { %3020 = vmatprep.subr.bf16.mxu1 %v7380_v47  ;;  %2943 = vmatpush1.bf16.msra.mxu0 %v7393_v3 }
 0x3c5   :  { %2953 = vmatprep.subr.bf16.mxu0 %v7402_v23 }
 0x3c7   :  { %3021 = vmatpush1.bf16.msra.mxu1 %v7379_v52 }
 0x3c8   :  { %3022 = vmatprep.subr.bf16.mxu1 %v7388_v54 }
 0x3cb   :  { %3023 = vmatpush1.bf16.msra.mxu1 %v7387_v62 }
 0x3cc   :  { %3024 = vmatprep.subr.bf16.mxu1 %v7396_v0  ;;  %v9836_v0 = vsub.s32 3, %v9765_v7 }
 0x3cf   :  { %3025 = vmatpush1.bf16.msra.mxu1 %v7395_v4 }
 0x3d0   :  { %3035 = vmatprep.subr.bf16.mxu1 %v7404_v29 }
 0x425   :  { %v1082_v5 = vpop.f32.mrb[4].mxu1 }
 0x426   :  { %v9796_v6 = vadd.f32 %v1082_v5, %v711_v1  ;;  %v1084_v9 = vpop.f32.mrb[5].mxu1  ;;  %v719_v1 = vrot.slane %v9790_v60, %v9833_v63 }
 0x427   :  { %v9798_v11 = vadd.f32 %v1084_v9, %v715_v2  ;;  %v1086_v12 = vpop.f32.mrb[6].mxu1  ;;  %v723_v2 = vrot.slane %v9790_v60, %v9836_v0 }
 0x428   :  { %v1132_v13 = vrot.slane %v9796_v6, 4  ;;  %v1156_v15 = vmul.f32 %v9796_v6, %v9796_v6  ;;  %v1087_v17 = vpop.f32.mrb[7].mxu1 }
 0x429   :  { %v1138_v21 = vrot.slane %v9798_v11, 4  ;;  %v1157_v22 = vmul.f32 %v9798_v11, %v9798_v11 }
 0x42a   :  { %v1133_v25 = vadd.f32 %v1132_v13, %v9796_v6  ;;  %v1160_v26 = vrot.slane %v1156_v15, 4 }
 0x42b   :  { %v1139_v27 = vadd.f32 %v1138_v21, %v9798_v11  ;;  %v1166_v28 = vrot.slane %v1157_v22, 4 }
 0x42c   :  { %v1134_v30 = vrot.slane %v1133_v25, 2  ;;  %v1161_v31 = vadd.f32 %v1160_v26, %v1156_v15 }
 0x42d   :  { %v1140_v32 = vrot.slane %v1139_v27, 2  ;;  %v1167_v33 = vadd.f32 %v1166_v28, %v1157_v22 }
 0x42e   :  { %v1135_v34 = vadd.f32 %v1134_v30, %v1133_v25  ;;  %v1162_v35 = vrot.slane %v1161_v31, 2 }
 0x42f   :  { %v1141_v36 = vadd.f32 %v1140_v32, %v1139_v27  ;;  %v1168_v37 = vrot.slane %v1167_v33, 2 }
 0x430   :  { %v1136_v38 = vrot.slane %v1135_v34, 1  ;;  %v1163_v39 = vadd.f32 %v1162_v35, %v1161_v31 }
 0x431   :  { %v1142_v40 = vrot.slane %v1141_v36, 1  ;;  %v1169_v41 = vadd.f32 %v1168_v37, %v1167_v33 }
 0x432   :  { %v1137_v42 = vadd.f32 %v1136_v38, %v1135_v34  ;;  %v1164_v43 = vrot.slane %v1163_v39, 1 }
 0x433   :  { %v1143_v44 = vadd.f32 %v1142_v40, %v1141_v36  ;;  %v1170_v45 = vrot.slane %v1169_v41, 1 }
 0x434   :  { %v1165_v46 = vadd.f32 %v1164_v43, %v1163_v39  ;;  %v9824_v47 = vmul.f32 0.125, %v1137_v42 }
 0x435   :  { %v1171_v48 = vadd.f32 %v1170_v45, %v1169_v41  ;;  %v9826_v49 = vmul.f32 0.125, %v1143_v44 }
 0x436   :  { %v1188_v50 = vmul.f32 0.125, %v1165_v46  ;;  %v1192_v51 = vmul.f32 %v9824_v47, %v9824_v47 }
 0x437   :  { %v1189_v52 = vmul.f32 0.125, %v1171_v48  ;;  %v1193_v53 = vmul.f32 %v9826_v49, %v9826_v49 }
 0x438   :  { %v1196_v54 = vsub.f32 %v1188_v50, %v1192_v51 }
 0x439   :  { %v1197_v55 = vsub.f32 %v1189_v52, %v1193_v53 }
 0x43a   :  { %v1200_v56 = vadd.f32 1e-05, %v1196_v54 }
 0x43b   :  { %v1201_v57 = vadd.f32 1e-05, %v1197_v55 }
 0x43c   :  { %8964 = vrsqrt.f32 %v1200_v56 }
 0x43d   :  { %8966 = vrsqrt.f32 %v1201_v57 }
 0x446   :  { %v8965_v58 = vpop.eup %8964 }
 0x447   :  { %v8967_v61 = vpop.eup %8966 }
 0x448   :  { %v1212_v62 = vcombine.low %v8965_v58, %v8967_v61 }
 0x465   :  { %v1123_v3 = vpop.f32.mrb[8].mxu1 }
 0x466   :  { %v9842_v4 = vadd.f32 %v1123_v3, %v719_v1  ;;  %v1125_v5 = vpop.f32.mrb[9].mxu1  ;;  %v1220_v1 = vrot.slane %v1212_v62, %v9776_v59 }
 0x467   :  { %v1126_v9 = vadd.f32 %v1125_v5, %v723_v2  ;;  %v1127_v12 = vpop.f32.mrb[10].mxu1  ;;  %v1130_v5 = vld [vmem:[#allocation17] sm:$0xf] }
 0x468   :  { %v1144_v13 = vrot.slane %v9842_v4, 4  ;;  %v1158_v15 = vmul.f32 %v9842_v4, %v9842_v4  ;;  %v1128_v17 = vpop.f32.mrb[11].mxu1 }
 0x469   :  { %v1150_v21 = vrot.slane %v1126_v9, 4  ;;  %v1159_v22 = vmul.f32 %v1126_v9, %v1126_v9 }
 0x46a   :  { %v1145_v23 = vadd.f32 %v1144_v13, %v9842_v4  ;;  %v1172_v25 = vrot.slane %v1158_v15, 4 }
 0x46b   :  { %v1151_v26 = vadd.f32 %v1150_v21, %v1126_v9  ;;  %v1178_v27 = vrot.slane %v1159_v22, 4 }
 0x46c   :  { %v1146_v60 = vrot.slane %v1145_v23, 2  ;;  %v1173_v28 = vadd.f32 %v1172_v25, %v1158_v15 }
 0x46d   :  { %v1152_v29 = vrot.slane %v1151_v26, 2  ;;  %v1179_v30 = vadd.f32 %v1178_v27, %v1159_v22 }
 0x46e   :  { %v1147_v31 = vadd.f32 %v1146_v60, %v1145_v23  ;;  %v1174_v32 = vrot.slane %v1173_v28, 2 }
 0x46f   :  { %v1153_v33 = vadd.f32 %v1152_v29, %v1151_v26  ;;  %v1180_v34 = vrot.slane %v1179_v30, 2 }
 0x470   :  { %v1148_v35 = vrot.slane %v1147_v31, 1  ;;  %v1175_v36 = vadd.f32 %v1174_v32, %v1173_v28 }
 0x471   :  { %v1154_v37 = vrot.slane %v1153_v33, 1  ;;  %v1181_v38 = vadd.f32 %v1180_v34, %v1179_v30 }
 0x472   :  { %v1149_v39 = vadd.f32 %v1148_v35, %v1147_v31  ;;  %v1176_v40 = vrot.slane %v1175_v36, 1  ;;  %v1131_v35 = vld [vmem:[#allocation19] sm:$0xf] }
 0x473   :  { %v1155_v41 = vadd.f32 %v1154_v37, %v1153_v33  ;;  %v1182_v42 = vrot.slane %v1181_v38, 1 }
 0x474   :  { %v1177_v43 = vadd.f32 %v1176_v40, %v1175_v36  ;;  %v1186_v44 = vmul.f32 0.125, %v1149_v39 }
 0x475   :  { %v1183_v45 = vadd.f32 %v1182_v42, %v1181_v38  ;;  %v1187_v46 = vmul.f32 0.125, %v1155_v41 }
 0x476   :  { %v1190_v48 = vmul.f32 0.125, %v1177_v43  ;;  %v1194_v50 = vmul.f32 %v1186_v44, %v1186_v44 }
 0x477   :  { %v1191_v51 = vmul.f32 0.125, %v1183_v45  ;;  %v1195_v52 = vmul.f32 %v1187_v46, %v1187_v46  ;;  %v1470_v45 = vld [vmem:[#allocation20 + $0x440] sm:$0xff] }
 0x478   :  { %v1198_v53 = vsub.f32 %v1190_v48, %v1194_v50  ;;  %v1474_v48 = vld [vmem:[#allocation20 + $0x460] sm:$0xff]  ;;  %v1471_v50 = vld [vmem:[#allocation20 + $0x448] sm:$0xff] }
 0x479   :  { %v1199_v54 = vsub.f32 %v1191_v51, %v1195_v52  ;;  %v1475_v51 = vld [vmem:[#allocation20 + $0x468] sm:$0xff] }
 0x47a   :  { %v1202_v55 = vadd.f32 1e-05, %v1198_v53 }
 0x47b   :  { %v1203_v56 = vadd.f32 1e-05, %v1199_v54  ;;  %v1478_v54 = vld [vmem:[#allocation20 + $0x480] sm:$0xff] }
 0x47c   :  { %8968 = vrsqrt.f32 %v1202_v55  ;;  %v7410_v55 = vcombine.high %v1470_v45, %v1474_v48 }
 0x47d   :  { %8970 = vrsqrt.f32 %v1203_v56  ;;  %v7412_v56 = vcombine.high %v1471_v50, %v1475_v51 }
 0x486   :  { %v8969_v57 = vpop.eup %8968 }
 0x487   :  { %v8971_v58 = vpop.eup %8970 }
 0x488   :  { %v1213_v61 = vcombine.low %v8969_v57, %v8971_v58  ;;  %v1482_v57 = vld [vmem:[#allocation20 + $0x4a0] sm:$0xff]  ;;  %v1479_v58 = vld [vmem:[#allocation20 + $0x488] sm:$0xff] }
 0x489   :  { %v7417_v18 = vcombine.low %v1478_v54, %v1482_v57 }
 0x48a   :  { %v1227_v2 = vrot.slane %v1213_v61, %v9776_v59  ;;  %v1483_v61 = vld [vmem:[#allocation20 + $0x4a8] sm:$0xff] }
 0x48b   :  { %v7419_v19 = vcombine.low %v1479_v58, %v1483_v61 }
 0x48c   :  { %v1228_v3 = vcombine.low %v1220_v1, %v1227_v2  ;;  %v7409_v2 = vcombine.low %v1470_v45, %v1474_v48  ;;  %v1530_v48 = vld [vmem:[#allocation20 + $0x620] sm:$0xff] }
 0x48e   :  { %v1235_v12 = vrot.slane %v1228_v3, %v9776_v59  ;;  %v7411_v3 = vcombine.low %v1471_v50, %v1475_v51  ;;  %v1527_v50 = vld [vmem:[#allocation20 + $0x608] sm:$0xff] }
 0x48f   :  { %v1531_v51 = vld [vmem:[#allocation20 + $0x628] sm:$0xff] }
 0x490   :  { %v1237_v13 = vmul.f32 %v1235_v12, %v1130_v5  ;;  %v7418_v5 = vcombine.high %v1478_v54, %v1482_v57  ;;  %v7420_v12 = vcombine.high %v1479_v58, %v1483_v61  ;;  %v7468_v57 = vcombine.high %v1527_v50, %v1531_v51  ;;  %v1534_v58 = vld [vmem:[#allocation20 + $0x640] sm:$0xff] }
 0x491   :  { %v1538_v61 = vld [vmem:[#allocation20 + $0x660] sm:$0xff] }
 0x492   :  { %v1250_v15 = vrot.slane %v1237_v13, %v9833_v63  ;;  %v1254_v17 = vrot.slane %v1237_v13, %v9836_v0  ;;  %v1242_v21 = vrot.slane %v1237_v13, %v9768_v8  ;;  %v1246_v22 = vrot.slane %v1237_v13, %v9771_v10  ;;  %v1486_v13 = vld [vmem:[#allocation20 + $0x4c0] sm:$0xff] }
 0x494   :  { %v1261_v23 = vmul.f32 %v1250_v15, %v1186_v44  ;;  %v1262_v25 = vmul.f32 %v1254_v17, %v1187_v46  ;;  %v1296_v26 = vmul.f32 %v1254_v17, %v1126_v9  ;;  %v1259_v62 = vmul.f32 %v1242_v21, %v9824_v47  ;;  %v1487_v17 = vld [vmem:[#allocation20 + $0x4c8] sm:$0xff] }
 0x495   :  { %v1260_v27 = vmul.f32 %v1246_v22, %v9826_v49  ;;  %v1294_v60 = vmul.f32 %v1246_v22, %v9798_v11  ;;  %v1293_v28 = vmul.f32 %v1242_v21, %v9796_v6  ;;  %v1295_v29 = vmul.f32 %v1250_v15, %v9842_v4  ;;  %v1490_v15 = vld [vmem:[#allocation20 + $0x4e0] sm:$0xff]  ;;  %v1491_v21 = vld [vmem:[#allocation20 + $0x4e8] sm:$0xff] }
 0x496   :  { %v1268_v30 = vcombine.low %v1261_v23, %v1262_v25  ;;  %v7426_v20 = vcombine.high %v1486_v13, %v1490_v15  ;;  %v7428_v24 = vcombine.high %v1487_v17, %v1491_v21  ;;  %v1495_v22 = vld [vmem:[#allocation20 + $0x508] sm:$0xff]  ;;  %v7425_v25 = vcombine.low %v1486_v13, %v1490_v15 }
 0x497   :  { %v1267_v31 = vcombine.low %v1259_v62, %v1260_v27  ;;  %v1499_v23 = vld [vmem:[#allocation20 + $0x528] sm:$0xff]  ;;  %v7474_v13 = vcombine.high %v1534_v58, %v1538_v61 }
 0x498   :  { %v1282_v32 = vrot.slane %v1268_v30, %v9776_v59  ;;  %v7436_v27 = vcombine.high %v1495_v22, %v1499_v23  ;;  %v1507_v30 = vld [vmem:[#allocation20 + $0x568] sm:$0xff] }
 0x499   :  { %v1275_v33 = vrot.slane %v1267_v31, %v9776_v59 }
 0x49b   :  { %v1283_v34 = vcombine.low %v1275_v33, %v1282_v32  ;;  %v7435_v32 = vcombine.low %v1495_v22, %v1499_v23  ;;  %v1550_v22 = vld [vmem:[#allocation20 + $0x6c0] sm:$0xff] }
 0x49c   :  { %v1554_v23 = vld [vmem:[#allocation20 + $0x6e0] sm:$0xff] }
 0x49d   :  { %v1290_v9 = vrot.slane %v1283_v34, %v9776_v59 }
 0x49f   :  { %v1292_v36 = vsub.f32 %v1131_v35, %v1290_v9  ;;  %v1510_v35 = vld [vmem:[#allocation20 + $0x580] sm:$0xff] }
 0x4a0   :  { %v1514_v9 = vld [vmem:[#allocation20 + $0x5a0] sm:$0xff] }
 0x4a1   :  { %v1305_v47 = vrot.slane %v1292_v36, %v9771_v10  ;;  %v1301_v49 = vrot.slane %v1292_v36, %v9768_v8  ;;  %v1313_v11 = vrot.slane %v1292_v36, %v9836_v0  ;;  %v1309_v6 = vrot.slane %v1292_v36, %v9833_v63  ;;  %v1511_v36 = vld [vmem:[#allocation20 + $0x588] sm:$0xff] }
 0x4a3   :  { %v1319_v4 = vadd.f32 %v1305_v47, %v1294_v60  ;;  %v1318_v37 = vadd.f32 %v1301_v49, %v1293_v28  ;;  %v1321_v38 = vadd.f32 %v1313_v11, %v1296_v26  ;;  %v9867_v39 = vadd.f32 %v1309_v6, %v1295_v29  ;;  %v1502_v60 = vld [vmem:[#allocation20 + $0x540] sm:$0xff]  ;;  %v1503_v29 = vld [vmem:[#allocation20 + $0x548] sm:$0xff] }
 0x4a4   :  { %v7427_v26 = vcombine.low %v1487_v17, %v1491_v21  ;;  %v1506_v28 = vld [vmem:[#allocation20 + $0x560] sm:$0xff]  ;;  %v7444_v34 = vcombine.high %v1503_v29, %v1507_v30  ;;  %v1515_v47 = vld [vmem:[#allocation20 + $0x5a8] sm:$0xff]  ;;  %v7443_v11 = vcombine.low %v1503_v29, %v1507_v30  ;;  %v7450_v6 = vcombine.high %v1510_v35, %v1514_v9 }
 0x4a5   :  { %v1323_v40 = vmul.f32 0.2, %v1319_v4  ;;  %v1322_v41 = vmul.f32 0.2, %v1318_v37  ;;  %v1325_v42 = vmul.f32 0.2, %v1321_v38  ;;  %v7442_v33 = vcombine.high %v1502_v60, %v1506_v28 }
 0x4a6   :  { %v7441_v49 = vcombine.low %v1502_v60, %v1506_v28  ;;  %v1542_v17 = vld [vmem:[#allocation20 + $0x680] sm:$0xff]  ;;  %v7490_v60 = vcombine.high %v1550_v22, %v1554_v23 }
 0x4a7   :  { %v1327_v43 = vmax.f32 %v1319_v4, %v1323_v40  ;;  %v1326_v44 = vmax.f32 %v1318_v37, %v1322_v41  ;;  %v1329_v46 = vmax.f32 %v1321_v38, %v1325_v42  ;;  %v7452_v4 = vcombine.high %v1511_v36, %v1515_v47  ;;  %v1518_v37 = vld [vmem:[#allocation20 + $0x5c0] sm:$0xff]  ;;  %v1519_v40 = vld [vmem:[#allocation20 + $0x5c8] sm:$0xff] }
 0x4a8   :  { %v1522_v38 = vld [vmem:[#allocation20 + $0x5e0] sm:$0xff]  ;;  %v1523_v41 = vld [vmem:[#allocation20 + $0x5e8] sm:$0xff]  ;;  %v7449_v42 = vcombine.low %v1510_v35, %v1514_v9 }
 0x4a9   :  { %v9869_v52 = vpack.c.bf16 %v1327_v43, %v1327_v43  ;;  %v9871_v53 = vpack.c.bf16 %v1326_v44, %v1326_v44  ;;  %v9877_v1 = vpack.c.bf16 %v1329_v46, %v1329_v46  ;;  %v7451_v43 = vcombine.low %v1511_v36, %v1515_v47  ;;  %v1526_v46 = vld [vmem:[#allocation20 + $0x600] sm:$0xff] }
 0x4aa   :  { %v7458_v44 = vcombine.high %v1518_v37, %v1522_v38  ;;  %v7460_v45 = vcombine.high %v1519_v40, %v1523_v41  ;;  %v7457_v54 = vcombine.low %v1518_v37, %v1522_v38  ;;  %v1546_v21 = vld [vmem:[#allocation20 + $0x6a0] sm:$0xff] }
 0x4ab   :  { %2944 = vmatprep.mubr.bf16.mxu0 %v9869_v52  ;;  %3026 = vmatprep.mubr.bf16.mxu1 %v9869_v52  ;;  %v1558_v29 = vld [vmem:[#allocation20 + $0x700] sm:$0xff] }
 0x4ac   :  { %2945 = vmatmul.mubr.bf16.vlgmr.msra.gmra.mrb[4].mxu0 %v9871_v53  ;;  %3027 = vmatmul.mubr.bf16.vlgmr.msra.gmra.mrb[12].mxu1 %v9871_v53  ;;  %v1562_v30 = vld [vmem:[#allocation20 + $0x720] sm:$0xff] }
 0x4ad   :  { %2954 = vmatpush1.bf16.msra.mxu0 %v7401_v16  ;;  %3036 = vmatpush1.bf16.msra.mxu1 %v7403_v14  ;;  %v1494_v16 = vld [vmem:[#allocation20 + $0x500] sm:$0xff]  ;;  %v7498_v35 = vcombine.high %v1558_v29, %v1562_v30 }
 0x4ae   :  { %2985 = vmatprep.mubr.bf16.mxu0 %v9877_v1  ;;  %3067 = vmatprep.mubr.bf16.mxu1 %v9877_v1  ;;  %v1498_v14 = vld [vmem:[#allocation20 + $0x520] sm:$0xff] }
 0x4af   :  { %2955 = vmatprep.subr.bf16.mxu0 %v7410_v55  ;;  %3037 = vmatprep.subr.bf16.mxu1 %v7412_v56  ;;  %v7434_v62 = vcombine.high %v1494_v16, %v1498_v14  ;;  %v7433_v31 = vcombine.low %v1494_v16, %v1498_v14  ;;  %v7459_v55 = vcombine.low %v1519_v40, %v1523_v41  ;;  %v1566_v36 = vld [vmem:[#allocation20 + $0x740] sm:$0xff] }
 0x4b0   :  { %v7466_v56 = vcombine.high %v1526_v46, %v1530_v48  ;;  %v7482_v16 = vcombine.high %v1542_v17, %v1546_v21  ;;  %v1570_v47 = vld [vmem:[#allocation20 + $0x760] sm:$0xff] }
 0x4b1   :  { %2956 = vmatpush1.bf16.msra.mxu0 %v7409_v2  ;;  %3038 = vmatpush1.bf16.msra.mxu1 %v7411_v3  ;;  %v1535_v2 = vld [vmem:[#allocation20 + $0x648] sm:$0xff]  ;;  %v7506_v37 = vcombine.high %v1566_v36, %v1570_v47  ;;  %v1574_v40 = vld [vmem:[#allocation20 + $0x780] sm:$0xff] }
 0x4b2   :  { %2957 = vmatprep.subr.bf16.mxu0 %v7418_v5  ;;  %3039 = vmatprep.subr.bf16.mxu1 %v7420_v12  ;;  %v1539_v3 = vld [vmem:[#allocation20 + $0x668] sm:$0xff]  ;;  %v7465_v5 = vcombine.low %v1526_v46, %v1530_v48  ;;  %v7467_v12 = vcombine.low %v1527_v50, %v1531_v51  ;;  %v1578_v41 = vld [vmem:[#allocation20 + $0x7a0] sm:$0xff] }
 0x4b3   :  { %v7476_v15 = vcombine.high %v1535_v2, %v1539_v3  ;;  %v7514_v46 = vcombine.high %v1574_v40, %v1578_v41  ;;  %v1582_v50 = vld [vmem:[#allocation20 + $0x7c0] sm:$0xff] }
 0x4b4   :  { %v1586_v51 = vld [vmem:[#allocation20 + $0x7e0] sm:$0xff] }
 0x4b5   :  { %2958 = vmatpush1.bf16.msra.mxu0 %v7417_v18  ;;  %3040 = vmatpush1.bf16.msra.mxu1 %v7419_v19  ;;  %v1543_v18 = vld [vmem:[#allocation20 + $0x688] sm:$0xff] }
 0x4b6   :  { %2959 = vmatprep.subr.bf16.mxu0 %v7426_v20  ;;  %3041 = vmatprep.subr.bf16.mxu1 %v7428_v24  ;;  %v1547_v19 = vld [vmem:[#allocation20 + $0x6a8] sm:$0xff]  ;;  %v7473_v20 = vcombine.low %v1534_v58, %v1538_v61  ;;  %v7475_v24 = vcombine.low %v1535_v2, %v1539_v3  ;;  %v7522_v58 = vcombine.high %v1582_v50, %v1586_v51  ;;  %v1324_v2 = vmul.f32 0.2, %v9867_v39  ;;  %v1336_v3 = vld [vmem:[#allocation20 + $0x10] sm:$0xff] }
 0x4b7   :  { %v7484_v14 = vcombine.high %v1543_v18, %v1547_v19 }
 0x4b9   :  { %2960 = vmatpush1.bf16.msra.mxu0 %v7425_v25  ;;  %3042 = vmatpush1.bf16.msra.mxu1 %v7427_v26  ;;  %v1551_v25 = vld [vmem:[#allocation20 + $0x6c8] sm:$0xff] }
 0x4ba   :  { %2961 = vmatprep.subr.bf16.mxu0 %v7434_v62  ;;  %3043 = vmatprep.subr.bf16.mxu1 %v7436_v27  ;;  %v1555_v26 = vld [vmem:[#allocation20 + $0x6e8] sm:$0xff]  ;;  %v7481_v62 = vcombine.low %v1542_v17, %v1546_v21  ;;  %v7483_v27 = vcombine.low %v1543_v18, %v1547_v19  ;;  %v1328_v21 = vmax.f32 %v9867_v39, %v1324_v2  ;;  %v1353_v39 = vld [vmem:[#allocation20 + $0x98] sm:$0xff] }
 0x4bb   :  { %v7492_v28 = vcombine.high %v1551_v25, %v1555_v26 }
 0x4bd   :  { %2962 = vmatpush1.bf16.msra.mxu0 %v7433_v31  ;;  %3044 = vmatpush1.bf16.msra.mxu1 %v7435_v32  ;;  %v1559_v31 = vld [vmem:[#allocation20 + $0x708] sm:$0xff] }
 0x4be   :  { %2963 = vmatprep.subr.bf16.mxu0 %v7442_v33  ;;  %3045 = vmatprep.subr.bf16.mxu1 %v7444_v34  ;;  %v1563_v32 = vld [vmem:[#allocation20 + $0x728] sm:$0xff]  ;;  %v7489_v33 = vcombine.low %v1550_v22, %v1554_v23  ;;  %v7491_v34 = vcombine.low %v1551_v25, %v1555_v26  ;;  %v9889_v23 = vpack.c.bf16 %v1328_v21, %v1328_v21 }
 0x4bf   :  { %v7500_v9 = vcombine.high %v1559_v31, %v1563_v32 }
 0x4c1   :  { %2964 = vmatpush1.bf16.msra.mxu0 %v7441_v49  ;;  %3046 = vmatpush1.bf16.msra.mxu1 %v7443_v11  ;;  %v1567_v49 = vld [vmem:[#allocation20 + $0x748] sm:$0xff] }
 0x4c2   :  { %2965 = vmatprep.subr.bf16.mxu0 %v7450_v6  ;;  %3047 = vmatprep.subr.bf16.mxu1 %v7452_v4  ;;  %v1571_v11 = vld [vmem:[#allocation20 + $0x768] sm:$0xff]  ;;  %v7497_v6 = vcombine.low %v1558_v29, %v1562_v30  ;;  %v7499_v4 = vcombine.low %v1559_v31, %v1563_v32 }
 0x4c3   :  { %v7508_v38 = vcombine.high %v1567_v49, %v1571_v11 }
 0x4c5   :  { %2966 = vmatpush1.bf16.msra.mxu0 %v7449_v42  ;;  %3048 = vmatpush1.bf16.msra.mxu1 %v7451_v43  ;;  %v1575_v42 = vld [vmem:[#allocation20 + $0x788] sm:$0xff] }
 0x4c6   :  { %2967 = vmatprep.subr.bf16.mxu0 %v7458_v44  ;;  %3049 = vmatprep.subr.bf16.mxu1 %v7460_v45  ;;  %v1579_v43 = vld [vmem:[#allocation20 + $0x7a8] sm:$0xff]  ;;  %v7505_v44 = vcombine.low %v1566_v36, %v1570_v47  ;;  %v7507_v45 = vcombine.low %v1567_v49, %v1571_v11 }
 0x4c7   :  { %v7516_v48 = vcombine.high %v1575_v42, %v1579_v43 }
 0x4c9   :  { %2968 = vmatpush1.bf16.msra.mxu0 %v7457_v54  ;;  %3050 = vmatpush1.bf16.msra.mxu1 %v7459_v55  ;;  %v1583_v54 = vld [vmem:[#allocation20 + $0x7c8] sm:$0xff] }
 0x4ca   :  { %2969 = vmatprep.subr.bf16.mxu0 %v7466_v56  ;;  %3051 = vmatprep.subr.bf16.mxu1 %v7468_v57  ;;  %v1587_v55 = vld [vmem:[#allocation20 + $0x7e8] sm:$0xff]  ;;  %v7513_v56 = vcombine.low %v1574_v40, %v1578_v41  ;;  %v7515_v57 = vcombine.low %v1575_v42, %v1579_v43  ;;  %v1376_v43 = vld [vmem:[#allocation20 + $0x150] sm:$0xff] }
 0x4cb   :  { %v7524_v61 = vcombine.high %v1583_v54, %v1587_v55  ;;  %v7523_v17 = vcombine.low %v1583_v54, %v1587_v55  ;;  %v1384_v55 = vld [vmem:[#allocation20 + $0x190] sm:$0xff] }
 0x4cd   :  { %2970 = vmatpush1.bf16.msra.mxu0 %v7465_v5  ;;  %3052 = vmatpush1.bf16.msra.mxu1 %v7467_v12  ;;  %v1340_v5 = vld [vmem:[#allocation20 + $0x30] sm:$0xff]  ;;  %v1337_v12 = vld [vmem:[#allocation20 + $0x18] sm:$0xff] }
 0x4ce   :  { %2971 = vmatprep.subr.bf16.mxu0 %v7474_v13  ;;  %3053 = vmatprep.subr.bf16.mxu1 %v7476_v15  ;;  %v1341_v13 = vld [vmem:[#allocation20 + $0x38] sm:$0xff]  ;;  %v7521_v15 = vcombine.low %v1582_v50, %v1586_v51  ;;  %v7278_v18 = vcombine.high %v1336_v3, %v1340_v5  ;;  %v7277_v22 = vcombine.low %v1336_v3, %v1340_v5 }
 0x4cf   :  { %v7280_v19 = vcombine.high %v1337_v12, %v1341_v13  ;;  %v7279_v25 = vcombine.low %v1337_v12, %v1341_v13  ;;  %v1392_v12 = vld [vmem:[#allocation20 + $0x1d0] sm:$0xff] }
 0x4d0   :  { %v1396_v13 = vld [vmem:[#allocation20 + $0x1f0] sm:$0xff] }
 0x4d1   :  { %2972 = vmatpush1.bf16.msra.mxu0 %v7473_v20  ;;  %3054 = vmatpush1.bf16.msra.mxu1 %v7475_v24  ;;  %v1344_v20 = vld [vmem:[#allocation20 + $0x50] sm:$0xff] }
 0x4d2   :  { %2973 = vmatprep.subr.bf16.mxu0 %v7482_v16  ;;  %3055 = vmatprep.subr.bf16.mxu1 %v7484_v14  ;;  %v1348_v24 = vld [vmem:[#allocation20 + $0x70] sm:$0xff]  ;;  %v1345_v16 = vld [vmem:[#allocation20 + $0x58] sm:$0xff] }
 0x4d3   :  { %v1349_v14 = vld [vmem:[#allocation20 + $0x78] sm:$0xff]  ;;  %v7286_v26 = vcombine.high %v1344_v20, %v1348_v24  ;;  %v7285_v29 = vcombine.low %v1344_v20, %v1348_v24  ;;  %v1400_v24 = vld [vmem:[#allocation20 + $0x210] sm:$0xff] }
 0x4d4   :  { %v7287_v30 = vcombine.low %v1345_v16, %v1349_v14 }
 0x4d5   :  { %2974 = vmatpush1.bf16.msra.mxu0 %v7481_v62  ;;  %3056 = vmatpush1.bf16.msra.mxu1 %v7483_v27  ;;  %v7288_v62 = vcombine.high %v1345_v16, %v1349_v14  ;;  %v1352_v27 = vld [vmem:[#allocation20 + $0x90] sm:$0xff]  ;;  %v1401_v14 = vld [vmem:[#allocation20 + $0x218] sm:$0xff] }
 0x4d6   :  { %2975 = vmatprep.subr.bf16.mxu0 %v7490_v60  ;;  %3057 = vmatprep.subr.bf16.mxu1 %v7492_v28  ;;  %v1356_v60 = vld [vmem:[#allocation20 + $0xb0] sm:$0xff]  ;;  %v1357_v28 = vld [vmem:[#allocation20 + $0xb8] sm:$0xff] }
 0x4d7   :  { %v7294_v31 = vcombine.high %v1352_v27, %v1356_v60  ;;  %v7296_v32 = vcombine.high %v1353_v39, %v1357_v28  ;;  %v7293_v36 = vcombine.low %v1352_v27, %v1356_v60  ;;  %v7295_v47 = vcombine.low %v1353_v39, %v1357_v28  ;;  %v1404_v16 = vld [vmem:[#allocation20 + $0x230] sm:$0xff]  ;;  %v1409_v28 = vld [vmem:[#allocation20 + $0x258] sm:$0xff] }
 0x4d8   :  { %v1408_v60 = vld [vmem:[#allocation20 + $0x250] sm:$0xff] }
 0x4d9   :  { %2976 = vmatpush1.bf16.msra.mxu0 %v7489_v33  ;;  %3058 = vmatpush1.bf16.msra.mxu1 %v7491_v34  ;;  %v1360_v33 = vld [vmem:[#allocation20 + $0xd0] sm:$0xff] }
 0x4da   :  { %2977 = vmatprep.subr.bf16.mxu0 %v7498_v35  ;;  %3059 = vmatprep.subr.bf16.mxu1 %v7500_v9  ;;  %v1364_v34 = vld [vmem:[#allocation20 + $0xf0] sm:$0xff]  ;;  %v1361_v35 = vld [vmem:[#allocation20 + $0xd8] sm:$0xff] }
 0x4db   :  { %v1365_v9 = vld [vmem:[#allocation20 + $0xf8] sm:$0xff]  ;;  %v7302_v49 = vcombine.high %v1360_v33, %v1364_v34  ;;  %v1412_v39 = vld [vmem:[#allocation20 + $0x270] sm:$0xff] }
 0x4dc   :  { %v7304_v11 = vcombine.high %v1361_v35, %v1365_v9  ;;  %v7303_v40 = vcombine.low %v1361_v35, %v1365_v9  ;;  %v1420_v35 = vld [vmem:[#allocation20 + $0x2b0] sm:$0xff]  ;;  %v1417_v9 = vld [vmem:[#allocation20 + $0x298] sm:$0xff] }
 0x4dd   :  { %2978 = vmatpush1.bf16.msra.mxu0 %v7497_v6  ;;  %3060 = vmatpush1.bf16.msra.mxu1 %v7499_v4  ;;  %v1368_v6 = vld [vmem:[#allocation20 + $0x110] sm:$0xff] }
 0x4de   :  { %2979 = vmatprep.subr.bf16.mxu0 %v7506_v37  ;;  %3061 = vmatprep.subr.bf16.mxu1 %v7508_v38  ;;  %v1372_v4 = vld [vmem:[#allocation20 + $0x130] sm:$0xff]  ;;  %v1373_v37 = vld [vmem:[#allocation20 + $0x138] sm:$0xff]  ;;  %v7301_v38 = vcombine.low %v1360_v33, %v1364_v34 }
 0x4df   :  { %v7310_v41 = vcombine.high %v1368_v6, %v1372_v4  ;;  %v1416_v34 = vld [vmem:[#allocation20 + $0x290] sm:$0xff] }
 0x4e1   :  { %2980 = vmatpush1.bf16.msra.mxu0 %v7505_v44  ;;  %3062 = vmatpush1.bf16.msra.mxu1 %v7507_v45  ;;  %v1380_v44 = vld [vmem:[#allocation20 + $0x170] sm:$0xff]  ;;  %v1377_v45 = vld [vmem:[#allocation20 + $0x158] sm:$0xff] }
 0x4e2   :  { %2981 = vmatprep.subr.bf16.mxu0 %v7514_v46  ;;  %3063 = vmatprep.subr.bf16.mxu1 %v7516_v48  ;;  %v1381_v46 = vld [vmem:[#allocation20 + $0x178] sm:$0xff]  ;;  %v7309_v48 = vcombine.low %v1368_v6, %v1372_v4  ;;  %v7318_v51 = vcombine.high %v1376_v43, %v1380_v44  ;;  %v1424_v4 = vld [vmem:[#allocation20 + $0x2d0] sm:$0xff] }
 0x4e3   :  { %v7320_v54 = vcombine.high %v1377_v45, %v1381_v46  ;;  %v7319_v2 = vcombine.low %v1377_v45, %v1381_v46  ;;  %v1436_v45 = vld [vmem:[#allocation20 + $0x330] sm:$0xff]  ;;  %v1433_v46 = vld [vmem:[#allocation20 + $0x318] sm:$0xff] }
 0x4e5   :  { %2982 = vmatpush1.bf16.msra.mxu0 %v7513_v56  ;;  %3064 = vmatpush1.bf16.msra.mxu1 %v7515_v57  ;;  %v1388_v56 = vld [vmem:[#allocation20 + $0x1b0] sm:$0xff]  ;;  %v1385_v57 = vld [vmem:[#allocation20 + $0x198] sm:$0xff] }
 0x4e6   :  { %2983 = vmatprep.subr.bf16.mxu0 %v7522_v58  ;;  %3065 = vmatprep.subr.bf16.mxu1 %v7524_v61  ;;  %v1389_v58 = vld [vmem:[#allocation20 + $0x1b8] sm:$0xff]  ;;  %v7317_v61 = vcombine.low %v1376_v43, %v1380_v44  ;;  %v7326_v3 = vcombine.high %v1384_v55, %v1388_v56  ;;  %v7325_v21 = vcombine.low %v1384_v55, %v1388_v56  ;;  %v1432_v44 = vld [vmem:[#allocation20 + $0x310] sm:$0xff] }
 0x4e7   :  { %v7328_v5 = vcombine.high %v1385_v57, %v1389_v58  ;;  %v1440_v56 = vld [vmem:[#allocation20 + $0x350] sm:$0xff] }
 0x4e9   :  { %2984 = vmatpush1.bf16.msra.mxu0 %v7521_v15  ;;  %3066 = vmatpush1.bf16.msra.mxu1 %v7523_v17  ;;  %v1393_v15 = vld [vmem:[#allocation20 + $0x1d8] sm:$0xff] }
 0x4ea   :  { %3076 = vmatprep.subr.bf16.mxu0 %v7278_v18  ;;  %3158 = vmatprep.subr.bf16.mxu1 %v7280_v19  ;;  %v1397_v17 = vld [vmem:[#allocation20 + $0x1f8] sm:$0xff]  ;;  %v7327_v18 = vcombine.low %v1385_v57, %v1389_v58  ;;  %v7334_v19 = vcombine.high %v1392_v12, %v1396_v13  ;;  %v1444_v57 = vld [vmem:[#allocation20 + $0x370] sm:$0xff] }
 0x4eb   :  { %v7336_v20 = vcombine.high %v1393_v15, %v1397_v17  ;;  %v1441_v58 = vld [vmem:[#allocation20 + $0x358] sm:$0xff] }
 0x4ec   :  { %2986 = vmatmul.mubr.bf16.vlgmr.msra.gmra.mrb[4].mxu0 %v9889_v23  ;;  %3068 = vmatmul.mubr.bf16.vlgmr.msra.gmra.mrb[12].mxu1 %v9889_v23 }
 0x4ed   :  { %3077 = vmatpush1.bf16.msra.mxu0 %v7277_v22  ;;  %3108 = vmatprep.mubr.bf16.mxu0 %v9869_v52  ;;  %v1405_v22 = vld [vmem:[#allocation20 + $0x238] sm:$0xff] }
 0x4ee   :  { %3159 = vmatpush1.bf16.msra.mxu1 %v7279_v25  ;;  %3190 = vmatprep.mubr.bf16.mxu1 %v9869_v52  ;;  %v1369_v52 = vld [vmem:[#allocation20 + $0x118] sm:$0xff]  ;;  %v7333_v25 = vcombine.low %v1392_v12, %v1396_v13  ;;  %v7344_v27 = vcombine.high %v1401_v14, %v1405_v22  ;;  %v1448_v13 = vld [vmem:[#allocation20 + $0x390] sm:$0xff] }
 0x4ef   :  { %3078 = vmatprep.subr.bf16.mxu0 %v7286_v26  ;;  %3160 = vmatprep.subr.bf16.mxu1 %v7288_v62  ;;  %v7312_v42 = vcombine.high %v1369_v52, %v1373_v37  ;;  %v7311_v50 = vcombine.low %v1369_v52, %v1373_v37  ;;  %v7335_v26 = vcombine.low %v1393_v15, %v1397_v17  ;;  %v1428_v52 = vld [vmem:[#allocation20 + $0x2f0] sm:$0xff]  ;;  %v1425_v37 = vld [vmem:[#allocation20 + $0x2d8] sm:$0xff] }
 0x4f0   :  { %v7342_v62 = vcombine.high %v1400_v24, %v1404_v16  ;;  %v1452_v15 = vld [vmem:[#allocation20 + $0x3b0] sm:$0xff]  ;;  %v1449_v17 = vld [vmem:[#allocation20 + $0x398] sm:$0xff] }
 0x4f1   :  { %3079 = vmatpush1.bf16.msra.mxu0 %v7285_v29  ;;  %v1413_v29 = vld [vmem:[#allocation20 + $0x278] sm:$0xff] }
 0x4f2   :  { %3161 = vmatpush1.bf16.msra.mxu1 %v7287_v30  ;;  %3080 = vmatprep.subr.bf16.mxu0 %v7294_v31  ;;  %v7341_v30 = vcombine.low %v1400_v24, %v1404_v16  ;;  %v7343_v31 = vcombine.low %v1401_v14, %v1405_v22  ;;  %v7352_v33 = vcombine.high %v1409_v28, %v1413_v29  ;;  %v1456_v16 = vld [vmem:[#allocation20 + $0x3d0] sm:$0xff]  ;;  %v1457_v22 = vld [vmem:[#allocation20 + $0x3d8] sm:$0xff] }
 0x4f3   :  { %3162 = vmatprep.subr.bf16.mxu1 %v7296_v32  ;;  %v7350_v32 = vcombine.high %v1408_v60, %v1412_v39  ;;  %v1460_v14 = vld [vmem:[#allocation20 + $0x3f0] sm:$0xff] }
 0x4f5   :  { %3081 = vmatpush1.bf16.msra.mxu0 %v7293_v36  ;;  %v1421_v36 = vld [vmem:[#allocation20 + $0x2b8] sm:$0xff] }
 0x4f6   :  { %3163 = vmatpush1.bf16.msra.mxu1 %v7295_v47  ;;  %3082 = vmatprep.subr.bf16.mxu0 %v7302_v49  ;;  %v7349_v47 = vcombine.low %v1408_v60, %v1412_v39  ;;  %v7351_v49 = vcombine.low %v1409_v28, %v1413_v29  ;;  %v7360_v6 = vcombine.high %v1417_v9, %v1421_v36  ;;  %v1464_v39 = vld [vmem:[#allocation20 + $0x410] sm:$0xff]  ;;  %v1465_v29 = vld [vmem:[#allocation20 + $0x418] sm:$0xff] }
 0x4f7   :  { %3164 = vmatprep.subr.bf16.mxu1 %v7304_v11  ;;  %v7358_v11 = vcombine.high %v1416_v34, %v1420_v35  ;;  %v1468_v28 = vld [vmem:[#allocation20 + $0x430] sm:$0xff] }
 0x4f9   :  { %3083 = vmatpush1.bf16.msra.mxu0 %v7301_v38  ;;  %v1429_v38 = vld [vmem:[#allocation20 + $0x2f8] sm:$0xff] }
 0x4fa   :  { %3165 = vmatpush1.bf16.msra.mxu1 %v7303_v40  ;;  %3084 = vmatprep.subr.bf16.mxu0 %v7310_v41  ;;  %v7357_v40 = vcombine.low %v1416_v34, %v1420_v35  ;;  %v7359_v41 = vcombine.low %v1417_v9, %v1421_v36  ;;  %v7368_v43 = vcombine.high %v1425_v37, %v1429_v38  ;;  %v1472_v35 = vld [vmem:[#allocation20 + $0x450] sm:$0xff] }
 0x4fb   :  { %3166 = vmatprep.subr.bf16.mxu1 %v7312_v42  ;;  %v7366_v42 = vcombine.high %v1424_v4, %v1428_v52  ;;  %v1476_v9 = vld [vmem:[#allocation20 + $0x470] sm:$0xff]  ;;  %v7405_v36 = vcombine.low %v1464_v39, %v1468_v28 }
 0x4fd   :  { %3085 = vmatpush1.bf16.msra.mxu0 %v7309_v48  ;;  %v1437_v48 = vld [vmem:[#allocation20 + $0x338] sm:$0xff] }
 0x4fe   :  { %3167 = vmatpush1.bf16.msra.mxu1 %v7311_v50  ;;  %3086 = vmatprep.subr.bf16.mxu0 %v7318_v51  ;;  %v7365_v50 = vcombine.low %v1424_v4, %v1428_v52  ;;  %v7367_v51 = vcombine.low %v1425_v37, %v1429_v38  ;;  %v7376_v55 = vcombine.high %v1433_v46, %v1437_v48  ;;  %v1480_v4 = vld [vmem:[#allocation20 + $0x490] sm:$0xff]  ;;  %v1481_v38 = vld [vmem:[#allocation20 + $0x498] sm:$0xff] }
 0x4ff   :  { %3168 = vmatprep.subr.bf16.mxu1 %v7320_v54  ;;  %v7374_v54 = vcombine.high %v1432_v44, %v1436_v45  ;;  %v1484_v52 = vld [vmem:[#allocation20 + $0x4b0] sm:$0xff] }
 0x501   :  { %3087 = vmatpush1.bf16.msra.mxu0 %v7317_v61  ;;  %v1445_v61 = vld [vmem:[#allocation20 + $0x378] sm:$0xff] }
 0x502   :  { %3169 = vmatpush1.bf16.msra.mxu1 %v7319_v2  ;;  %3088 = vmatprep.subr.bf16.mxu0 %v7326_v3  ;;  %v7373_v2 = vcombine.low %v1432_v44, %v1436_v45  ;;  %v7375_v3 = vcombine.low %v1433_v46, %v1437_v48  ;;  %v7384_v12 = vcombine.high %v1441_v58, %v1445_v61  ;;  %v1488_v45 = vld [vmem:[#allocation20 + $0x4d0] sm:$0xff]  ;;  %v1489_v48 = vld [vmem:[#allocation20 + $0x4d8] sm:$0xff] }
 0x503   :  { %3170 = vmatprep.subr.bf16.mxu1 %v7328_v5  ;;  %v7382_v5 = vcombine.high %v1440_v56, %v1444_v57  ;;  %v1492_v46 = vld [vmem:[#allocation20 + $0x4f0] sm:$0xff] }
 0x505   :  { %3089 = vmatpush1.bf16.msra.mxu0 %v7325_v21  ;;  %v1453_v21 = vld [vmem:[#allocation20 + $0x3b8] sm:$0xff] }
 0x506   :  { %3171 = vmatpush1.bf16.msra.mxu1 %v7327_v18  ;;  %3090 = vmatprep.subr.bf16.mxu0 %v7334_v19  ;;  %v7381_v18 = vcombine.low %v1440_v56, %v1444_v57  ;;  %v7383_v19 = vcombine.low %v1441_v58, %v1445_v61  ;;  %v7392_v24 = vcombine.high %v1449_v17, %v1453_v21  ;;  %v1496_v56 = vld [vmem:[#allocation20 + $0x510] sm:$0xff]  ;;  %v1497_v58 = vld [vmem:[#allocation20 + $0x518] sm:$0xff] }
 0x507   :  { %3172 = vmatprep.subr.bf16.mxu1 %v7336_v20  ;;  %v7390_v20 = vcombine.high %v1448_v13, %v1452_v15  ;;  %v1500_v57 = vld [vmem:[#allocation20 + $0x530] sm:$0xff]  ;;  %v1501_v61 = vld [vmem:[#allocation20 + $0x538] sm:$0xff] }
 0x509   :  { %3091 = vmatpush1.bf16.msra.mxu0 %v7333_v25  ;;  %v1461_v25 = vld [vmem:[#allocation20 + $0x3f8] sm:$0xff] }
 0x50a   :  { %3173 = vmatpush1.bf16.msra.mxu1 %v7335_v26  ;;  %3092 = vmatprep.subr.bf16.mxu0 %v7342_v62  ;;  %v7389_v26 = vcombine.low %v1448_v13, %v1452_v15  ;;  %v7391_v62 = vcombine.low %v1449_v17, %v1453_v21  ;;  %v7400_v60 = vcombine.high %v1457_v22, %v1461_v25  ;;  %v1508_v13 = vld [vmem:[#allocation20 + $0x570] sm:$0xff]  ;;  %v1505_v15 = vld [vmem:[#allocation20 + $0x558] sm:$0xff] }
 0x50b   :  { %3174 = vmatprep.subr.bf16.mxu1 %v7344_v27  ;;  %v7398_v27 = vcombine.high %v1456_v16, %v1460_v14  ;;  %v1509_v17 = vld [vmem:[#allocation20 + $0x578] sm:$0xff]  ;;  %v7437_v21 = vcombine.low %v1496_v56, %v1500_v57 }
 0x50d   :  { %3093 = vmatpush1.bf16.msra.mxu0 %v7341_v30  ;;  %v1469_v30 = vld [vmem:[#allocation20 + $0x438] sm:$0xff] }
 0x50e   :  { %3175 = vmatpush1.bf16.msra.mxu1 %v7343_v31  ;;  %3094 = vmatprep.subr.bf16.mxu0 %v7350_v32  ;;  %v7397_v31 = vcombine.low %v1456_v16, %v1460_v14  ;;  %v7399_v32 = vcombine.low %v1457_v22, %v1461_v25  ;;  %v7408_v34 = vcombine.high %v1465_v29, %v1469_v30  ;;  %v1516_v16 = vld [vmem:[#allocation20 + $0x5b0] sm:$0xff]  ;;  %v1513_v14 = vld [vmem:[#allocation20 + $0x598] sm:$0xff] }
 0x50f   :  { %3176 = vmatprep.subr.bf16.mxu1 %v7352_v33  ;;  %v7406_v33 = vcombine.high %v1464_v39, %v1468_v28  ;;  %v1517_v22 = vld [vmem:[#allocation20 + $0x5b8] sm:$0xff]  ;;  %v1524_v39 = vld [vmem:[#allocation20 + $0x5f0] sm:$0xff] }
 0x510   :  { %v1521_v28 = vld [vmem:[#allocation20 + $0x5d8] sm:$0xff] }
 0x511   :  { %3095 = vmatpush1.bf16.msra.mxu0 %v7349_v47  ;;  %v1473_v47 = vld [vmem:[#allocation20 + $0x458] sm:$0xff] }
 0x512   :  { %3177 = vmatpush1.bf16.msra.mxu1 %v7351_v49  ;;  %3096 = vmatprep.subr.bf16.mxu0 %v7358_v11  ;;  %v1477_v49 = vld [vmem:[#allocation20 + $0x478] sm:$0xff]  ;;  %v7407_v11 = vcombine.low %v1465_v29, %v1469_v30 }
 0x513   :  { %3178 = vmatprep.subr.bf16.mxu1 %v7360_v6  ;;  %v7414_v6 = vcombine.high %v1472_v35, %v1476_v9  ;;  %v7416_v37 = vcombine.high %v1473_v47, %v1477_v49  ;;  %v1525_v29 = vld [vmem:[#allocation20 + $0x5f8] sm:$0xff] }
 0x515   :  { %3097 = vmatpush1.bf16.msra.mxu0 %v7357_v40  ;;  %v1485_v40 = vld [vmem:[#allocation20 + $0x4b8] sm:$0xff] }
 0x516   :  { %3179 = vmatpush1.bf16.msra.mxu1 %v7359_v41  ;;  %3098 = vmatprep.subr.bf16.mxu0 %v7366_v42  ;;  %v7413_v41 = vcombine.low %v1472_v35, %v1476_v9  ;;  %v7415_v42 = vcombine.low %v1473_v47, %v1477_v49  ;;  %v7424_v44 = vcombine.high %v1481_v38, %v1485_v40  ;;  %v1532_v35 = vld [vmem:[#allocation20 + $0x630] sm:$0xff]  ;;  %v1529_v9 = vld [vmem:[#allocation20 + $0x618] sm:$0xff] }
 0x517   :  { %3180 = vmatprep.subr.bf16.mxu1 %v7368_v43  ;;  %v7422_v43 = vcombine.high %v1480_v4, %v1484_v52  ;;  %v7463_v49 = vcombine.low %v1521_v28, %v1525_v29 }
 0x519   :  { %3099 = vmatpush1.bf16.msra.mxu0 %v7365_v50  ;;  %v1493_v50 = vld [vmem:[#allocation20 + $0x4f8] sm:$0xff] }
 0x51a   :  { %3181 = vmatpush1.bf16.msra.mxu1 %v7367_v51  ;;  %3100 = vmatprep.subr.bf16.mxu0 %v7374_v54  ;;  %v7421_v51 = vcombine.low %v1480_v4, %v1484_v52  ;;  %v7430_v54 = vcombine.high %v1488_v45, %v1492_v46  ;;  %v1536_v4 = vld [vmem:[#allocation20 + $0x650] sm:$0xff] }
 0x51b   :  { %3182 = vmatprep.subr.bf16.mxu1 %v7376_v55  ;;  %v7432_v55 = vcombine.high %v1489_v48, %v1493_v50  ;;  %v1540_v52 = vld [vmem:[#allocation20 + $0x670] sm:$0xff] }
 0x51d   :  { %3101 = vmatpush1.bf16.msra.mxu0 %v7373_v2  ;;  %v7431_v2 = vcombine.low %v1489_v48, %v1493_v50  ;;  %v1549_v48 = vld [vmem:[#allocation20 + $0x6b8] sm:$0xff]  ;;  %v7477_v50 = vcombine.low %v1536_v4, %v1540_v52 }
 0x51e   :  { %3183 = vmatpush1.bf16.msra.mxu1 %v7375_v3  ;;  %3102 = vmatprep.subr.bf16.mxu0 %v7382_v5  ;;  %v7438_v3 = vcombine.high %v1496_v56, %v1500_v57  ;;  %v7440_v5 = vcombine.high %v1497_v58, %v1501_v61  ;;  %v1556_v56 = vld [vmem:[#allocation20 + $0x6f0] sm:$0xff]  ;;  %v1553_v57 = vld [vmem:[#allocation20 + $0x6d8] sm:$0xff] }
 0x51f   :  { %3184 = vmatprep.subr.bf16.mxu1 %v7384_v12  ;;  %v1504_v12 = vld [vmem:[#allocation20 + $0x550] sm:$0xff] }
 0x520   :  { %v7445_v25 = vcombine.low %v1504_v12, %v1508_v13 }
 0x521   :  { %3103 = vmatpush1.bf16.msra.mxu0 %v7381_v18  ;;  %v7439_v18 = vcombine.low %v1497_v58, %v1501_v61  ;;  %v1557_v58 = vld [vmem:[#allocation20 + $0x6f8] sm:$0xff] }
 0x522   :  { %3185 = vmatpush1.bf16.msra.mxu1 %v7383_v19  ;;  %3104 = vmatprep.subr.bf16.mxu0 %v7390_v20  ;;  %v7446_v19 = vcombine.high %v1504_v12, %v1508_v13  ;;  %v7448_v20 = vcombine.high %v1505_v15, %v1509_v17  ;;  %v1564_v12 = vld [vmem:[#allocation20 + $0x730] sm:$0xff]  ;;  %v1561_v13 = vld [vmem:[#allocation20 + $0x718] sm:$0xff] }
 0x523   :  { %3186 = vmatprep.subr.bf16.mxu1 %v7392_v24  ;;  %v1512_v24 = vld [vmem:[#allocation20 + $0x590] sm:$0xff] }
 0x524   :  { %v7453_v30 = vcombine.low %v1512_v24, %v1516_v16 }
 0x525   :  { %3105 = vmatpush1.bf16.msra.mxu0 %v7389_v26  ;;  %v7447_v26 = vcombine.low %v1505_v15, %v1509_v17  ;;  %v1565_v15 = vld [vmem:[#allocation20 + $0x738] sm:$0xff] }
 0x526   :  { %3187 = vmatpush1.bf16.msra.mxu1 %v7391_v62  ;;  %3106 = vmatprep.subr.bf16.mxu0 %v7398_v27  ;;  %v7454_v62 = vcombine.high %v1512_v24, %v1516_v16  ;;  %v7456_v27 = vcombine.high %v1513_v14, %v1517_v22  ;;  %v1572_v24 = vld [vmem:[#allocation20 + $0x770] sm:$0xff]  ;;  %v1569_v16 = vld [vmem:[#allocation20 + $0x758] sm:$0xff] }
 0x527   :  { %3188 = vmatprep.subr.bf16.mxu1 %v7400_v60  ;;  %v1520_v60 = vld [vmem:[#allocation20 + $0x5d0] sm:$0xff] }
 0x528   :  { %v7461_v47 = vcombine.low %v1520_v60, %v1524_v39 }
 0x529   :  { %3107 = vmatpush1.bf16.msra.mxu0 %v7397_v31  ;;  %v7455_v31 = vcombine.low %v1513_v14, %v1517_v22  ;;  %v1573_v14 = vld [vmem:[#allocation20 + $0x778] sm:$0xff] }
 0x52a   :  { %3189 = vmatpush1.bf16.msra.mxu1 %v7399_v32  ;;  %3117 = vmatprep.subr.bf16.mxu0 %v7406_v33  ;;  %v7462_v32 = vcombine.high %v1520_v60, %v1524_v39  ;;  %v7464_v33 = vcombine.high %v1521_v28, %v1525_v29  ;;  %v1580_v60 = vld [vmem:[#allocation20 + $0x7b0] sm:$0xff]  ;;  %v1577_v39 = vld [vmem:[#allocation20 + $0x798] sm:$0xff] }
 0x52b   :  { %3199 = vmatprep.subr.bf16.mxu1 %v7408_v34  ;;  %v1528_v34 = vld [vmem:[#allocation20 + $0x610] sm:$0xff]  ;;  %v1581_v28 = vld [vmem:[#allocation20 + $0x7b8] sm:$0xff] }
 0x52c   :  { %3109 = vmatmul.mubr.bf16.vlgmr.msra.gmra.mrb[8].mxu0 %v9871_v53 }
 0x52d   :  { %3191 = vmatmul.mubr.bf16.vlgmr.msra.gmra.mrb[16].mxu1 %v9871_v53  ;;  %3118 = vmatpush1.bf16.msra.mxu0 %v7405_v36  ;;  %v7423_v53 = vcombine.low %v1481_v38, %v1485_v40  ;;  %v1533_v36 = vld [vmem:[#allocation20 + $0x638] sm:$0xff]  ;;  %v7469_v40 = vcombine.low %v1528_v34, %v1532_v35 }
 0x52e   :  { %3149 = vmatprep.mubr.bf16.mxu0 %v9877_v1  ;;  %3200 = vmatpush1.bf16.msra.mxu1 %v7407_v11  ;;  %v7470_v11 = vcombine.high %v1528_v34, %v1532_v35  ;;  %v1541_v38 = vld [vmem:[#allocation20 + $0x678] sm:$0xff]  ;;  %v1588_v34 = vld [vmem:[#allocation20 + $0x7f0] sm:$0xff] }
 0x52f   :  { %3231 = vmatprep.mubr.bf16.mxu1 %v9877_v1  ;;  %3119 = vmatprep.subr.bf16.mxu0 %v7414_v6  ;;  %v7429_v1 = vcombine.low %v1488_v45, %v1492_v46  ;;  %v7472_v6 = vcombine.high %v1529_v9, %v1533_v36  ;;  %v1548_v45 = vld [vmem:[#allocation20 + $0x6b0] sm:$0xff]  ;;  %v1545_v46 = vld [vmem:[#allocation20 + $0x698] sm:$0xff] }
 0x530   :  { %3201 = vmatprep.subr.bf16.mxu1 %v7416_v37  ;;  %v1537_v37 = vld [vmem:[#allocation20 + $0x658] sm:$0xff] }
 0x531   :  { %3120 = vmatpush1.bf16.msra.mxu0 %v7413_v41  ;;  %v7471_v41 = vcombine.low %v1529_v9, %v1533_v36  ;;  %v1585_v35 = vld [vmem:[#allocation20 + $0x7d8] sm:$0xff] }
 0x532   :  { %3202 = vmatpush1.bf16.msra.mxu1 %v7415_v42  ;;  %3121 = vmatprep.subr.bf16.mxu0 %v7422_v43  ;;  %v7478_v42 = vcombine.high %v1536_v4, %v1540_v52  ;;  %v7480_v43 = vcombine.high %v1537_v37, %v1541_v38  ;;  %v1589_v9 = vld [vmem:[#allocation20 + $0x7f8] sm:$0xff]  ;;  %v9901_v52 = vld [vmem:[#allocation22] sm:$0xff] }
 0x533   :  { %3203 = vmatprep.subr.bf16.mxu1 %v7424_v44  ;;  %v1544_v44 = vld [vmem:[#allocation20 + $0x690] sm:$0xff]  ;;  %v7527_v4 = vcombine.low %v1585_v35, %v1589_v9 }
 0x534   :  { %v7485_v61 = vcombine.low %v1544_v44, %v1548_v45 }
 0x535   :  { %3122 = vmatpush1.bf16.msra.mxu0 %v7421_v51  ;;  %v7479_v51 = vcombine.low %v1537_v37, %v1541_v38  ;;  %v1595_v37 = vrot.slane %v9901_v52, %v9768_v8  ;;  %v1603_v38 = vrot.slane %v9901_v52, %v9833_v63 }
 0x536   :  { %3204 = vmatpush1.bf16.msra.mxu1 %v7423_v53  ;;  %3123 = vmatprep.subr.bf16.mxu0 %v7430_v54  ;;  %v7486_v53 = vcombine.high %v1544_v44, %v1548_v45  ;;  %v7488_v54 = vcombine.high %v1545_v46, %v1549_v48 }
 0x537   :  { %3205 = vmatprep.subr.bf16.mxu1 %v7432_v55  ;;  %v1552_v55 = vld [vmem:[#allocation20 + $0x6d0] sm:$0xff] }
 0x538   :  { %v7493_v17 = vcombine.low %v1552_v55, %v1556_v56 }
 0x539   :  { %3124 = vmatpush1.bf16.msra.mxu0 %v7429_v1  ;;  %v7487_v1 = vcombine.low %v1545_v46, %v1549_v48 }
 0x53a   :  { %3206 = vmatpush1.bf16.msra.mxu1 %v7431_v2  ;;  %3125 = vmatprep.subr.bf16.mxu0 %v7438_v3  ;;  %v7494_v2 = vcombine.high %v1552_v55, %v1556_v56  ;;  %v7496_v3 = vcombine.high %v1553_v57, %v1557_v58 }
 0x53b   :  { %3207 = vmatprep.subr.bf16.mxu1 %v7440_v5  ;;  %v1560_v5 = vld [vmem:[#allocation20 + $0x710] sm:$0xff] }
 0x53c   :  { %v7501_v22 = vcombine.low %v1560_v5, %v1564_v12 }
 0x53d   :  { %3126 = vmatpush1.bf16.msra.mxu0 %v7437_v21  ;;  %v7495_v21 = vcombine.low %v1553_v57, %v1557_v58 }
 0x53e   :  { %3208 = vmatpush1.bf16.msra.mxu1 %v7439_v18  ;;  %3127 = vmatprep.subr.bf16.mxu0 %v7446_v19  ;;  %v7502_v18 = vcombine.high %v1560_v5, %v1564_v12  ;;  %v7504_v19 = vcombine.high %v1561_v13, %v1565_v15 }
 0x53f   :  { %3209 = vmatprep.subr.bf16.mxu1 %v7448_v20  ;;  %v1568_v20 = vld [vmem:[#allocation20 + $0x750] sm:$0xff] }
 0x540   :  { %v7509_v29 = vcombine.low %v1568_v20, %v1572_v24 }
 0x541   :  { %3128 = vmatpush1.bf16.msra.mxu0 %v7445_v25  ;;  %v7503_v25 = vcombine.low %v1561_v13, %v1565_v15 }
 0x542   :  { %3210 = vmatpush1.bf16.msra.mxu1 %v7447_v26  ;;  %3129 = vmatprep.subr.bf16.mxu0 %v7454_v62  ;;  %v7510_v26 = vcombine.high %v1568_v20, %v1572_v24  ;;  %v7512_v62 = vcombine.high %v1569_v16, %v1573_v14 }
 0x543   :  { %3211 = vmatprep.subr.bf16.mxu1 %v7456_v27  ;;  %v1576_v27 = vld [vmem:[#allocation20 + $0x790] sm:$0xff] }
 0x544   :  { %v7517_v36 = vcombine.low %v1576_v27, %v1580_v60 }
 0x545   :  { %3130 = vmatpush1.bf16.msra.mxu0 %v7453_v30  ;;  %v7511_v30 = vcombine.low %v1569_v16, %v1573_v14 }
 0x546   :  { %3212 = vmatpush1.bf16.msra.mxu1 %v7455_v31  ;;  %3131 = vmatprep.subr.bf16.mxu0 %v7462_v32  ;;  %v7518_v31 = vcombine.high %v1576_v27, %v1580_v60  ;;  %v7520_v32 = vcombine.high %v1577_v39, %v1581_v28 }
 0x547   :  { %3213 = vmatprep.subr.bf16.mxu1 %v7464_v33  ;;  %v1584_v33 = vld [vmem:[#allocation20 + $0x7d0] sm:$0xff] }
 0x549   :  { %3132 = vmatpush1.bf16.msra.mxu0 %v7461_v47  ;;  %v7519_v47 = vcombine.low %v1577_v39, %v1581_v28 }
 0x54a   :  { %3214 = vmatpush1.bf16.msra.mxu1 %v7463_v49  ;;  %3133 = vmatprep.subr.bf16.mxu0 %v7470_v11  ;;  %v7526_v49 = vcombine.high %v1584_v33, %v1588_v34  ;;  %v7528_v11 = vcombine.high %v1585_v35, %v1589_v9 }
 0x54b   :  { %3215 = vmatprep.subr.bf16.mxu1 %v7472_v6  ;;  %v7525_v6 = vcombine.low %v1584_v33, %v1588_v34 }
 0x54d   :  { %3134 = vmatpush1.bf16.msra.mxu0 %v7469_v40  ;;  %v1599_v40 = vrot.slane %v9901_v52, %v9771_v10 }
 0x54e   :  { %3216 = vmatpush1.bf16.msra.mxu1 %v7471_v41  ;;  %3135 = vmatprep.subr.bf16.mxu0 %v7478_v42  ;;  %v1607_v41 = vrot.slane %v9901_v52, %v9836_v0 }
 0x54f   :  { %3217 = vmatprep.subr.bf16.mxu1 %v7480_v43 }
 0x551   :  { %3136 = vmatpush1.bf16.msra.mxu0 %v7477_v50 }
 0x552   :  { %3218 = vmatpush1.bf16.msra.mxu1 %v7479_v51  ;;  %3137 = vmatprep.subr.bf16.mxu0 %v7486_v53 }
 0x553   :  { %3219 = vmatprep.subr.bf16.mxu1 %v7488_v54 }
 0x555   :  { %3138 = vmatpush1.bf16.msra.mxu0 %v7485_v61 }
 0x556   :  { %3220 = vmatpush1.bf16.msra.mxu1 %v7487_v1  ;;  %3139 = vmatprep.subr.bf16.mxu0 %v7494_v2 }
 0x557   :  { %3221 = vmatprep.subr.bf16.mxu1 %v7496_v3 }
 0x559   :  { %3140 = vmatpush1.bf16.msra.mxu0 %v7493_v17 }
 0x55a   :  { %3222 = vmatpush1.bf16.msra.mxu1 %v7495_v21  ;;  %3141 = vmatprep.subr.bf16.mxu0 %v7502_v18 }
 0x55b   :  { %3223 = vmatprep.subr.bf16.mxu1 %v7504_v19 }
 0x55d   :  { %3142 = vmatpush1.bf16.msra.mxu0 %v7501_v22 }
 0x55e   :  { %3224 = vmatpush1.bf16.msra.mxu1 %v7503_v25  ;;  %3143 = vmatprep.subr.bf16.mxu0 %v7510_v26 }
 0x55f   :  { %3225 = vmatprep.subr.bf16.mxu1 %v7512_v62 }
 0x561   :  { %3144 = vmatpush1.bf16.msra.mxu0 %v7509_v29 }
 0x562   :  { %3226 = vmatpush1.bf16.msra.mxu1 %v7511_v30  ;;  %3145 = vmatprep.subr.bf16.mxu0 %v7518_v31 }
 0x563   :  { %3227 = vmatprep.subr.bf16.mxu1 %v7520_v32 }
 0x565   :  { %3146 = vmatpush1.bf16.msra.mxu0 %v7517_v36 }
 0x566   :  { %3228 = vmatpush1.bf16.msra.mxu1 %v7519_v47  ;;  %3147 = vmatprep.subr.bf16.mxu0 %v7526_v49  ;;  %v8322_v47 = vld [vmem:[#allocation26 + $0x4] ss:$28 sps:$4 sm:$0xff]   ;;  %v8325_v49 = vld [vmem:[#allocation26 + $0xc] ss:$28 sps:$4 sm:$0xff]  }
 0x567   :  { %3229 = vmatprep.subr.bf16.mxu1 %v7528_v11 }
 0x569   :  { %3148 = vmatpush1.bf16.msra.mxu0 %v7525_v6 }
 0x56a   :  { %3230 = vmatpush1.bf16.msra.mxu1 %v7527_v4  ;;  %6495 = vmatprep.subr.bf16.mxu0 %v8322_v47  ;;  %v8349_v47 = vld [vmem:[#allocation26 + $0xec] ss:$28 sps:$4 sm:$0xff]  }
 0x56b   :  { %6659 = vmatprep.subr.bf16.mxu1 %v8325_v49  ;;  %v8344_v49 = vld [vmem:[#allocation26 + $0xe0] ss:$28 sps:$4 sm:$0xff]  }
 0x56c   :  { %3150 = vmatmul.mubr.bf16.vlgmr.msra.gmra.mrb[8].mxu0 %v9889_v23 }
 0x56d   :  { %3232 = vmatmul.mubr.bf16.vlgmr.msra.gmra.mrb[16].mxu1 %v9889_v23 }
 0x5bf   :  { %v2987_v42 = vpop.f32.mrb[4].mxu0  ;;  %v3069_v43 = vpop.f32.mrb[12].mxu1 }
 0x5c0   :  { %v9911_v44 = vadd.f32 %v2987_v42, %v1595_v37  ;;  %v9913_v45 = vadd.f32 %v3069_v43, %v1603_v38  ;;  %v2989_v23 = vpop.f32.mrb[5].mxu0  ;;  %v3071_v46 = vpop.f32.mrb[13].mxu1  ;;  %v8320_v38 = vld [vmem:[#allocation26] ss:$28 sps:$4 sm:$0xff]  }
 0x5c1   :  { %v9915_v48 = vadd.f32 %v2989_v23, %v1599_v40  ;;  %v9917_v50 = vadd.f32 %v3071_v46, %v1607_v41  ;;  %v2991_v51 = vpop.f32.mrb[6].mxu0  ;;  %v3073_v53 = vpop.f32.mrb[14].mxu1  ;;  %v8323_v40 = vld [vmem:[#allocation26 + $0x8] ss:$28 sps:$4 sm:$0xff]   ;;  %6496 = vmatpush1.bf16.msra.mxu0 %v8320_v38  ;;  %v8353_v38 = vld [vmem:[#allocation26 + $0x120] ss:$28 sps:$4 sm:$0xff]  }
 0x5c2   :  { %v3242_v54 = vrot.slane %v9911_v44, 4  ;;  %v3290_v55 = vmul.f32 %v9911_v44, %v9911_v44  ;;  %v3254_v56 = vrot.slane %v9913_v45, 4  ;;  %v3292_v57 = vmul.f32 %v9913_v45, %v9913_v45  ;;  %v2992_v58 = vpop.f32.mrb[7].mxu0  ;;  %v3074_v61 = vpop.f32.mrb[15].mxu1  ;;  %6660 = vmatpush1.bf16.msra.mxu1 %v8323_v40 }
 0x5c3   :  { %v3248_v1 = vrot.slane %v9915_v48, 4  ;;  %v3291_v2 = vmul.f32 %v9915_v48, %v9915_v48  ;;  %v3260_v3 = vrot.slane %v9917_v50, 4  ;;  %v3293_v5 = vmul.f32 %v9917_v50, %v9917_v50  ;;  %v8328_v61 = vld [vmem:[#allocation26 + $0x3c] ss:$28 sps:$4 sm:$0xff]  }
 0x5c4   :  { %v3243_v12 = vadd.f32 %v9911_v44, %v3242_v54  ;;  %v3298_v13 = vrot.slane %v3290_v55, 4  ;;  %v3255_v15 = vadd.f32 %v9913_v45, %v3254_v56  ;;  %v3310_v17 = vrot.slane %v3292_v57, 4  ;;  %6497 = vmatprep.subr.bf16.mxu0 %v8328_v61 }
 0x5c5   :  { %v3249_v21 = vadd.f32 %v9915_v48, %v3248_v1  ;;  %v3304_v18 = vrot.slane %v3291_v2, 4  ;;  %v3261_v19 = vadd.f32 %v9917_v50, %v3260_v3  ;;  %v3316_v20 = vrot.slane %v3293_v5, 4  ;;  %v8331_v1 = vld [vmem:[#allocation26 + $0x44] ss:$28 sps:$4 sm:$0xff]  }
 0x5c6   :  { %v3244_v24 = vrot.slane %v3243_v12, 2  ;;  %v3299_v16 = vadd.f32 %v3298_v13, %v3290_v55  ;;  %v3256_v14 = vrot.slane %v3255_v15, 2  ;;  %v3311_v22 = vadd.f32 %v3310_v17, %v3292_v57  ;;  %v8326_v13 = vld [vmem:[#allocation26 + $0x38] ss:$28 sps:$4 sm:$0xff]   ;;  %6661 = vmatprep.subr.bf16.mxu1 %v8331_v1  ;;  %v8364_v1 = vld [vmem:[#allocation26 + $0x18c] ss:$28 sps:$4 sm:$0xff]  }
 0x5c7   :  { %v3250_v25 = vrot.slane %v3249_v21, 2  ;;  %v3305_v26 = vadd.f32 %v3304_v18, %v3291_v2  ;;  %v3262_v62 = vrot.slane %v3261_v19, 2  ;;  %v3317_v27 = vadd.f32 %v3316_v20, %v3293_v5  ;;  %6498 = vmatpush1.bf16.msra.mxu0 %v8326_v13  ;;  %v8365_v13 = vld [vmem:[#allocation26 + $0x190] ss:$28 sps:$4 sm:$0xff]  }
 0x5c8   :  { %v3245_v60 = vadd.f32 %v3244_v24, %v3243_v12  ;;  %v3300_v39 = vrot.slane %v3299_v16, 2  ;;  %v3257_v28 = vadd.f32 %v3256_v14, %v3255_v15  ;;  %v3312_v29 = vrot.slane %v3311_v22, 2  ;;  %v8329_v15 = vld [vmem:[#allocation26 + $0x40] ss:$28 sps:$4 sm:$0xff]  }
 0x5c9   :  { %v3251_v30 = vadd.f32 %v3250_v25, %v3249_v21  ;;  %v3306_v31 = vrot.slane %v3305_v26, 2  ;;  %v3263_v32 = vadd.f32 %v3262_v62, %v3261_v19  ;;  %v3318_v33 = vrot.slane %v3317_v27, 2  ;;  %6662 = vmatpush1.bf16.msra.mxu1 %v8329_v15  ;;  %v8337_v62 = vld [vmem:[#allocation26 + $0x7c] ss:$28 sps:$4 sm:$0xff]  }
 0x5ca   :  { %v3246_v34 = vrot.slane %v3245_v60, 1  ;;  %v3301_v35 = vadd.f32 %v3300_v39, %v3299_v16  ;;  %v3258_v9 = vrot.slane %v3257_v28, 1  ;;  %v3313_v36 = vadd.f32 %v3312_v29, %v3311_v22  ;;  %v8332_v39 = vld [vmem:[#allocation26 + $0x70] ss:$28 sps:$4 sm:$0xff]   ;;  %6663 = vmatprep.subr.bf16.mxu1 %v8337_v62  ;;  %v8383_v62 = vld [vmem:[#allocation26 + $0x238] ss:$28 sps:$4 sm:$0xff]  }
 0x5cb   :  { %v3252_v11 = vrot.slane %v3251_v30, 1  ;;  %v3307_v6 = vadd.f32 %v3306_v31, %v3305_v26  ;;  %v3264_v4 = vrot.slane %v3263_v32, 1  ;;  %v3319_v37 = vadd.f32 %v3318_v33, %v3317_v27  ;;  %v8334_v26 = vld [vmem:[#allocation26 + $0x74] ss:$28 sps:$4 sm:$0xff]   ;;  %v8340_v33 = vld [vmem:[#allocation26 + $0xac] ss:$28 sps:$4 sm:$0xff]  }
 0x5cc   :  { %v3247_v41 = vadd.f32 %v3246_v34, %v3245_v60  ;;  %v3302_v42 = vrot.slane %v3301_v35, 1  ;;  %v3259_v43 = vadd.f32 %v3258_v9, %v3257_v28  ;;  %v3314_v23 = vrot.slane %v3313_v36, 1  ;;  %v8335_v28 = vld [vmem:[#allocation26 + $0x78] ss:$28 sps:$4 sm:$0xff]   ;;  %6499 = vmatprep.subr.bf16.mxu0 %v8334_v26  ;;  %v8341_v9 = vld [vmem:[#allocation26 + $0xb0] ss:$28 sps:$4 sm:$0xff]  }
 0x5cd   :  { %v3253_v46 = vadd.f32 %v3252_v11, %v3251_v30  ;;  %v3308_v51 = vrot.slane %v3307_v6, 1  ;;  %v3265_v53 = vadd.f32 %v3264_v4, %v3263_v32  ;;  %v3320_v54 = vrot.slane %v3319_v37, 1  ;;  %6500 = vmatpush1.bf16.msra.mxu0 %v8332_v39  ;;  %6664 = vmatpush1.bf16.msra.mxu1 %v8335_v28  ;;  %v8343_v34 = vld [vmem:[#allocation26 + $0xb4] ss:$28 sps:$4 sm:$0xff]   ;;  %v8347_v11 = vld [vmem:[#allocation26 + $0xe8] ss:$28 sps:$4 sm:$0xff]  }
 0x5ce   :  { %v3303_v55 = vadd.f32 %v3302_v42, %v3301_v35  ;;  %v9935_v56 = vmul.f32 0.125, %v3247_v41  ;;  %v3315_v57 = vadd.f32 %v3314_v23, %v3313_v36  ;;  %v9937_v58 = vmul.f32 0.125, %v3259_v43  ;;  %v8338_v35 = vld [vmem:[#allocation26 + $0xa8] ss:$28 sps:$4 sm:$0xff]   ;;  %6501 = vmatprep.subr.bf16.mxu0 %v8340_v33  ;;  %6665 = vmatprep.subr.bf16.mxu1 %v8343_v34  ;;  %v8358_v43 = vld [vmem:[#allocation26 + $0x154] ss:$28 sps:$4 sm:$0xff]  }
 0x5cf   :  { %v3309_v2 = vadd.f32 %v3308_v51, %v3307_v6  ;;  %v9939_v3 = vmul.f32 0.125, %v3253_v46  ;;  %v3321_v5 = vadd.f32 %v3320_v54, %v3319_v37  ;;  %v9941_v12 = vmul.f32 0.125, %v3265_v53  ;;  %v8346_v36 = vld [vmem:[#allocation26 + $0xe4] ss:$28 sps:$4 sm:$0xff]   ;;  %v8352_v6 = vld [vmem:[#allocation26 + $0x11c] ss:$28 sps:$4 sm:$0xff]  }
 0x5d0   :  { %v3354_v17 = vmul.f32 0.125, %v3303_v55  ;;  %v3362_v21 = vmul.f32 %v9935_v56, %v9935_v56  ;;  %v3356_v18 = vmul.f32 0.125, %v3315_v57  ;;  %v3364_v19 = vmul.f32 %v9937_v58, %v9937_v58  ;;  %v8355_v4 = vld [vmem:[#allocation26 + $0x124] ss:$28 sps:$4 sm:$0xff]   ;;  %v8350_v37 = vld [vmem:[#allocation26 + $0x118] ss:$28 sps:$4 sm:$0xff]  }
 0x5d1   :  { %v3355_v20 = vmul.f32 0.125, %v3309_v2  ;;  %v3363_v24 = vmul.f32 %v9939_v3, %v9939_v3  ;;  %v3357_v16 = vmul.f32 0.125, %v3321_v5  ;;  %v3365_v14 = vmul.f32 %v9941_v12, %v9941_v12  ;;  %6502 = vmatpush1.bf16.msra.mxu0 %v8338_v35  ;;  %6666 = vmatpush1.bf16.msra.mxu1 %v8341_v9  ;;  %v8361_v23 = vld [vmem:[#allocation26 + $0x15c] ss:$28 sps:$4 sm:$0xff]   ;;  %v8356_v53 = vld [vmem:[#allocation26 + $0x150] ss:$28 sps:$4 sm:$0xff]  }
 0x5d2   :  { %v3370_v22 = vsub.f32 %v3354_v17, %v3362_v21  ;;  %v3372_v25 = vsub.f32 %v3356_v18, %v3364_v19  ;;  %6503 = vmatprep.subr.bf16.mxu0 %v8346_v36  ;;  %6667 = vmatprep.subr.bf16.mxu1 %v8349_v47  ;;  %v8359_v54 = vld [vmem:[#allocation26 + $0x158] ss:$28 sps:$4 sm:$0xff]   ;;  %v8362_v5 = vld [vmem:[#allocation26 + $0x188] ss:$28 sps:$4 sm:$0xff]   ;;  %v8368_v18 = vld [vmem:[#allocation26 + $0x1c0] ss:$28 sps:$4 sm:$0xff]  }
 0x5d3   :  { %v3371_v27 = vsub.f32 %v3355_v20, %v3363_v24  ;;  %v3373_v60 = vsub.f32 %v3357_v16, %v3365_v14  ;;  %v8367_v2 = vld [vmem:[#allocation26 + $0x194] ss:$28 sps:$4 sm:$0xff]   ;;  %v8370_v17 = vld [vmem:[#allocation26 + $0x1c4] ss:$28 sps:$4 sm:$0xff]   ;;  %v8373_v21 = vld [vmem:[#allocation26 + $0x1cc] ss:$28 sps:$4 sm:$0xff]  }
 0x5d4   :  { %v3378_v29 = vadd.f32 1e-05, %v3370_v22  ;;  %v3380_v30 = vadd.f32 1e-05, %v3372_v25  ;;  %v8371_v19 = vld [vmem:[#allocation26 + $0x1c8] ss:$28 sps:$4 sm:$0xff]  }
 0x5d5   :  { %v3379_v31 = vadd.f32 1e-05, %v3371_v27  ;;  %v3381_v32 = vadd.f32 1e-05, %v3373_v60  ;;  %6504 = vmatpush1.bf16.msra.mxu0 %v8344_v49  ;;  %6668 = vmatpush1.bf16.msra.mxu1 %v8347_v11  ;;  %v8376_v20 = vld [vmem:[#allocation26 + $0x1fc] ss:$28 sps:$4 sm:$0xff]  }
 0x5d6   :  { %8972 = vrsqrt.f32 %v3378_v29  ;;  %6505 = vmatprep.subr.bf16.mxu0 %v8352_v6  ;;  %6669 = vmatprep.subr.bf16.mxu1 %v8355_v4  ;;  %v8379_v24 = vld [vmem:[#allocation26 + $0x204] ss:$28 sps:$4 sm:$0xff]   ;;  %v8374_v16 = vld [vmem:[#allocation26 + $0x1f8] ss:$28 sps:$4 sm:$0xff]   ;;  %v8380_v26 = vld [vmem:[#allocation26 + $0x230] ss:$28 sps:$4 sm:$0xff]  }
 0x5d7   :  { %8974 = vrsqrt.f32 %v3380_v30  ;;  %v8377_v14 = vld [vmem:[#allocation26 + $0x200] ss:$28 sps:$4 sm:$0xff]   ;;  %v8382_v22 = vld [vmem:[#allocation26 + $0x234] ss:$28 sps:$4 sm:$0xff]   ;;  %v8388_v27 = vld [vmem:[#allocation26 + $0x26c] ss:$28 sps:$4 sm:$0xff]  }
 0x5d8   :  { %8976 = vrsqrt.f32 %v3379_v31  ;;  %v8385_v25 = vld [vmem:[#allocation26 + $0x23c] ss:$28 sps:$4 sm:$0xff]   ;;  %v8391_v60 = vld [vmem:[#allocation26 + $0x274] ss:$28 sps:$4 sm:$0xff]   ;;  %v8386_v39 = vld [vmem:[#allocation26 + $0x268] ss:$28 sps:$4 sm:$0xff]  }
 0x5d9   :  { %8978 = vrsqrt.f32 %v3381_v32  ;;  %6506 = vmatpush1.bf16.msra.mxu0 %v8350_v37  ;;  %6670 = vmatpush1.bf16.msra.mxu1 %v8353_v38  ;;  %v8389_v28 = vld [vmem:[#allocation26 + $0x270] ss:$28 sps:$4 sm:$0xff]   ;;  %v8394_v29 = vld [vmem:[#allocation26 + $0x2a4] ss:$28 sps:$4 sm:$0xff]   ;;  %v8400_v33 = vld [vmem:[#allocation26 + $0x2dc] ss:$28 sps:$4 sm:$0xff]  }
 0x5da   :  { %6507 = vmatprep.subr.bf16.mxu0 %v8358_v43  ;;  %6671 = vmatprep.subr.bf16.mxu1 %v8361_v23  ;;  %v8397_v30 = vld [vmem:[#allocation26 + $0x2ac] ss:$28 sps:$4 sm:$0xff]   ;;  %v8392_v31 = vld [vmem:[#allocation26 + $0x2a0] ss:$28 sps:$4 sm:$0xff]   ;;  %v8398_v35 = vld [vmem:[#allocation26 + $0x2d8] ss:$28 sps:$4 sm:$0xff]  }
 0x5db   :  { %v8395_v32 = vld [vmem:[#allocation26 + $0x2a8] ss:$28 sps:$4 sm:$0xff]   ;;  %v8401_v9 = vld [vmem:[#allocation26 + $0x2e0] ss:$28 sps:$4 sm:$0xff]   ;;  %v8404_v36 = vld [vmem:[#allocation26 + $0x310] ss:$28 sps:$4 sm:$0xff]  }
 0x5dc   :  { %v8403_v34 = vld [vmem:[#allocation26 + $0x2e4] ss:$28 sps:$4 sm:$0xff]   ;;  %v8406_v47 = vld [vmem:[#allocation26 + $0x314] ss:$28 sps:$4 sm:$0xff]   ;;  %v8409_v11 = vld [vmem:[#allocation26 + $0x31c] ss:$28 sps:$4 sm:$0xff]  }
 0x5dd   :  { %6508 = vmatpush1.bf16.msra.mxu0 %v8356_v53  ;;  %6672 = vmatpush1.bf16.msra.mxu1 %v8359_v54  ;;  %v8407_v49 = vld [vmem:[#allocation26 + $0x318] ss:$28 sps:$4 sm:$0xff]   ;;  %v8412_v6 = vld [vmem:[#allocation26 + $0x34c] ss:$28 sps:$4 sm:$0xff]   ;;  %v9963_v43 = vsub.s32 6, %v9765_v7  ;;  %v9966_v23 = vsub.s32 5, %v9765_v7 }
 0x5de   :  { %6509 = vmatprep.subr.bf16.mxu0 %v8364_v1  ;;  %6673 = vmatprep.subr.bf16.mxu1 %v8367_v2  ;;  %v8415_v4 = vld [vmem:[#allocation26 + $0x354] ss:$28 sps:$4 sm:$0xff]   ;;  %v8410_v37 = vld [vmem:[#allocation26 + $0x348] ss:$28 sps:$4 sm:$0xff]  }
 0x5df   :  { %v8413_v38 = vld [vmem:[#allocation26 + $0x350] ss:$28 sps:$4 sm:$0xff]   ;;  %v1619_v53 = vrot.slane %v9901_v52, %v9963_v43  ;;  %v1615_v54 = vrot.slane %v9901_v52, %v9966_v23 }
 0x5e0   :  { %v8973_v40 = vpop.eup %8972 }
 0x5e1   :  { %v8975_v41 = vpop.eup %8974  ;;  %6510 = vmatpush1.bf16.msra.mxu0 %v8362_v5  ;;  %6674 = vmatpush1.bf16.msra.mxu1 %v8365_v13 }
 0x5e2   :  { %v8977_v42 = vpop.eup %8976  ;;  %6511 = vmatprep.subr.bf16.mxu0 %v8370_v17  ;;  %6675 = vmatprep.subr.bf16.mxu1 %v8373_v21 }
 0x5e3   :  { %v8979_v46 = vpop.eup %8978  ;;  %v3402_v51 = vcombine.low %v8973_v40, %v8977_v42  ;;  %v8418_v40 = vld [vmem:[#allocation26 + $0x384] ss:$28 sps:$4 sm:$0xff]   ;;  %v9960_v42 = vsub.s32 4, %v9765_v7 }
 0x5e4   :  { %v3403_v55 = vcombine.low %v8975_v41, %v8979_v46  ;;  %v8421_v41 = vld [vmem:[#allocation26 + $0x38c] ss:$28 sps:$4 sm:$0xff]   ;;  %v9969_v46 = vsub.s32 7, %v9765_v7 }
 0x5e5   :  { %v9952_v57 = vrot.slane %v3402_v51, %v9776_v59  ;;  %6512 = vmatpush1.bf16.msra.mxu0 %v8368_v18  ;;  %6676 = vmatpush1.bf16.msra.mxu1 %v8371_v19  ;;  %v1611_v51 = vrot.slane %v9901_v52, %v9960_v42 }
 0x5e6   :  { %v9955_v61 = vrot.slane %v3403_v55, %v9776_v59  ;;  %6513 = vmatprep.subr.bf16.mxu0 %v8376_v20  ;;  %6677 = vmatprep.subr.bf16.mxu1 %v8379_v24  ;;  %v1623_v55 = vrot.slane %v9901_v52, %v9969_v46 }
 0x5e8   :  { %v3434_v15 = vcombine.low %v9952_v57, %v9955_v61 }
 0x5e9   :  { %6514 = vmatpush1.bf16.msra.mxu0 %v8374_v16  ;;  %6678 = vmatpush1.bf16.msra.mxu1 %v8377_v14 }
 0x5ea   :  { %6515 = vmatprep.subr.bf16.mxu0 %v8382_v22  ;;  %6679 = vmatprep.subr.bf16.mxu1 %v8385_v25 }
 0x5ed   :  { %6516 = vmatpush1.bf16.msra.mxu0 %v8380_v26  ;;  %6680 = vmatpush1.bf16.msra.mxu1 %v8383_v62 }
 0x5ee   :  { %6517 = vmatprep.subr.bf16.mxu0 %v8388_v27  ;;  %6681 = vmatprep.subr.bf16.mxu1 %v8391_v60 }
 0x5f1   :  { %6518 = vmatpush1.bf16.msra.mxu0 %v8386_v39  ;;  %6682 = vmatpush1.bf16.msra.mxu1 %v8389_v28 }
 0x5f2   :  { %6519 = vmatprep.subr.bf16.mxu0 %v8394_v29  ;;  %6683 = vmatprep.subr.bf16.mxu1 %v8397_v30 }
 0x5f5   :  { %6520 = vmatpush1.bf16.msra.mxu0 %v8392_v31  ;;  %6684 = vmatpush1.bf16.msra.mxu1 %v8395_v32 }
 0x5f6   :  { %6521 = vmatprep.subr.bf16.mxu0 %v8400_v33  ;;  %6685 = vmatprep.subr.bf16.mxu1 %v8403_v34 }
 0x5f9   :  { %6522 = vmatpush1.bf16.msra.mxu0 %v8398_v35  ;;  %6686 = vmatpush1.bf16.msra.mxu1 %v8401_v9 }
 0x5fa   :  { %6523 = vmatprep.subr.bf16.mxu0 %v8406_v47  ;;  %6687 = vmatprep.subr.bf16.mxu1 %v8409_v11 }
 0x5fd   :  { %6524 = vmatpush1.bf16.msra.mxu0 %v8404_v36  ;;  %6688 = vmatpush1.bf16.msra.mxu1 %v8407_v49 }
 0x5fe   :  { %6525 = vmatprep.subr.bf16.mxu0 %v8412_v6  ;;  %6689 = vmatprep.subr.bf16.mxu1 %v8415_v4 }
 0x601   :  { %6526 = vmatpush1.bf16.msra.mxu0 %v8410_v37  ;;  %6690 = vmatpush1.bf16.msra.mxu1 %v8413_v38 }
 0x602   :  { %6536 = vmatprep.subr.bf16.mxu0 %v8418_v40  ;;  %6700 = vmatprep.subr.bf16.mxu1 %v8421_v41 }
 0x63f   :  { %v3151_v1 = vpop.f32.mrb[8].mxu0 }
 0x640   :  { %v9979_v2 = vadd.f32 %v3151_v1, %v1611_v51  ;;  %v3233_v5 = vpop.f32.mrb[16].mxu1  ;;  %v3153_v13 = vpop.f32.mrb[9].mxu0 }
 0x641   :  { %v9981_v17 = vadd.f32 %v3233_v5, %v1619_v53  ;;  %v9983_v7 = vadd.f32 %v3153_v13, %v1615_v54  ;;  %v3235_v21 = vpop.f32.mrb[17].mxu1  ;;  %v3155_v18 = vpop.f32.mrb[10].mxu0 }
 0x642   :  { %v3266_v19 = vrot.slane %v9979_v2, 4  ;;  %v3294_v20 = vmul.f32 %v9979_v2, %v9979_v2  ;;  %v9988_v24 = vadd.f32 %v3235_v21, %v1623_v55  ;;  %v3237_v16 = vpop.f32.mrb[18].mxu1  ;;  %v3156_v52 = vpop.f32.mrb[11].mxu0 }
 0x643   :  { %v3278_v14 = vrot.slane %v9981_v17, 4  ;;  %v3296_v22 = vmul.f32 %v9981_v17, %v9981_v17  ;;  %v3272_v25 = vrot.slane %v9983_v7, 4  ;;  %v3295_v26 = vmul.f32 %v9983_v7, %v9983_v7  ;;  %v3238_v62 = vpop.f32.mrb[19].mxu1 }
 0x644   :  { %v3267_v27 = vadd.f32 %v9979_v2, %v3266_v19  ;;  %v3322_v60 = vrot.slane %v3294_v20, 4  ;;  %v3284_v39 = vrot.slane %v9988_v24, 4  ;;  %v3297_v28 = vmul.f32 %v9988_v24, %v9988_v24 }
 0x645   :  { %v3279_v29 = vadd.f32 %v9981_v17, %v3278_v14  ;;  %v3334_v30 = vrot.slane %v3296_v22, 4  ;;  %v3273_v31 = vadd.f32 %v9983_v7, %v3272_v25  ;;  %v3328_v32 = vrot.slane %v3295_v26, 4 }
 0x646   :  { %v3268_v33 = vrot.slane %v3267_v27, 2  ;;  %v3323_v34 = vadd.f32 %v3322_v60, %v3294_v20  ;;  %v3285_v35 = vadd.f32 %v9988_v24, %v3284_v39  ;;  %v3340_v9 = vrot.slane %v3297_v28, 4 }
 0x647   :  { %v3280_v36 = vrot.slane %v3279_v29, 2  ;;  %v3335_v47 = vadd.f32 %v3334_v30, %v3296_v22  ;;  %v3274_v49 = vrot.slane %v3273_v31, 2  ;;  %v3329_v11 = vadd.f32 %v3328_v32, %v3295_v26 }
 0x648   :  { %v3269_v6 = vadd.f32 %v3268_v33, %v3267_v27  ;;  %v3324_v4 = vrot.slane %v3323_v34, 2  ;;  %v3286_v37 = vrot.slane %v3285_v35, 2  ;;  %v3341_v38 = vadd.f32 %v3340_v9, %v3297_v28 }
 0x649   :  { %v3281_v40 = vadd.f32 %v3280_v36, %v3279_v29  ;;  %v3336_v41 = vrot.slane %v3335_v47, 2  ;;  %v3275_v51 = vadd.f32 %v3274_v49, %v3273_v31  ;;  %v3330_v53 = vrot.slane %v3329_v11, 2 }
 0x64a   :  { %v3270_v54 = vrot.slane %v3269_v6, 1  ;;  %v3325_v55 = vadd.f32 %v3324_v4, %v3323_v34  ;;  %v3287_v1 = vadd.f32 %v3286_v37, %v3285_v35  ;;  %v3342_v5 = vrot.slane %v3341_v38, 2 }
 0x64b   :  { %v3282_v13 = vrot.slane %v3281_v40, 1  ;;  %v3337_v21 = vadd.f32 %v3336_v41, %v3335_v47  ;;  %v3276_v18 = vrot.slane %v3275_v51, 1  ;;  %v3331_v19 = vadd.f32 %v3330_v53, %v3329_v11 }
 0x64c   :  { %v3271_v20 = vadd.f32 %v3270_v54, %v3269_v6  ;;  %v3326_v16 = vrot.slane %v3325_v55, 1  ;;  %v3288_v52 = vrot.slane %v3287_v1, 1  ;;  %v3343_v14 = vadd.f32 %v3342_v5, %v3341_v38 }
 0x64d   :  { %v3283_v22 = vadd.f32 %v3282_v13, %v3281_v40  ;;  %v3338_v25 = vrot.slane %v3337_v21, 1  ;;  %v3277_v26 = vadd.f32 %v3276_v18, %v3275_v51  ;;  %v3332_v62 = vrot.slane %v3331_v19, 1 }
 0x64e   :  { %v3327_v27 = vadd.f32 %v3326_v16, %v3325_v55  ;;  %v3350_v60 = vmul.f32 0.125, %v3271_v20  ;;  %v3289_v39 = vadd.f32 %v3288_v52, %v3287_v1  ;;  %v3344_v28 = vrot.slane %v3343_v14, 1 }
 0x64f   :  { %v3339_v29 = vadd.f32 %v3338_v25, %v3337_v21  ;;  %v3352_v30 = vmul.f32 0.125, %v3283_v22  ;;  %v3333_v31 = vadd.f32 %v3332_v62, %v3331_v19  ;;  %v3351_v32 = vmul.f32 0.125, %v3277_v26  ;;  %v3240_v25 = vld [vmem:[#allocation23] sm:$0xff] }
 0x650   :  { %v3358_v33 = vmul.f32 0.125, %v3327_v27  ;;  %v3366_v34 = vmul.f32 %v3350_v60, %v3350_v60  ;;  %v3345_v35 = vadd.f32 %v3344_v28, %v3343_v14  ;;  %v3353_v9 = vmul.f32 0.125, %v3289_v39 }
 0x651   :  { %v3360_v36 = vmul.f32 0.125, %v3339_v29  ;;  %v3368_v47 = vmul.f32 %v3352_v30, %v3352_v30  ;;  %v3359_v49 = vmul.f32 0.125, %v3333_v31  ;;  %v3367_v11 = vmul.f32 %v3351_v32, %v3351_v32 }
 0x652   :  { %v3374_v6 = vsub.f32 %v3358_v33, %v3366_v34  ;;  %v3361_v4 = vmul.f32 0.125, %v3345_v35  ;;  %v3369_v37 = vmul.f32 %v3353_v9, %v3353_v9  ;;  %v3442_v14 = vrot.slane %v3434_v15, %v9776_v59 }
 0x653   :  { %v3376_v38 = vsub.f32 %v3360_v36, %v3368_v47  ;;  %v3375_v40 = vsub.f32 %v3359_v49, %v3367_v11 }
 0x654   :  { %v3382_v41 = vadd.f32 1e-05, %v3374_v6  ;;  %v3377_v51 = vsub.f32 %v3361_v4, %v3369_v37 }
 0x655   :  { %v3384_v53 = vadd.f32 1e-05, %v3376_v38  ;;  %v3383_v54 = vadd.f32 1e-05, %v3375_v40 }
 0x656   :  { %8980 = vrsqrt.f32 %v3382_v41  ;;  %v3385_v55 = vadd.f32 1e-05, %v3377_v51 }
 0x657   :  { %8982 = vrsqrt.f32 %v3384_v53 }
 0x658   :  { %8984 = vrsqrt.f32 %v3383_v54  ;;  %v3241_v54 = vld [vmem:[#allocation25] sm:$0xff] }
 0x659   :  { %8986 = vrsqrt.f32 %v3385_v55 }
 0x660   :  { %v8981_v1 = vpop.eup %8980 }
 0x661   :  { %v8983_v5 = vpop.eup %8982 }
 0x662   :  { %v8985_v13 = vpop.eup %8984 }
 0x663   :  { %v8987_v21 = vpop.eup %8986  ;;  %v3404_v18 = vcombine.low %v8981_v1, %v8985_v13 }
 0x664   :  { %v3405_v19 = vcombine.low %v8983_v5, %v8987_v21 }
 0x665   :  { %v3426_v20 = vrot.slane %v3404_v18, %v9776_v59 }
 0x666   :  { %v3433_v16 = vrot.slane %v3405_v19, %v9776_v59 }
 0x668   :  { %v3435_v52 = vcombine.low %v3426_v20, %v3433_v16 }
 0x66a   :  { %v3449_v22 = vrot.slane %v3435_v52, %v9776_v59 }
 0x66c   :  { %v3450_v26 = vcombine.low %v3442_v14, %v3449_v22 }
 0x66e   :  { %v3452_v62 = vmul.f32 %v3450_v26, %v3240_v25 }
 0x670   :  { %v3457_v27 = vrot.slane %v3452_v62, %v9768_v8  ;;  %v3461_v39 = vrot.slane %v3452_v62, %v9771_v10  ;;  %v3465_v28 = vrot.slane %v3452_v62, %v9833_v63  ;;  %v3469_v29 = vrot.slane %v3452_v62, %v9836_v0 }
 0x671   :  { %v3473_v31 = vrot.slane %v3452_v62, %v9960_v42  ;;  %v3477_v33 = vrot.slane %v3452_v62, %v9966_v23  ;;  %v3481_v57 = vrot.slane %v3452_v62, %v9963_v43  ;;  %v3485_v61 = vrot.slane %v3452_v62, %v9969_v46 }
 0x672   :  { %v3494_v15 = vmul.f32 %v3457_v27, %v9935_v56  ;;  %v3495_v34 = vmul.f32 %v3461_v39, %v9939_v3  ;;  %v3496_v35 = vmul.f32 %v3465_v28, %v9937_v58  ;;  %v3497_v36 = vmul.f32 %v3469_v29, %v9941_v12 }
 0x673   :  { %v3498_v47 = vmul.f32 %v3473_v31, %v3350_v60  ;;  %v3499_v49 = vmul.f32 %v3477_v33, %v3351_v32  ;;  %v3500_v11 = vmul.f32 %v3481_v57, %v3352_v30  ;;  %v3501_v6 = vmul.f32 %v3485_v61, %v3353_v9 }
 0x674   :  { %v3510_v4 = vcombine.low %v3494_v15, %v3495_v34  ;;  %v3511_v37 = vcombine.low %v3496_v35, %v3497_v36  ;;  %v3568_v38 = vmul.f32 %v9988_v24, %v3485_v61  ;;  %v3562_v40 = vmul.f32 %v9915_v48, %v3461_v39  ;;  %v8424_v15 = vld [vmem:[#allocation26 + $0x3bc] ss:$28 sps:$4 sm:$0xff]   ;;  %v8427_v34 = vld [vmem:[#allocation26 + $0x3c4] ss:$28 sps:$4 sm:$0xff]  }
 0x675   :  { %v3512_v41 = vcombine.low %v3498_v47, %v3499_v49  ;;  %v3513_v51 = vcombine.low %v3500_v11, %v3501_v6  ;;  %v3561_v56 = vmul.f32 %v9911_v44, %v3457_v27  ;;  %v3564_v3 = vmul.f32 %v9917_v50, %v3469_v29  ;;  %v8422_v36 = vld [vmem:[#allocation26 + $0x3b8] ss:$28 sps:$4 sm:$0xff]   ;;  %v8425_v47 = vld [vmem:[#allocation26 + $0x3c0] ss:$28 sps:$4 sm:$0xff]   ;;  %v8428_v6 = vld [vmem:[#allocation26 + $0x3f0] ss:$28 sps:$4 sm:$0xff]  }
 0x676   :  { %v3520_v58 = vrot.slane %v3510_v4, %v9776_v59  ;;  %v3527_v12 = vrot.slane %v3511_v37, %v9776_v59  ;;  %v3566_v60 = vmul.f32 %v9983_v7, %v3477_v33  ;;  %v3565_v24 = vmul.f32 %v9979_v2, %v3473_v31  ;;  %v8416_v33 = vld [vmem:[#allocation26 + $0x380] ss:$28 sps:$4 sm:$0xff]   ;;  %v8430_v49 = vld [vmem:[#allocation26 + $0x3f4] ss:$28 sps:$4 sm:$0xff]   ;;  %v8436_v37 = vld [vmem:[#allocation26 + $0x42c] ss:$28 sps:$4 sm:$0xff]  }
 0x677   :  { %v3534_v30 = vrot.slane %v3512_v41, %v9776_v59  ;;  %v3541_v32 = vrot.slane %v3513_v51, %v9776_v59  ;;  %v3567_v48 = vmul.f32 %v9981_v17, %v3481_v57  ;;  %v3563_v5 = vmul.f32 %v9913_v45, %v3465_v28  ;;  %v8419_v57 = vld [vmem:[#allocation26 + $0x388] ss:$28 sps:$4 sm:$0xff]   ;;  %v8433_v11 = vld [vmem:[#allocation26 + $0x3fc] ss:$28 sps:$4 sm:$0xff]   ;;  %v8437_v41 = vld [vmem:[#allocation26 + $0x430] ss:$28 sps:$4 sm:$0xff]  }
 0x678   :  { %v3542_v9 = vcombine.low %v3520_v58, %v3527_v12  ;;  %v8431_v4 = vld [vmem:[#allocation26 + $0x3f8] ss:$28 sps:$4 sm:$0xff]   ;;  %v8442_v51 = vld [vmem:[#allocation26 + $0x464] ss:$28 sps:$4 sm:$0xff]  }
 0x679   :  { %v3543_v53 = vcombine.low %v3534_v30, %v3541_v32  ;;  %v8443_v58 = vld [vmem:[#allocation26 + $0x468] ss:$28 sps:$4 sm:$0xff]   ;;  %v8448_v12 = vld [vmem:[#allocation26 + $0x49c] ss:$28 sps:$4 sm:$0xff]  }
 0x67a   :  { %v3550_v44 = vrot.slane %v3542_v9, %v9776_v59  ;;  %v8446_v30 = vld [vmem:[#allocation26 + $0x498] ss:$28 sps:$4 sm:$0xff]   ;;  %v8449_v32 = vld [vmem:[#allocation26 + $0x4a0] ss:$28 sps:$4 sm:$0xff]   ;;  %v8452_v9 = vld [vmem:[#allocation26 + $0x4d0] ss:$28 sps:$4 sm:$0xff]  }
 0x67b   :  { %v3557_v50 = vrot.slane %v3543_v53, %v9776_v59  ;;  %v8455_v53 = vld [vmem:[#allocation26 + $0x4d8] ss:$28 sps:$4 sm:$0xff]  }
 0x67d   :  { %v3558_v55 = vcombine.low %v3550_v44, %v3557_v50  ;;  %v8460_v44 = vld [vmem:[#allocation26 + $0x50c] ss:$28 sps:$4 sm:$0xff]   ;;  %v8463_v50 = vld [vmem:[#allocation26 + $0x514] ss:$28 sps:$4 sm:$0xff]  }
 0x67f   :  { %v3560_v1 = vsub.f32 %v3241_v54, %v3558_v55  ;;  %v8458_v54 = vld [vmem:[#allocation26 + $0x508] ss:$28 sps:$4 sm:$0xff]   ;;  %v8461_v55 = vld [vmem:[#allocation26 + $0x510] ss:$28 sps:$4 sm:$0xff]  }
 0x681   :  { %v3601_v7 = vrot.slane %v3560_v1, %v9969_v46  ;;  %v3577_v13 = vrot.slane %v3560_v1, %v9771_v10  ;;  %v3573_v21 = vrot.slane %v3560_v1, %v9768_v8  ;;  %v3585_v2 = vrot.slane %v3560_v1, %v9836_v0 }
 0x682   :  { %v3581_v17 = vrot.slane %v3560_v1, %v9833_v63  ;;  %v3593_v18 = vrot.slane %v3560_v1, %v9966_v23  ;;  %v3589_v19 = vrot.slane %v3560_v1, %v9960_v42  ;;  %v3597_v59 = vrot.slane %v3560_v1, %v9963_v43  ;;  %v8466_v1 = vld [vmem:[#allocation26 + $0x544] ss:$28 sps:$4 sm:$0xff]  }
 0x683   :  { %v3611_v20 = vadd.f32 %v3577_v13, %v3562_v40  ;;  %v3610_v16 = vadd.f32 %v3573_v21, %v3561_v56  ;;  %v3613_v52 = vadd.f32 %v3585_v2, %v3564_v3  ;;  %v10044_v45 = vadd.f32 %v3601_v7, %v3568_v38  ;;  %v8439_v38 = vld [vmem:[#allocation26 + $0x434] ss:$28 sps:$4 sm:$0xff]   ;;  %v8434_v40 = vld [vmem:[#allocation26 + $0x428] ss:$28 sps:$4 sm:$0xff]   ;;  %v8440_v3 = vld [vmem:[#allocation26 + $0x460] ss:$28 sps:$4 sm:$0xff]  }
 0x684   :  { %v10046_v46 = vadd.f32 %v3581_v17, %v3563_v5  ;;  %v10048_v14 = vadd.f32 %v3593_v18, %v3566_v60  ;;  %v10050_v22 = vadd.f32 %v3589_v19, %v3565_v24  ;;  %v10052_v25 = vadd.f32 %v3597_v59, %v3567_v48  ;;  %v8445_v56 = vld [vmem:[#allocation26 + $0x46c] ss:$28 sps:$4 sm:$0xff]   ;;  %v8451_v60 = vld [vmem:[#allocation26 + $0x4a4] ss:$28 sps:$4 sm:$0xff]   ;;  %v8454_v24 = vld [vmem:[#allocation26 + $0x4d4] ss:$28 sps:$4 sm:$0xff]  }
 0x685   :  { %v3619_v26 = vmul.f32 0.2, %v3611_v20  ;;  %v3618_v62 = vmul.f32 0.2, %v3610_v16  ;;  %v3621_v27 = vmul.f32 0.2, %v3613_v52 }
 0x686   :  { %v8457_v48 = vld [vmem:[#allocation26 + $0x4dc] ss:$28 sps:$4 sm:$0xff]   ;;  %v8469_v5 = vld [vmem:[#allocation26 + $0x54c] ss:$28 sps:$4 sm:$0xff]   ;;  %v8475_v2 = vld [vmem:[#allocation26 + $0x584] ss:$28 sps:$4 sm:$0xff]  }
 0x687   :  { %v3627_v39 = vmax.f32 %v3611_v20, %v3619_v26  ;;  %v3626_v28 = vmax.f32 %v3610_v16, %v3618_v62  ;;  %v3629_v29 = vmax.f32 %v3613_v52, %v3621_v27  ;;  %v8464_v7 = vld [vmem:[#allocation26 + $0x540] ss:$28 sps:$4 sm:$0xff]   ;;  %v8467_v13 = vld [vmem:[#allocation26 + $0x548] ss:$28 sps:$4 sm:$0xff]   ;;  %v8470_v17 = vld [vmem:[#allocation26 + $0x578] ss:$28 sps:$4 sm:$0xff]  }
 0x688   :  { %v8472_v21 = vld [vmem:[#allocation26 + $0x57c] ss:$28 sps:$4 sm:$0xff]   ;;  %v8478_v19 = vld [vmem:[#allocation26 + $0x5b4] ss:$28 sps:$4 sm:$0xff]   ;;  %v8484_v52 = vld [vmem:[#allocation26 + $0x5ec] ss:$28 sps:$4 sm:$0xff]  }
 0x689   :  { %v10054_v31 = vpack.c.bf16 %v3627_v39, %v3627_v39  ;;  %v10056_v61 = vpack.c.bf16 %v3626_v28, %v3626_v28  ;;  %v10062_v35 = vpack.c.bf16 %v3629_v29, %v3629_v29  ;;  %v8473_v18 = vld [vmem:[#allocation26 + $0x580] ss:$28 sps:$4 sm:$0xff]   ;;  %v8476_v20 = vld [vmem:[#allocation26 + $0x5b0] ss:$28 sps:$4 sm:$0xff]   ;;  %v8479_v16 = vld [vmem:[#allocation26 + $0x5b8] ss:$28 sps:$4 sm:$0xff]  }
 0x68a   :  { %v8481_v59 = vld [vmem:[#allocation26 + $0x5bc] ss:$28 sps:$4 sm:$0xff]   ;;  %v8487_v26 = vld [vmem:[#allocation26 + $0x5f4] ss:$28 sps:$4 sm:$0xff]   ;;  %v8482_v62 = vld [vmem:[#allocation26 + $0x5e8] ss:$28 sps:$4 sm:$0xff]  }
 0x68b   :  { %6527 = vmatprep.mubr.bf16.mxu0 %v10054_v31  ;;  %6691 = vmatprep.mubr.bf16.mxu1 %v10054_v31  ;;  %v8485_v27 = vld [vmem:[#allocation26 + $0x5f0] ss:$28 sps:$4 sm:$0xff]   ;;  %v8490_v39 = vld [vmem:[#allocation26 + $0x624] ss:$28 sps:$4 sm:$0xff]  }
 0x68c   :  { %6528 = vmatmul.mubr.bf16.vlgmr.msra.gmra.mrb[12].mxu0 %v10056_v61  ;;  %6692 = vmatmul.mubr.bf16.vlgmr.msra.gmra.mrb[20].mxu1 %v10056_v61  ;;  %v8493_v28 = vld [vmem:[#allocation26 + $0x62c] ss:$28 sps:$4 sm:$0xff]   ;;  %v8488_v29 = vld [vmem:[#allocation26 + $0x620] ss:$28 sps:$4 sm:$0xff]  }
 0x68d   :  { %6537 = vmatpush1.bf16.msra.mxu0 %v8416_v33  ;;  %6701 = vmatpush1.bf16.msra.mxu1 %v8419_v57  ;;  %v8491_v33 = vld [vmem:[#allocation26 + $0x628] ss:$28 sps:$4 sm:$0xff]   ;;  %v8496_v57 = vld [vmem:[#allocation26 + $0x65c] ss:$28 sps:$4 sm:$0xff]  }
 0x68e   :  { %6568 = vmatprep.mubr.bf16.mxu0 %v10062_v35  ;;  %6732 = vmatprep.mubr.bf16.mxu1 %v10062_v35 }
 0x68f   :  { %6538 = vmatprep.subr.bf16.mxu0 %v8424_v15  ;;  %6702 = vmatprep.subr.bf16.mxu1 %v8427_v34  ;;  %v8499_v15 = vld [vmem:[#allocation26 + $0x664] ss:$28 sps:$4 sm:$0xff]   ;;  %v8494_v34 = vld [vmem:[#allocation26 + $0x658] ss:$28 sps:$4 sm:$0xff]  }
 0x691   :  { %6539 = vmatpush1.bf16.msra.mxu0 %v8422_v36  ;;  %6703 = vmatpush1.bf16.msra.mxu1 %v8425_v47  ;;  %v8497_v36 = vld [vmem:[#allocation26 + $0x660] ss:$28 sps:$4 sm:$0xff]   ;;  %v8502_v47 = vld [vmem:[#allocation26 + $0x694] ss:$28 sps:$4 sm:$0xff]  }
 0x692   :  { %6540 = vmatprep.subr.bf16.mxu0 %v8430_v49  ;;  %6704 = vmatprep.subr.bf16.mxu1 %v8433_v11  ;;  %v8505_v49 = vld [vmem:[#allocation26 + $0x69c] ss:$28 sps:$4 sm:$0xff]   ;;  %v8500_v11 = vld [vmem:[#allocation26 + $0x690] ss:$28 sps:$4 sm:$0xff]  }
 0x695   :  { %6541 = vmatpush1.bf16.msra.mxu0 %v8428_v6  ;;  %6705 = vmatpush1.bf16.msra.mxu1 %v8431_v4  ;;  %v8503_v6 = vld [vmem:[#allocation26 + $0x698] ss:$28 sps:$4 sm:$0xff]   ;;  %v8508_v4 = vld [vmem:[#allocation26 + $0x6cc] ss:$28 sps:$4 sm:$0xff]  }
 0x696   :  { %6542 = vmatprep.subr.bf16.mxu0 %v8436_v37  ;;  %6706 = vmatprep.subr.bf16.mxu1 %v8439_v38  ;;  %v8511_v37 = vld [vmem:[#allocation26 + $0x6d4] ss:$28 sps:$4 sm:$0xff]   ;;  %v3620_v38 = vmul.f32 0.2, %v10046_v46 }
 0x699   :  { %6543 = vmatpush1.bf16.msra.mxu0 %v8434_v40  ;;  %6707 = vmatpush1.bf16.msra.mxu1 %v8437_v41  ;;  %v3623_v40 = vmul.f32 0.2, %v10048_v14  ;;  %v8506_v41 = vld [vmem:[#allocation26 + $0x6c8] ss:$28 sps:$4 sm:$0xff]  }
 0x69a   :  { %6544 = vmatprep.subr.bf16.mxu0 %v8442_v51  ;;  %6708 = vmatprep.subr.bf16.mxu1 %v8445_v56  ;;  %v8509_v51 = vld [vmem:[#allocation26 + $0x6d0] ss:$28 sps:$4 sm:$0xff]   ;;  %v3628_v56 = vmax.f32 %v10046_v46, %v3620_v38  ;;  %v8518_v46 = vld [vmem:[#allocation26 + $0x738] ss:$28 sps:$4 sm:$0xff]  }
 0x69b   :  { %v8575_v38 = vld [vmem:[#allocation26 + $0x938] ss:$28 sps:$4 sm:$0xff]  }
 0x69d   :  { %6545 = vmatpush1.bf16.msra.mxu0 %v8440_v3  ;;  %6709 = vmatpush1.bf16.msra.mxu1 %v8443_v58  ;;  %v8514_v3 = vld [vmem:[#allocation26 + $0x704] ss:$28 sps:$4 sm:$0xff]   ;;  %v8517_v58 = vld [vmem:[#allocation26 + $0x70c] ss:$28 sps:$4 sm:$0xff]  }
 0x69e   :  { %6546 = vmatprep.subr.bf16.mxu0 %v8448_v12  ;;  %6710 = vmatprep.subr.bf16.mxu1 %v8451_v60  ;;  %v3631_v12 = vmax.f32 %v10048_v14, %v3623_v40  ;;  %v8512_v60 = vld [vmem:[#allocation26 + $0x700] ss:$28 sps:$4 sm:$0xff]   ;;  %v8580_v40 = vld [vmem:[#allocation26 + $0x96c] ss:$28 sps:$4 sm:$0xff]  }
 0x69f   :  { %v8521_v14 = vld [vmem:[#allocation26 + $0x740] ss:$28 sps:$4 sm:$0xff]  }
 0x6a1   :  { %6547 = vmatpush1.bf16.msra.mxu0 %v8446_v30  ;;  %6711 = vmatpush1.bf16.msra.mxu1 %v8449_v32  ;;  %v10070_v30 = vpack.c.bf16 %v3628_v56, %v3628_v56  ;;  %v8515_v32 = vld [vmem:[#allocation26 + $0x708] ss:$28 sps:$4 sm:$0xff]   ;;  %v8581_v56 = vld [vmem:[#allocation26 + $0x970] ss:$28 sps:$4 sm:$0xff]  }
 0x6a2   :  { %6548 = vmatprep.subr.bf16.mxu0 %v8454_v24  ;;  %6712 = vmatprep.subr.bf16.mxu1 %v8457_v48  ;;  %v10072_v24 = vpack.c.bf16 %v3631_v12, %v3631_v12  ;;  %v8520_v48 = vld [vmem:[#allocation26 + $0x73c] ss:$28 sps:$4 sm:$0xff]  }
 0x6a3   :  { %v8584_v12 = vld [vmem:[#allocation26 + $0x9a0] ss:$28 sps:$4 sm:$0xff]  }
 0x6a5   :  { %6549 = vmatpush1.bf16.msra.mxu0 %v8452_v9  ;;  %6713 = vmatpush1.bf16.msra.mxu1 %v8455_v53  ;;  %v8523_v9 = vld [vmem:[#allocation26 + $0x744] ss:$28 sps:$4 sm:$0xff]   ;;  %v8526_v53 = vld [vmem:[#allocation26 + $0x774] ss:$28 sps:$4 sm:$0xff]  }
 0x6a6   :  { %6550 = vmatprep.subr.bf16.mxu0 %v8460_v44  ;;  %6714 = vmatprep.subr.bf16.mxu1 %v8463_v50  ;;  %v8529_v44 = vld [vmem:[#allocation26 + $0x77c] ss:$28 sps:$4 sm:$0xff]   ;;  %v8524_v50 = vld [vmem:[#allocation26 + $0x770] ss:$28 sps:$4 sm:$0xff]  }
 0x6a9   :  { %6551 = vmatpush1.bf16.msra.mxu0 %v8458_v54  ;;  %6715 = vmatpush1.bf16.msra.mxu1 %v8461_v55  ;;  %v8527_v54 = vld [vmem:[#allocation26 + $0x778] ss:$28 sps:$4 sm:$0xff]   ;;  %v8532_v55 = vld [vmem:[#allocation26 + $0x7ac] ss:$28 sps:$4 sm:$0xff]  }
 0x6aa   :  { %6552 = vmatprep.subr.bf16.mxu0 %v8466_v1  ;;  %6716 = vmatprep.subr.bf16.mxu1 %v8469_v5  ;;  %v8535_v1 = vld [vmem:[#allocation26 + $0x7b4] ss:$28 sps:$4 sm:$0xff]   ;;  %v8530_v5 = vld [vmem:[#allocation26 + $0x7a8] ss:$28 sps:$4 sm:$0xff]  }
 0x6ad   :  { %6553 = vmatpush1.bf16.msra.mxu0 %v8464_v7  ;;  %6717 = vmatpush1.bf16.msra.mxu1 %v8467_v13  ;;  %v8533_v7 = vld [vmem:[#allocation26 + $0x7b0] ss:$28 sps:$4 sm:$0xff]   ;;  %v8538_v13 = vld [vmem:[#allocation26 + $0x7e4] ss:$28 sps:$4 sm:$0xff]  }
 0x6ae   :  { %6554 = vmatprep.subr.bf16.mxu0 %v8472_v21  ;;  %6718 = vmatprep.subr.bf16.mxu1 %v8475_v2  ;;  %v8541_v21 = vld [vmem:[#allocation26 + $0x7ec] ss:$28 sps:$4 sm:$0xff]   ;;  %v8536_v2 = vld [vmem:[#allocation26 + $0x7e0] ss:$28 sps:$4 sm:$0xff]  }
 0x6b1   :  { %6555 = vmatpush1.bf16.msra.mxu0 %v8470_v17  ;;  %6719 = vmatpush1.bf16.msra.mxu1 %v8473_v18  ;;  %v8539_v17 = vld [vmem:[#allocation26 + $0x7e8] ss:$28 sps:$4 sm:$0xff]   ;;  %v8544_v18 = vld [vmem:[#allocation26 + $0x81c] ss:$28 sps:$4 sm:$0xff]  }
 0x6b2   :  { %6556 = vmatprep.subr.bf16.mxu0 %v8478_v19  ;;  %6720 = vmatprep.subr.bf16.mxu1 %v8481_v59  ;;  %v8547_v19 = vld [vmem:[#allocation26 + $0x824] ss:$28 sps:$4 sm:$0xff]   ;;  %v8542_v59 = vld [vmem:[#allocation26 + $0x818] ss:$28 sps:$4 sm:$0xff]  }
 0x6b5   :  { %6557 = vmatpush1.bf16.msra.mxu0 %v8476_v20  ;;  %6721 = vmatpush1.bf16.msra.mxu1 %v8479_v16  ;;  %v8545_v20 = vld [vmem:[#allocation26 + $0x820] ss:$28 sps:$4 sm:$0xff]   ;;  %v8550_v16 = vld [vmem:[#allocation26 + $0x854] ss:$28 sps:$4 sm:$0xff]  }
 0x6b6   :  { %6558 = vmatprep.subr.bf16.mxu0 %v8484_v52  ;;  %6722 = vmatprep.subr.bf16.mxu1 %v8487_v26  ;;  %v8553_v52 = vld [vmem:[#allocation26 + $0x85c] ss:$28 sps:$4 sm:$0xff]   ;;  %v8548_v26 = vld [vmem:[#allocation26 + $0x850] ss:$28 sps:$4 sm:$0xff]  }
 0x6b9   :  { %6559 = vmatpush1.bf16.msra.mxu0 %v8482_v62  ;;  %6723 = vmatpush1.bf16.msra.mxu1 %v8485_v27  ;;  %v8551_v62 = vld [vmem:[#allocation26 + $0x858] ss:$28 sps:$4 sm:$0xff]   ;;  %v8556_v27 = vld [vmem:[#allocation26 + $0x88c] ss:$28 sps:$4 sm:$0xff]  }
 0x6ba   :  { %6560 = vmatprep.subr.bf16.mxu0 %v8490_v39  ;;  %6724 = vmatprep.subr.bf16.mxu1 %v8493_v28  ;;  %v8559_v39 = vld [vmem:[#allocation26 + $0x894] ss:$28 sps:$4 sm:$0xff]   ;;  %v8554_v28 = vld [vmem:[#allocation26 + $0x888] ss:$28 sps:$4 sm:$0xff]  }
 0x6bd   :  { %6561 = vmatpush1.bf16.msra.mxu0 %v8488_v29  ;;  %6725 = vmatpush1.bf16.msra.mxu1 %v8491_v33  ;;  %v8557_v29 = vld [vmem:[#allocation26 + $0x890] ss:$28 sps:$4 sm:$0xff]   ;;  %v8562_v33 = vld [vmem:[#allocation26 + $0x8c4] ss:$28 sps:$4 sm:$0xff]  }
 0x6be   :  { %6562 = vmatprep.subr.bf16.mxu0 %v8496_v57  ;;  %6726 = vmatprep.subr.bf16.mxu1 %v8499_v15  ;;  %v8565_v57 = vld [vmem:[#allocation26 + $0x8cc] ss:$28 sps:$4 sm:$0xff]   ;;  %v8560_v15 = vld [vmem:[#allocation26 + $0x8c0] ss:$28 sps:$4 sm:$0xff]  }
 0x6c1   :  { %6563 = vmatpush1.bf16.msra.mxu0 %v8494_v34  ;;  %6727 = vmatpush1.bf16.msra.mxu1 %v8497_v36  ;;  %v8563_v34 = vld [vmem:[#allocation26 + $0x8c8] ss:$28 sps:$4 sm:$0xff]   ;;  %v8568_v36 = vld [vmem:[#allocation26 + $0x8fc] ss:$28 sps:$4 sm:$0xff]  }
 0x6c2   :  { %6564 = vmatprep.subr.bf16.mxu0 %v8502_v47  ;;  %6728 = vmatprep.subr.bf16.mxu1 %v8505_v49  ;;  %v8571_v47 = vld [vmem:[#allocation26 + $0x904] ss:$28 sps:$4 sm:$0xff]   ;;  %v8566_v49 = vld [vmem:[#allocation26 + $0x8f8] ss:$28 sps:$4 sm:$0xff]  }
 0x6c5   :  { %6565 = vmatpush1.bf16.msra.mxu0 %v8500_v11  ;;  %6729 = vmatpush1.bf16.msra.mxu1 %v8503_v6  ;;  %v8569_v11 = vld [vmem:[#allocation26 + $0x900] ss:$28 sps:$4 sm:$0xff]   ;;  %v8574_v6 = vld [vmem:[#allocation26 + $0x934] ss:$28 sps:$4 sm:$0xff]  }
 0x6c6   :  { %6566 = vmatprep.subr.bf16.mxu0 %v8508_v4  ;;  %6730 = vmatprep.subr.bf16.mxu1 %v8511_v37  ;;  %v8577_v4 = vld [vmem:[#allocation26 + $0x93c] ss:$28 sps:$4 sm:$0xff]   ;;  %v8572_v37 = vld [vmem:[#allocation26 + $0x930] ss:$28 sps:$4 sm:$0xff]  }
 0x6c9   :  { %6567 = vmatpush1.bf16.msra.mxu0 %v8506_v41  ;;  %6731 = vmatpush1.bf16.msra.mxu1 %v8509_v51  ;;  %v8583_v41 = vld [vmem:[#allocation26 + $0x974] ss:$28 sps:$4 sm:$0xff]   ;;  %v8578_v51 = vld [vmem:[#allocation26 + $0x968] ss:$28 sps:$4 sm:$0xff]  }
 0x6ca   :  { %6577 = vmatprep.subr.bf16.mxu0 %v8514_v3  ;;  %6741 = vmatprep.subr.bf16.mxu1 %v8517_v58  ;;  %v8586_v3 = vld [vmem:[#allocation26 + $0x9a4] ss:$28 sps:$4 sm:$0xff]   ;;  %v8589_v58 = vld [vmem:[#allocation26 + $0x9ac] ss:$28 sps:$4 sm:$0xff]  }
 0x6cc   :  { %6569 = vmatmul.mubr.bf16.vlgmr.msra.gmra.mrb[12].mxu0 %v10070_v30  ;;  %6733 = vmatmul.mubr.bf16.vlgmr.msra.gmra.mrb[20].mxu1 %v10070_v30 }
 0x6cd   :  { %6578 = vmatpush1.bf16.msra.mxu0 %v8512_v60  ;;  %6609 = vmatprep.mubr.bf16.mxu0 %v10072_v24  ;;  %v8587_v60 = vld [vmem:[#allocation26 + $0x9a8] ss:$28 sps:$4 sm:$0xff]  }
 0x6ce   :  { %6742 = vmatpush1.bf16.msra.mxu1 %v8515_v32  ;;  %6773 = vmatprep.mubr.bf16.mxu1 %v10072_v24  ;;  %v8592_v32 = vld [vmem:[#allocation26 + $0x9dc] ss:$28 sps:$4 sm:$0xff]  }
 0x6cf   :  { %6579 = vmatprep.subr.bf16.mxu0 %v8520_v48  ;;  %6743 = vmatprep.subr.bf16.mxu1 %v8523_v9  ;;  %v8595_v48 = vld [vmem:[#allocation26 + $0x9e4] ss:$28 sps:$4 sm:$0xff]   ;;  %v8590_v9 = vld [vmem:[#allocation26 + $0x9d8] ss:$28 sps:$4 sm:$0xff]  }
 0x6d1   :  { %6580 = vmatpush1.bf16.msra.mxu0 %v8518_v46  ;;  %v8593_v46 = vld [vmem:[#allocation26 + $0x9e0] ss:$28 sps:$4 sm:$0xff]  }
 0x6d2   :  { %6744 = vmatpush1.bf16.msra.mxu1 %v8521_v14  ;;  %6581 = vmatprep.subr.bf16.mxu0 %v8526_v53  ;;  %v8598_v14 = vld [vmem:[#allocation26 + $0xa14] ss:$28 sps:$4 sm:$0xff]   ;;  %v8601_v53 = vld [vmem:[#allocation26 + $0xa1c] ss:$28 sps:$4 sm:$0xff]  }
 0x6d3   :  { %6745 = vmatprep.subr.bf16.mxu1 %v8529_v44  ;;  %v8596_v44 = vld [vmem:[#allocation26 + $0xa10] ss:$28 sps:$4 sm:$0xff]  }
 0x6d5   :  { %6582 = vmatpush1.bf16.msra.mxu0 %v8524_v50  ;;  %v8599_v50 = vld [vmem:[#allocation26 + $0xa18] ss:$28 sps:$4 sm:$0xff]  }
 0x6d6   :  { %6746 = vmatpush1.bf16.msra.mxu1 %v8527_v54  ;;  %6583 = vmatprep.subr.bf16.mxu0 %v8532_v55  ;;  %v8604_v54 = vld [vmem:[#allocation26 + $0xa4c] ss:$28 sps:$4 sm:$0xff]   ;;  %v3622_v55 = vmul.f32 0.2, %v10050_v22 }
 0x6d7   :  { %6747 = vmatprep.subr.bf16.mxu1 %v8535_v1  ;;  %v8607_v1 = vld [vmem:[#allocation26 + $0xa54] ss:$28 sps:$4 sm:$0xff]  }
 0x6d9   :  { %6584 = vmatpush1.bf16.msra.mxu0 %v8530_v5  ;;  %v3625_v5 = vmul.f32 0.2, %v10044_v45 }
 0x6da   :  { %6748 = vmatpush1.bf16.msra.mxu1 %v8533_v7  ;;  %6585 = vmatprep.subr.bf16.mxu0 %v8538_v13  ;;  %v8602_v7 = vld [vmem:[#allocation26 + $0xa48] ss:$28 sps:$4 sm:$0xff]   ;;  %v8605_v13 = vld [vmem:[#allocation26 + $0xa50] ss:$28 sps:$4 sm:$0xff]  }
 0x6db   :  { %6749 = vmatprep.subr.bf16.mxu1 %v8541_v21  ;;  %v3630_v21 = vmax.f32 %v10050_v22, %v3622_v55  ;;  %v8614_v22 = vld [vmem:[#allocation26 + $0xab8] ss:$28 sps:$4 sm:$0xff]   ;;  %v8668_v55 = vld [vmem:[#allocation26 + $0xcb0] ss:$28 sps:$4 sm:$0xff]  }
 0x6dd   :  { %6586 = vmatpush1.bf16.msra.mxu0 %v8536_v2  ;;  %v8610_v2 = vld [vmem:[#allocation26 + $0xa84] ss:$28 sps:$4 sm:$0xff]  }
 0x6de   :  { %6750 = vmatpush1.bf16.msra.mxu1 %v8539_v17  ;;  %6587 = vmatprep.subr.bf16.mxu0 %v8544_v18  ;;  %v8613_v17 = vld [vmem:[#allocation26 + $0xa8c] ss:$28 sps:$4 sm:$0xff]   ;;  %v3633_v18 = vmax.f32 %v10044_v45, %v3625_v5  ;;  %v8617_v45 = vld [vmem:[#allocation26 + $0xac0] ss:$28 sps:$4 sm:$0xff]  }
 0x6df   :  { %6751 = vmatprep.subr.bf16.mxu1 %v8547_v19  ;;  %v8608_v19 = vld [vmem:[#allocation26 + $0xa80] ss:$28 sps:$4 sm:$0xff]   ;;  %v8676_v5 = vld [vmem:[#allocation26 + $0xcec] ss:$28 sps:$4 sm:$0xff]  }
 0x6e1   :  { %6588 = vmatpush1.bf16.msra.mxu0 %v8542_v59  ;;  %v10082_v59 = vpack.c.bf16 %v3630_v21, %v3630_v21  ;;  %v8677_v21 = vld [vmem:[#allocation26 + $0xcf0] ss:$28 sps:$4 sm:$0xff]  }
 0x6e2   :  { %6752 = vmatpush1.bf16.msra.mxu1 %v8545_v20  ;;  %6589 = vmatprep.subr.bf16.mxu0 %v8550_v16  ;;  %v8611_v20 = vld [vmem:[#allocation26 + $0xa88] ss:$28 sps:$4 sm:$0xff]   ;;  %v8616_v16 = vld [vmem:[#allocation26 + $0xabc] ss:$28 sps:$4 sm:$0xff]  }
 0x6e3   :  { %6753 = vmatprep.subr.bf16.mxu1 %v8553_v52  ;;  %v10085_v52 = vpack.c.bf16 %v3633_v18, %v3633_v18  ;;  %v8680_v18 = vld [vmem:[#allocation26 + $0xd20] ss:$28 sps:$4 sm:$0xff]  }
 0x6e5   :  { %6590 = vmatpush1.bf16.msra.mxu0 %v8548_v26  ;;  %v8619_v26 = vld [vmem:[#allocation26 + $0xac4] ss:$28 sps:$4 sm:$0xff]  }
 0x6e6   :  { %6754 = vmatpush1.bf16.msra.mxu1 %v8551_v62  ;;  %6591 = vmatprep.subr.bf16.mxu0 %v8556_v27  ;;  %v8622_v62 = vld [vmem:[#allocation26 + $0xaf4] ss:$28 sps:$4 sm:$0xff]   ;;  %v8625_v27 = vld [vmem:[#allocation26 + $0xafc] ss:$28 sps:$4 sm:$0xff]  }
 0x6e7   :  { %6755 = vmatprep.subr.bf16.mxu1 %v8559_v39  ;;  %v8620_v39 = vld [vmem:[#allocation26 + $0xaf0] ss:$28 sps:$4 sm:$0xff]  }
 0x6e9   :  { %6592 = vmatpush1.bf16.msra.mxu0 %v8554_v28  ;;  %v8623_v28 = vld [vmem:[#allocation26 + $0xaf8] ss:$28 sps:$4 sm:$0xff]  }
 0x6ea   :  { %6756 = vmatpush1.bf16.msra.mxu1 %v8557_v29  ;;  %6593 = vmatprep.subr.bf16.mxu0 %v8562_v33  ;;  %v8628_v29 = vld [vmem:[#allocation26 + $0xb2c] ss:$28 sps:$4 sm:$0xff]   ;;  %v8631_v33 = vld [vmem:[#allocation26 + $0xb34] ss:$28 sps:$4 sm:$0xff]  }
 0x6eb   :  { %6757 = vmatprep.subr.bf16.mxu1 %v8565_v57  ;;  %v8626_v57 = vld [vmem:[#allocation26 + $0xb28] ss:$28 sps:$4 sm:$0xff]  }
 0x6ed   :  { %6594 = vmatpush1.bf16.msra.mxu0 %v8560_v15  ;;  %v8629_v15 = vld [vmem:[#allocation26 + $0xb30] ss:$28 sps:$4 sm:$0xff]  }
 0x6ee   :  { %6758 = vmatpush1.bf16.msra.mxu1 %v8563_v34  ;;  %6595 = vmatprep.subr.bf16.mxu0 %v8568_v36  ;;  %v8634_v34 = vld [vmem:[#allocation26 + $0xb64] ss:$28 sps:$4 sm:$0xff]   ;;  %v8637_v36 = vld [vmem:[#allocation26 + $0xb6c] ss:$28 sps:$4 sm:$0xff]  }
 0x6ef   :  { %6759 = vmatprep.subr.bf16.mxu1 %v8571_v47  ;;  %v8632_v47 = vld [vmem:[#allocation26 + $0xb60] ss:$28 sps:$4 sm:$0xff]  }
 0x6f1   :  { %6596 = vmatpush1.bf16.msra.mxu0 %v8566_v49  ;;  %v8635_v49 = vld [vmem:[#allocation26 + $0xb68] ss:$28 sps:$4 sm:$0xff]  }
 0x6f2   :  { %6760 = vmatpush1.bf16.msra.mxu1 %v8569_v11  ;;  %6597 = vmatprep.subr.bf16.mxu0 %v8574_v6  ;;  %v8640_v11 = vld [vmem:[#allocation26 + $0xb9c] ss:$28 sps:$4 sm:$0xff]   ;;  %v8643_v6 = vld [vmem:[#allocation26 + $0xba4] ss:$28 sps:$4 sm:$0xff]  }
 0x6f3   :  { %6761 = vmatprep.subr.bf16.mxu1 %v8577_v4  ;;  %v8638_v4 = vld [vmem:[#allocation26 + $0xb98] ss:$28 sps:$4 sm:$0xff]  }
 0x6f5   :  { %6598 = vmatpush1.bf16.msra.mxu0 %v8572_v37  ;;  %v8641_v37 = vld [vmem:[#allocation26 + $0xba0] ss:$28 sps:$4 sm:$0xff]  }
 0x6f6   :  { %6762 = vmatpush1.bf16.msra.mxu1 %v8575_v38  ;;  %6599 = vmatprep.subr.bf16.mxu0 %v8580_v40  ;;  %v8646_v38 = vld [vmem:[#allocation26 + $0xbd4] ss:$28 sps:$4 sm:$0xff]   ;;  %v8649_v40 = vld [vmem:[#allocation26 + $0xbdc] ss:$28 sps:$4 sm:$0xff]  }
 0x6f7   :  { %6763 = vmatprep.subr.bf16.mxu1 %v8583_v41  ;;  %v8644_v41 = vld [vmem:[#allocation26 + $0xbd0] ss:$28 sps:$4 sm:$0xff]  }
 0x6f9   :  { %6600 = vmatpush1.bf16.msra.mxu0 %v8578_v51  ;;  %v8647_v51 = vld [vmem:[#allocation26 + $0xbd8] ss:$28 sps:$4 sm:$0xff]  }
 0x6fa   :  { %6764 = vmatpush1.bf16.msra.mxu1 %v8581_v56  ;;  %6601 = vmatprep.subr.bf16.mxu0 %v8586_v3  ;;  %v8652_v56 = vld [vmem:[#allocation26 + $0xc0c] ss:$28 sps:$4 sm:$0xff]   ;;  %v8655_v3 = vld [vmem:[#allocation26 + $0xc14] ss:$28 sps:$4 sm:$0xff]  }
 0x6fb   :  { %6765 = vmatprep.subr.bf16.mxu1 %v8589_v58  ;;  %v8650_v58 = vld [vmem:[#allocation26 + $0xc08] ss:$28 sps:$4 sm:$0xff]  }
 0x6fd   :  { %6602 = vmatpush1.bf16.msra.mxu0 %v8584_v12  ;;  %v8653_v12 = vld [vmem:[#allocation26 + $0xc10] ss:$28 sps:$4 sm:$0xff]  }
 0x6fe   :  { %6766 = vmatpush1.bf16.msra.mxu1 %v8587_v60  ;;  %6603 = vmatprep.subr.bf16.mxu0 %v8592_v32  ;;  %v8658_v60 = vld [vmem:[#allocation26 + $0xc44] ss:$28 sps:$4 sm:$0xff]   ;;  %v8661_v32 = vld [vmem:[#allocation26 + $0xc4c] ss:$28 sps:$4 sm:$0xff]  }
 0x6ff   :  { %6767 = vmatprep.subr.bf16.mxu1 %v8595_v48  ;;  %v8656_v48 = vld [vmem:[#allocation26 + $0xc40] ss:$28 sps:$4 sm:$0xff]  }
 0x701   :  { %6604 = vmatpush1.bf16.msra.mxu0 %v8590_v9  ;;  %v8659_v9 = vld [vmem:[#allocation26 + $0xc48] ss:$28 sps:$4 sm:$0xff]  }
 0x702   :  { %6768 = vmatpush1.bf16.msra.mxu1 %v8593_v46  ;;  %6605 = vmatprep.subr.bf16.mxu0 %v8598_v14  ;;  %v8664_v46 = vld [vmem:[#allocation26 + $0xc7c] ss:$28 sps:$4 sm:$0xff]   ;;  %v8667_v14 = vld [vmem:[#allocation26 + $0xc84] ss:$28 sps:$4 sm:$0xff]  }
 0x703   :  { %6769 = vmatprep.subr.bf16.mxu1 %v8601_v53  ;;  %v8662_v53 = vld [vmem:[#allocation26 + $0xc78] ss:$28 sps:$4 sm:$0xff]  }
 0x705   :  { %6606 = vmatpush1.bf16.msra.mxu0 %v8596_v44  ;;  %v8665_v44 = vld [vmem:[#allocation26 + $0xc80] ss:$28 sps:$4 sm:$0xff]  }
 0x706   :  { %6770 = vmatpush1.bf16.msra.mxu1 %v8599_v50  ;;  %6607 = vmatprep.subr.bf16.mxu0 %v8604_v54  ;;  %v8670_v50 = vld [vmem:[#allocation26 + $0xcb4] ss:$28 sps:$4 sm:$0xff]   ;;  %v8673_v54 = vld [vmem:[#allocation26 + $0xcbc] ss:$28 sps:$4 sm:$0xff]  }
 0x707   :  { %6771 = vmatprep.subr.bf16.mxu1 %v8607_v1  ;;  %v8671_v1 = vld [vmem:[#allocation26 + $0xcb8] ss:$28 sps:$4 sm:$0xff]  }
 0x709   :  { %6608 = vmatpush1.bf16.msra.mxu0 %v8602_v7  ;;  %v8679_v7 = vld [vmem:[#allocation26 + $0xcf4] ss:$28 sps:$4 sm:$0xff]  }
 0x70a   :  { %6772 = vmatpush1.bf16.msra.mxu1 %v8605_v13  ;;  %6618 = vmatprep.subr.bf16.mxu0 %v8610_v2  ;;  %v8674_v13 = vld [vmem:[#allocation26 + $0xce8] ss:$28 sps:$4 sm:$0xff]  }
 0x70b   :  { %6782 = vmatprep.subr.bf16.mxu1 %v8613_v17  ;;  %v8682_v2 = vld [vmem:[#allocation26 + $0xd24] ss:$28 sps:$4 sm:$0xff]   ;;  %v8685_v17 = vld [vmem:[#allocation26 + $0xd2c] ss:$28 sps:$4 sm:$0xff]  }
 0x70c   :  { %6610 = vmatmul.mubr.bf16.vlgmr.msra.gmra.mrb[12].mxu0 %v10082_v59 }
 0x70d   :  { %6774 = vmatmul.mubr.bf16.vlgmr.msra.gmra.mrb[20].mxu1 %v10082_v59  ;;  %6619 = vmatpush1.bf16.msra.mxu0 %v8608_v19  ;;  %v8683_v19 = vld [vmem:[#allocation26 + $0xd28] ss:$28 sps:$4 sm:$0xff]  }
 0x70e   :  { %6650 = vmatprep.mubr.bf16.mxu0 %v10085_v52  ;;  %6783 = vmatpush1.bf16.msra.mxu1 %v8611_v20  ;;  %v8688_v20 = vld [vmem:[#allocation26 + $0xd5c] ss:$28 sps:$4 sm:$0xff]  }
 0x70f   :  { %6814 = vmatprep.mubr.bf16.mxu1 %v10085_v52  ;;  %6620 = vmatprep.subr.bf16.mxu0 %v8616_v16  ;;  %v8691_v16 = vld [vmem:[#allocation26 + $0xd64] ss:$28 sps:$4 sm:$0xff]  }
 0x710   :  { %6784 = vmatprep.subr.bf16.mxu1 %v8619_v26  ;;  %v8686_v26 = vld [vmem:[#allocation26 + $0xd58] ss:$28 sps:$4 sm:$0xff]  }
 0x711   :  { %6621 = vmatpush1.bf16.msra.mxu0 %v8614_v22  ;;  %v8689_v22 = vld [vmem:[#allocation26 + $0xd60] ss:$28 sps:$4 sm:$0xff]  }
 0x712   :  { %6785 = vmatpush1.bf16.msra.mxu1 %v8617_v45  ;;  %6622 = vmatprep.subr.bf16.mxu0 %v8622_v62  ;;  %v8694_v45 = vld [vmem:[#allocation26 + $0xd94] ss:$28 sps:$4 sm:$0xff]   ;;  %v8697_v62 = vld [vmem:[#allocation26 + $0xd9c] ss:$28 sps:$4 sm:$0xff]  }
 0x713   :  { %6786 = vmatprep.subr.bf16.mxu1 %v8625_v27  ;;  %v8692_v27 = vld [vmem:[#allocation26 + $0xd90] ss:$28 sps:$4 sm:$0xff]  }
 0x715   :  { %6623 = vmatpush1.bf16.msra.mxu0 %v8620_v39  ;;  %v8695_v39 = vld [vmem:[#allocation26 + $0xd98] ss:$28 sps:$4 sm:$0xff]  }
 0x716   :  { %6787 = vmatpush1.bf16.msra.mxu1 %v8623_v28  ;;  %6624 = vmatprep.subr.bf16.mxu0 %v8628_v29  ;;  %v8700_v28 = vld [vmem:[#allocation26 + $0xdcc] ss:$28 sps:$4 sm:$0xff]   ;;  %v3624_v29 = vmul.f32 0.2, %v10052_v25 }
 0x717   :  { %6788 = vmatprep.subr.bf16.mxu1 %v8631_v33  ;;  %v8703_v33 = vld [vmem:[#allocation26 + $0xdd4] ss:$28 sps:$4 sm:$0xff]  }
 0x719   :  { %6625 = vmatpush1.bf16.msra.mxu0 %v8626_v57  ;;  %v8698_v57 = vld [vmem:[#allocation26 + $0xdc8] ss:$28 sps:$4 sm:$0xff]  }
 0x71a   :  { %6789 = vmatpush1.bf16.msra.mxu1 %v8629_v15  ;;  %6626 = vmatprep.subr.bf16.mxu0 %v8634_v34  ;;  %v8701_v15 = vld [vmem:[#allocation26 + $0xdd0] ss:$28 sps:$4 sm:$0xff]   ;;  %v3632_v34 = vmax.f32 %v10052_v25, %v3624_v29  ;;  %v8762_v29 = vld [vmem:[#allocation26 + $0x600] ss:$28 sps:$4 sm:$0xff]  }
 0x71b   :  { %6790 = vmatprep.subr.bf16.mxu1 %v8637_v36  ;;  %v8706_v36 = vld [vmem:[#allocation26 + $0x14] ss:$28 sps:$4 sm:$0xff]  }
 0x71c   :  { %v8713_v25 = vld [vmem:[#allocation26 + $0x50] ss:$28 sps:$4 sm:$0xff]  }
 0x71d   :  { %6627 = vmatpush1.bf16.msra.mxu0 %v8632_v47  ;;  %v8707_v47 = vld [vmem:[#allocation26 + $0x1d8] ss:$28 sps:$4 sm:$0xff]  }
 0x71e   :  { %6791 = vmatpush1.bf16.msra.mxu1 %v8635_v49  ;;  %6628 = vmatprep.subr.bf16.mxu0 %v8640_v11  ;;  %v8704_v49 = vld [vmem:[#allocation26 + $0x10] ss:$28 sps:$4 sm:$0xff]   ;;  %v10092_v11 = vpack.c.bf16 %v3632_v34, %v3632_v34  ;;  %v8767_v34 = vld [vmem:[#allocation26 + $0x638] ss:$28 sps:$4 sm:$0xff]  }
 0x71f   :  { %6792 = vmatprep.subr.bf16.mxu1 %v8643_v6  ;;  %v8708_v6 = vld [vmem:[#allocation26 + $0x18] ss:$28 sps:$4 sm:$0xff]  }
 0x721   :  { %6629 = vmatpush1.bf16.msra.mxu0 %v8638_v4  ;;  %v8711_v4 = vld [vmem:[#allocation26 + $0x4c] ss:$28 sps:$4 sm:$0xff]  }
 0x722   :  { %6793 = vmatpush1.bf16.msra.mxu1 %v8641_v37  ;;  %6630 = vmatprep.subr.bf16.mxu0 %v8646_v38  ;;  %v8712_v37 = vld [vmem:[#allocation26 + $0x210] ss:$28 sps:$4 sm:$0xff]   ;;  %v8709_v38 = vld [vmem:[#allocation26 + $0x48] ss:$28 sps:$4 sm:$0xff]  }
 0x723   :  { %6794 = vmatprep.subr.bf16.mxu1 %v8649_v40  ;;  %v8716_v40 = vld [vmem:[#allocation26 + $0x84] ss:$28 sps:$4 sm:$0xff]  }
 0x725   :  { %6631 = vmatpush1.bf16.msra.mxu0 %v8644_v41  ;;  %v8717_v41 = vld [vmem:[#allocation26 + $0x248] ss:$28 sps:$4 sm:$0xff]  }
 0x726   :  { %6795 = vmatpush1.bf16.msra.mxu1 %v8647_v51  ;;  %6632 = vmatprep.subr.bf16.mxu0 %v8652_v56  ;;  %v8714_v51 = vld [vmem:[#allocation26 + $0x80] ss:$28 sps:$4 sm:$0xff]   ;;  %v8718_v56 = vld [vmem:[#allocation26 + $0x88] ss:$28 sps:$4 sm:$0xff]  }
 0x727   :  { %6796 = vmatprep.subr.bf16.mxu1 %v8655_v3  ;;  %v8721_v3 = vld [vmem:[#allocation26 + $0xbc] ss:$28 sps:$4 sm:$0xff]  }
 0x729   :  { %6633 = vmatpush1.bf16.msra.mxu0 %v8650_v58  ;;  %v8722_v58 = vld [vmem:[#allocation26 + $0x280] ss:$28 sps:$4 sm:$0xff]  }
 0x72a   :  { %6797 = vmatpush1.bf16.msra.mxu1 %v8653_v12  ;;  %6634 = vmatprep.subr.bf16.mxu0 %v8658_v60  ;;  %v8719_v12 = vld [vmem:[#allocation26 + $0xb8] ss:$28 sps:$4 sm:$0xff]   ;;  %v8723_v60 = vld [vmem:[#allocation26 + $0xc0] ss:$28 sps:$4 sm:$0xff]  }
 0x72b   :  { %6798 = vmatprep.subr.bf16.mxu1 %v8661_v32  ;;  %v8726_v32 = vld [vmem:[#allocation26 + $0xf4] ss:$28 sps:$4 sm:$0xff]  }
 0x72d   :  { %6635 = vmatpush1.bf16.msra.mxu0 %v8656_v48  ;;  %v8727_v48 = vld [vmem:[#allocation26 + $0x2b8] ss:$28 sps:$4 sm:$0xff]  }
 0x72e   :  { %6799 = vmatpush1.bf16.msra.mxu1 %v8659_v9  ;;  %6636 = vmatprep.subr.bf16.mxu0 %v8664_v46  ;;  %v8728_v9 = vld [vmem:[#allocation26 + $0xf8] ss:$28 sps:$4 sm:$0xff]   ;;  %v8731_v46 = vld [vmem:[#allocation26 + $0x12c] ss:$28 sps:$4 sm:$0xff]  }
 0x72f   :  { %6800 = vmatprep.subr.bf16.mxu1 %v8667_v14  ;;  %v8732_v14 = vld [vmem:[#allocation26 + $0x2f0] ss:$28 sps:$4 sm:$0xff]  }
 0x731   :  { %6637 = vmatpush1.bf16.msra.mxu0 %v8662_v53  ;;  %v8729_v53 = vld [vmem:[#allocation26 + $0x128] ss:$28 sps:$4 sm:$0xff]  }
 0x732   :  { %6801 = vmatpush1.bf16.msra.mxu1 %v8665_v44  ;;  %6638 = vmatprep.subr.bf16.mxu0 %v8670_v50  ;;  %v8733_v44 = vld [vmem:[#allocation26 + $0x130] ss:$28 sps:$4 sm:$0xff]   ;;  %v8736_v50 = vld [vmem:[#allocation26 + $0x164] ss:$28 sps:$4 sm:$0xff]  }
 0x733   :  { %6802 = vmatprep.subr.bf16.mxu1 %v8673_v54  ;;  %v8737_v54 = vld [vmem:[#allocation26 + $0x328] ss:$28 sps:$4 sm:$0xff]  }
 0x735   :  { %6639 = vmatpush1.bf16.msra.mxu0 %v8668_v55  ;;  %v8734_v55 = vld [vmem:[#allocation26 + $0x160] ss:$28 sps:$4 sm:$0xff]  }
 0x736   :  { %6803 = vmatpush1.bf16.msra.mxu1 %v8671_v1  ;;  %6640 = vmatprep.subr.bf16.mxu0 %v8676_v5  ;;  %v8738_v1 = vld [vmem:[#allocation26 + $0x168] ss:$28 sps:$4 sm:$0xff]   ;;  %v8741_v5 = vld [vmem:[#allocation26 + $0x19c] ss:$28 sps:$4 sm:$0xff]  }
 0x737   :  { %6804 = vmatprep.subr.bf16.mxu1 %v8679_v7  ;;  %v8742_v7 = vld [vmem:[#allocation26 + $0x360] ss:$28 sps:$4 sm:$0xff]  }
 0x739   :  { %6641 = vmatpush1.bf16.msra.mxu0 %v8674_v13  ;;  %v8739_v13 = vld [vmem:[#allocation26 + $0x198] ss:$28 sps:$4 sm:$0xff]  }
 0x73a   :  { %6805 = vmatpush1.bf16.msra.mxu1 %v8677_v21  ;;  %6642 = vmatprep.subr.bf16.mxu0 %v8682_v2  ;;  %v8743_v21 = vld [vmem:[#allocation26 + $0x1a0] ss:$28 sps:$4 sm:$0xff]   ;;  %v8746_v2 = vld [vmem:[#allocation26 + $0x1d4] ss:$28 sps:$4 sm:$0xff]  }
 0x73b   :  { %6806 = vmatprep.subr.bf16.mxu1 %v8685_v17  ;;  %v8747_v17 = vld [vmem:[#allocation26 + $0x558] ss:$28 sps:$4 sm:$0xff]  }
 0x73d   :  { %6643 = vmatpush1.bf16.msra.mxu0 %v8680_v18  ;;  %v8744_v18 = vld [vmem:[#allocation26 + $0x1d0] ss:$28 sps:$4 sm:$0xff]  }
 0x73e   :  { %6807 = vmatpush1.bf16.msra.mxu1 %v8683_v19  ;;  %6644 = vmatprep.subr.bf16.mxu0 %v8688_v20  ;;  %v8748_v19 = vld [vmem:[#allocation26 + $0x398] ss:$28 sps:$4 sm:$0xff]   ;;  %v8751_v20 = vld [vmem:[#allocation26 + $0x20c] ss:$28 sps:$4 sm:$0xff]  }
 0x73f   :  { %6808 = vmatprep.subr.bf16.mxu1 %v8691_v16  ;;  %v8752_v16 = vld [vmem:[#allocation26 + $0x590] ss:$28 sps:$4 sm:$0xff]  }
 0x741   :  { %6645 = vmatpush1.bf16.msra.mxu0 %v8686_v26  ;;  %v8749_v26 = vld [vmem:[#allocation26 + $0x208] ss:$28 sps:$4 sm:$0xff]  }
 0x742   :  { %6809 = vmatpush1.bf16.msra.mxu1 %v8689_v22  ;;  %6646 = vmatprep.subr.bf16.mxu0 %v8694_v45  ;;  %v8753_v22 = vld [vmem:[#allocation26 + $0x3d0] ss:$28 sps:$4 sm:$0xff]   ;;  %v8756_v45 = vld [vmem:[#allocation26 + $0x244] ss:$28 sps:$4 sm:$0xff]  }
 0x743   :  { %6810 = vmatprep.subr.bf16.mxu1 %v8697_v62  ;;  %v8757_v62 = vld [vmem:[#allocation26 + $0x5c8] ss:$28 sps:$4 sm:$0xff]  }
 0x745   :  { %6647 = vmatpush1.bf16.msra.mxu0 %v8692_v27  ;;  %v8754_v27 = vld [vmem:[#allocation26 + $0x240] ss:$28 sps:$4 sm:$0xff]  }
 0x746   :  { %6811 = vmatpush1.bf16.msra.mxu1 %v8695_v39  ;;  %6648 = vmatprep.subr.bf16.mxu0 %v8700_v28  ;;  %v8758_v39 = vld [vmem:[#allocation26 + $0x408] ss:$28 sps:$4 sm:$0xff]   ;;  %v8761_v28 = vld [vmem:[#allocation26 + $0x27c] ss:$28 sps:$4 sm:$0xff]  }
 0x747   :  { %6812 = vmatprep.subr.bf16.mxu1 %v8703_v33  ;;  %v8759_v33 = vld [vmem:[#allocation26 + $0x278] ss:$28 sps:$4 sm:$0xff]  }
 0x749   :  { %6649 = vmatpush1.bf16.msra.mxu0 %v8698_v57  ;;  %v8763_v57 = vld [vmem:[#allocation26 + $0x440] ss:$28 sps:$4 sm:$0xff]  }
 0x74a   :  { %6813 = vmatpush1.bf16.msra.mxu1 %v8701_v15  ;;  %6823 = vmatprep.subr.bf16.mxu0 %v8706_v36  ;;  %v8766_v15 = vld [vmem:[#allocation26 + $0x2b4] ss:$28 sps:$4 sm:$0xff]  }
 0x74b   :  { %7986 = vmatprep.subr.bf16.mxu1 %v8707_v47  ;;  %v8764_v36 = vld [vmem:[#allocation26 + $0x2b0] ss:$28 sps:$4 sm:$0xff]   ;;  %v8768_v47 = vld [vmem:[#allocation26 + $0x478] ss:$28 sps:$4 sm:$0xff]  }
 0x74c   :  { %6651 = vmatmul.mubr.bf16.vlgmr.msra.gmra.mrb[12].mxu0 %v10092_v11 }
 0x74d   :  { %6815 = vmatmul.mubr.bf16.vlgmr.msra.gmra.mrb[20].mxu1 %v10092_v11  ;;  %6824 = vmatpush1.bf16.msra.mxu0 %v8704_v49  ;;  %v8771_v49 = vld [vmem:[#allocation26 + $0x2ec] ss:$28 sps:$4 sm:$0xff]  }
 0x74e   :  { %6855 = vmatprep.mubr.bf16.mxu0 %v10054_v31  ;;  %7987 = vmatpush3.bf16.msra.mxu1 %v8708_v6  ;;  %v8772_v6 = vld [vmem:[#allocation26 + $0x670] ss:$28 sps:$4 sm:$0xff]  }
 0x74f   :  { %7019 = vmatprep.mubr.bf16.mxu1 %v10054_v31  ;;  %6825 = vmatprep.subr.bf16.mxu0 %v8711_v4  ;;  %v8724_v31 = vld [vmem:[#allocation26 + $0xf0] ss:$28 sps:$4 sm:$0xff]   ;;  %v8769_v4 = vld [vmem:[#allocation26 + $0x2e8] ss:$28 sps:$4 sm:$0xff]  }
 0x750   :  { %7988 = vmatprep.subr.bf16.mxu1 %v8712_v37  ;;  %v8773_v37 = vld [vmem:[#allocation26 + $0x4b0] ss:$28 sps:$4 sm:$0xff]  }
 0x751   :  { %6826 = vmatpush1.bf16.msra.mxu0 %v8709_v38  ;;  %v8776_v38 = vld [vmem:[#allocation26 + $0x324] ss:$28 sps:$4 sm:$0xff]  }
 0x752   :  { %7989 = vmatpush3.bf16.msra.mxu1 %v8713_v25  ;;  %6827 = vmatprep.subr.bf16.mxu0 %v8716_v40  ;;  %v8777_v25 = vld [vmem:[#allocation26 + $0x6a8] ss:$28 sps:$4 sm:$0xff]   ;;  %v8774_v40 = vld [vmem:[#allocation26 + $0x320] ss:$28 sps:$4 sm:$0xff]  }
 0x753   :  { %7990 = vmatprep.subr.bf16.mxu1 %v8717_v41  ;;  %v8778_v41 = vld [vmem:[#allocation26 + $0x4e8] ss:$28 sps:$4 sm:$0xff]  }
 0x755   :  { %6828 = vmatpush1.bf16.msra.mxu0 %v8714_v51  ;;  %v8781_v51 = vld [vmem:[#allocation26 + $0x35c] ss:$28 sps:$4 sm:$0xff]  }
 0x756   :  { %7991 = vmatpush3.bf16.msra.mxu1 %v8718_v56  ;;  %6829 = vmatprep.subr.bf16.mxu0 %v8721_v3  ;;  %v8782_v56 = vld [vmem:[#allocation26 + $0x6e0] ss:$28 sps:$4 sm:$0xff]   ;;  %v8779_v3 = vld [vmem:[#allocation26 + $0x358] ss:$28 sps:$4 sm:$0xff]  }
 0x757   :  { %7992 = vmatprep.subr.bf16.mxu1 %v8722_v58  ;;  %v8783_v58 = vld [vmem:[#allocation26 + $0x520] ss:$28 sps:$4 sm:$0xff]  }
 0x759   :  { %6830 = vmatpush1.bf16.msra.mxu0 %v8719_v12  ;;  %v8786_v12 = vld [vmem:[#allocation26 + $0x394] ss:$28 sps:$4 sm:$0xff]  }
 0x75a   :  { %7993 = vmatpush3.bf16.msra.mxu1 %v8723_v60  ;;  %6831 = vmatprep.subr.bf16.mxu0 %v8726_v32  ;;  %v8787_v60 = vld [vmem:[#allocation26 + $0x8d8] ss:$28 sps:$4 sm:$0xff]   ;;  %v8784_v32 = vld [vmem:[#allocation26 + $0x390] ss:$28 sps:$4 sm:$0xff]  }
 0x75b   :  { %7994 = vmatprep.subr.bf16.mxu1 %v8727_v48  ;;  %v8788_v48 = vld [vmem:[#allocation26 + $0x718] ss:$28 sps:$4 sm:$0xff]  }
 0x75d   :  { %6832 = vmatpush1.bf16.msra.mxu0 %v8724_v31  ;;  %v8791_v31 = vld [vmem:[#allocation26 + $0x3cc] ss:$28 sps:$4 sm:$0xff]  }
 0x75e   :  { %7995 = vmatpush3.bf16.msra.mxu1 %v8728_v9  ;;  %6833 = vmatprep.subr.bf16.mxu0 %v8731_v46  ;;  %v8792_v9 = vld [vmem:[#allocation26 + $0x910] ss:$28 sps:$4 sm:$0xff]   ;;  %v8789_v46 = vld [vmem:[#allocation26 + $0x3c8] ss:$28 sps:$4 sm:$0xff]  }
 0x75f   :  { %7996 = vmatprep.subr.bf16.mxu1 %v8732_v14  ;;  %v8793_v14 = vld [vmem:[#allocation26 + $0x750] ss:$28 sps:$4 sm:$0xff]  }
 0x761   :  { %6834 = vmatpush1.bf16.msra.mxu0 %v8729_v53  ;;  %v8796_v53 = vld [vmem:[#allocation26 + $0x404] ss:$28 sps:$4 sm:$0xff]  }
 0x762   :  { %7997 = vmatpush3.bf16.msra.mxu1 %v8733_v44  ;;  %6835 = vmatprep.subr.bf16.mxu0 %v8736_v50  ;;  %v8797_v44 = vld [vmem:[#allocation26 + $0x948] ss:$28 sps:$4 sm:$0xff]   ;;  %v8794_v50 = vld [vmem:[#allocation26 + $0x400] ss:$28 sps:$4 sm:$0xff]  }
 0x763   :  { %7998 = vmatprep.subr.bf16.mxu1 %v8737_v54  ;;  %v8801_v54 = vld [vmem:[#allocation26 + $0x43c] ss:$28 sps:$4 sm:$0xff]  }
 0x765   :  { %6836 = vmatpush1.bf16.msra.mxu0 %v8734_v55  ;;  %v8802_v55 = vld [vmem:[#allocation26 + $0x980] ss:$28 sps:$4 sm:$0xff]  }
 0x766   :  { %7999 = vmatpush3.bf16.msra.mxu1 %v8738_v1  ;;  %6837 = vmatprep.subr.bf16.mxu0 %v8741_v5  ;;  %v8799_v1 = vld [vmem:[#allocation26 + $0x438] ss:$28 sps:$4 sm:$0xff]  }
 0x767   :  { %8000 = vmatprep.subr.bf16.mxu1 %v8742_v7  ;;  %v8806_v5 = vld [vmem:[#allocation26 + $0x474] ss:$28 sps:$4 sm:$0xff]  }
 0x768   :  { %v8807_v7 = vld [vmem:[#allocation26 + $0x9b8] ss:$28 sps:$4 sm:$0xff]  }
 0x769   :  { %6838 = vmatpush1.bf16.msra.mxu0 %v8739_v13  ;;  %v8804_v13 = vld [vmem:[#allocation26 + $0x470] ss:$28 sps:$4 sm:$0xff]  }
 0x76a   :  { %8001 = vmatpush3.bf16.msra.mxu1 %v8743_v21  ;;  %6839 = vmatprep.subr.bf16.mxu0 %v8746_v2  ;;  %v8808_v21 = vld [vmem:[#allocation26 + $0x7f8] ss:$28 sps:$4 sm:$0xff]   ;;  %v8811_v2 = vld [vmem:[#allocation26 + $0x4ac] ss:$28 sps:$4 sm:$0xff]  }
 0x76b   :  { %8008 = vmatprep.subr.bf16.mxu1 %v8747_v17  ;;  %v8812_v17 = vld [vmem:[#allocation26 + $0x9f0] ss:$28 sps:$4 sm:$0xff]  }
 0x76d   :  { %7020 = vmatmul.mubr.bf16.vlgmr.msra.gmra.mrb[24].mxu1 %v10056_v61  ;;  %6840 = vmatpush1.bf16.msra.mxu0 %v8744_v18  ;;  %v8809_v18 = vld [vmem:[#allocation26 + $0x4a8] ss:$28 sps:$4 sm:$0xff]  }
 0x76e   :  { %8009 = vmatpush3.bf16.msra.mxu1 %v8748_v19  ;;  %7059 = vmatprep.mubr.bf16.mxu1 %v10062_v35  ;;  %v8813_v19 = vld [vmem:[#allocation26 + $0x830] ss:$28 sps:$4 sm:$0xff]  }
 0x76f   :  { %6841 = vmatprep.subr.bf16.mxu0 %v8751_v20  ;;  %8010 = vmatprep.subr.bf16.mxu1 %v8752_v16  ;;  %v8816_v20 = vld [vmem:[#allocation26 + $0x4e4] ss:$28 sps:$4 sm:$0xff]  }
 0x770   :  { %v8817_v16 = vld [vmem:[#allocation26 + $0xa28] ss:$28 sps:$4 sm:$0xff]  }
 0x771   :  { %6842 = vmatpush1.bf16.msra.mxu0 %v8749_v26  ;;  %v8814_v26 = vld [vmem:[#allocation26 + $0x4e0] ss:$28 sps:$4 sm:$0xff]  }
 0x772   :  { %8011 = vmatpush3.bf16.msra.mxu1 %v8753_v22  ;;  %6843 = vmatprep.subr.bf16.mxu0 %v8756_v45  ;;  %v8818_v22 = vld [vmem:[#allocation26 + $0x868] ss:$28 sps:$4 sm:$0xff]   ;;  %v8821_v45 = vld [vmem:[#allocation26 + $0x51c] ss:$28 sps:$4 sm:$0xff]  }
 0x773   :  { %8012 = vmatprep.subr.bf16.mxu1 %v8757_v62  ;;  %v8822_v62 = vld [vmem:[#allocation26 + $0xa60] ss:$28 sps:$4 sm:$0xff]  }
 0x775   :  { %6844 = vmatpush1.bf16.msra.mxu0 %v8754_v27  ;;  %v8819_v27 = vld [vmem:[#allocation26 + $0x518] ss:$28 sps:$4 sm:$0xff]  }
 0x776   :  { %8013 = vmatpush3.bf16.msra.mxu1 %v8758_v39  ;;  %6845 = vmatprep.subr.bf16.mxu0 %v8761_v28  ;;  %v8823_v39 = vld [vmem:[#allocation26 + $0x8a0] ss:$28 sps:$4 sm:$0xff]   ;;  %v8826_v28 = vld [vmem:[#allocation26 + $0x554] ss:$28 sps:$4 sm:$0xff]  }
 0x777   :  { %8014 = vmatprep.subr.bf16.mxu1 %v8762_v29  ;;  %v8827_v29 = vld [vmem:[#allocation26 + $0xc58] ss:$28 sps:$4 sm:$0xff]  }
 0x779   :  { %6846 = vmatpush1.bf16.msra.mxu0 %v8759_v33  ;;  %v8824_v33 = vld [vmem:[#allocation26 + $0x550] ss:$28 sps:$4 sm:$0xff]  }
 0x77a   :  { %8015 = vmatpush3.bf16.msra.mxu1 %v8763_v57  ;;  %6847 = vmatprep.subr.bf16.mxu0 %v8766_v15  ;;  %v8828_v57 = vld [vmem:[#allocation26 + $0xa98] ss:$28 sps:$4 sm:$0xff]   ;;  %v8831_v15 = vld [vmem:[#allocation26 + $0x58c] ss:$28 sps:$4 sm:$0xff]  }
 0x77b   :  { %8016 = vmatprep.subr.bf16.mxu1 %v8767_v34  ;;  %v8832_v34 = vld [vmem:[#allocation26 + $0xc90] ss:$28 sps:$4 sm:$0xff]  }
 0x77d   :  { %6848 = vmatpush1.bf16.msra.mxu0 %v8764_v36  ;;  %v8829_v36 = vld [vmem:[#allocation26 + $0x588] ss:$28 sps:$4 sm:$0xff]  }
 0x77e   :  { %8017 = vmatpush3.bf16.msra.mxu1 %v8768_v47  ;;  %6849 = vmatprep.subr.bf16.mxu0 %v8771_v49  ;;  %v8833_v47 = vld [vmem:[#allocation26 + $0xad0] ss:$28 sps:$4 sm:$0xff]   ;;  %v8836_v49 = vld [vmem:[#allocation26 + $0x5c4] ss:$28 sps:$4 sm:$0xff]  }
 0x77f   :  { %8018 = vmatprep.subr.bf16.mxu1 %v8772_v6  ;;  %v8837_v6 = vld [vmem:[#allocation26 + $0xcc8] ss:$28 sps:$4 sm:$0xff]  }
 0x781   :  { %6850 = vmatpush1.bf16.msra.mxu0 %v8769_v4  ;;  %v8834_v4 = vld [vmem:[#allocation26 + $0x5c0] ss:$28 sps:$4 sm:$0xff]  }
 0x782   :  { %8019 = vmatpush3.bf16.msra.mxu1 %v8773_v37  ;;  %6851 = vmatprep.subr.bf16.mxu0 %v8776_v38  ;;  %v8838_v37 = vld [vmem:[#allocation26 + $0xb08] ss:$28 sps:$4 sm:$0xff]   ;;  %v8841_v38 = vld [vmem:[#allocation26 + $0x5fc] ss:$28 sps:$4 sm:$0xff]  }
 0x783   :  { %8020 = vmatprep.subr.bf16.mxu1 %v8777_v25  ;;  %v8842_v25 = vld [vmem:[#allocation26 + $0xd00] ss:$28 sps:$4 sm:$0xff]  }
 0x785   :  { %6852 = vmatpush1.bf16.msra.mxu0 %v8774_v40  ;;  %v8839_v40 = vld [vmem:[#allocation26 + $0x5f8] ss:$28 sps:$4 sm:$0xff]  }
 0x786   :  { %8021 = vmatpush3.bf16.msra.mxu1 %v8778_v41  ;;  %6853 = vmatprep.subr.bf16.mxu0 %v8781_v51  ;;  %v8843_v41 = vld [vmem:[#allocation26 + $0xb40] ss:$28 sps:$4 sm:$0xff]   ;;  %v8846_v51 = vld [vmem:[#allocation26 + $0x634] ss:$28 sps:$4 sm:$0xff]  }
 0x787   :  { %8022 = vmatprep.subr.bf16.mxu1 %v8782_v56  ;;  %v8847_v56 = vld [vmem:[#allocation26 + $0xd38] ss:$28 sps:$4 sm:$0xff]  }
 0x789   :  { %6854 = vmatpush1.bf16.msra.mxu0 %v8779_v3  ;;  %v8844_v3 = vld [vmem:[#allocation26 + $0x630] ss:$28 sps:$4 sm:$0xff]  }
 0x78a   :  { %8023 = vmatpush3.bf16.msra.mxu1 %v8783_v58  ;;  %6864 = vmatprep.subr.bf16.mxu0 %v8786_v12  ;;  %v8848_v58 = vld [vmem:[#allocation26 + $0xb78] ss:$28 sps:$4 sm:$0xff]   ;;  %v8851_v12 = vld [vmem:[#allocation26 + $0x66c] ss:$28 sps:$4 sm:$0xff]  }
 0x78b   :  { %8030 = vmatprep.subr.bf16.mxu1 %v8787_v60  ;;  %v8852_v60 = vld [vmem:[#allocation26 + $0xd70] ss:$28 sps:$4 sm:$0xff]  }
 0x78c   :  { %6856 = vmatmul.mubr.bf16.vlgmr.msra.gmra.mrb[16].mxu0 %v10056_v61  ;;  %v8798_v61 = vld [vmem:[#allocation26 + $0x788] ss:$28 sps:$4 sm:$0xff]  }
 0x78d   :  { %7060 = vmatmul.mubr.bf16.vlgmr.msra.gmra.mrb[28].mxu1 %v10070_v30  ;;  %6865 = vmatpush1.bf16.msra.mxu0 %v8784_v32  ;;  %v8849_v32 = vld [vmem:[#allocation26 + $0x668] ss:$28 sps:$4 sm:$0xff]  }
 0x78e   :  { %6896 = vmatprep.mubr.bf16.mxu0 %v10062_v35  ;;  %8031 = vmatpush3.bf16.msra.mxu1 %v8788_v48  ;;  %v8803_v35 = vld [vmem:[#allocation26 + $0x7c0] ss:$28 sps:$4 sm:$0xff]   ;;  %v8853_v48 = vld [vmem:[#allocation26 + $0xbb0] ss:$28 sps:$4 sm:$0xff]  }
 0x78f   :  { %7099 = vmatprep.mubr.bf16.mxu1 %v10072_v24  ;;  %6866 = vmatprep.subr.bf16.mxu0 %v8791_v31  ;;  %v8856_v31 = vld [vmem:[#allocation26 + $0x6a4] ss:$28 sps:$4 sm:$0xff]  }
 0x790   :  { %8032 = vmatprep.subr.bf16.mxu1 %v8792_v9  ;;  %v8857_v9 = vld [vmem:[#allocation26 + $0xda8] ss:$28 sps:$4 sm:$0xff]  }
 0x791   :  { %6867 = vmatpush1.bf16.msra.mxu0 %v8789_v46  ;;  %v8854_v46 = vld [vmem:[#allocation26 + $0x6a0] ss:$28 sps:$4 sm:$0xff]  }
 0x792   :  { %8033 = vmatpush3.bf16.msra.mxu1 %v8793_v14  ;;  %6868 = vmatprep.subr.bf16.mxu0 %v8796_v53  ;;  %v8858_v14 = vld [vmem:[#allocation26 + $0xbe8] ss:$28 sps:$4 sm:$0xff]   ;;  %v8861_v53 = vld [vmem:[#allocation26 + $0x6dc] ss:$28 sps:$4 sm:$0xff]  }
 0x793   :  { %8034 = vmatprep.subr.bf16.mxu1 %v8797_v44  ;;  %v8862_v44 = vld [vmem:[#allocation26 + $0xde0] ss:$28 sps:$4 sm:$0xff]  }
 0x795   :  { %6869 = vmatpush1.bf16.msra.mxu0 %v8794_v50  ;;  %v8859_v50 = vld [vmem:[#allocation26 + $0x6d8] ss:$28 sps:$4 sm:$0xff]  }
 0x796   :  { %8035 = vmatpush3.bf16.msra.mxu1 %v8798_v61  ;;  %6870 = vmatprep.subr.bf16.mxu0 %v8801_v54  ;;  %v8863_v61 = vld [vmem:[#allocation26 + $0xc20] ss:$28 sps:$4 sm:$0xff]   ;;  %v8866_v54 = vld [vmem:[#allocation26 + $0x714] ss:$28 sps:$4 sm:$0xff]  }
 0x797   :  { %8036 = vmatprep.subr.bf16.mxu1 %v8802_v55  ;;  %v8864_v55 = vld [vmem:[#allocation26 + $0x710] ss:$28 sps:$4 sm:$0xff]  }
 0x799   :  { %6871 = vmatpush1.bf16.msra.mxu0 %v8799_v1  ;;  %v8869_v1 = vld [vmem:[#allocation26 + $0x74c] ss:$28 sps:$4 sm:$0xff]  }
 0x79a   :  { %8037 = vmatpush3.bf16.msra.mxu1 %v8803_v35  ;;  %6872 = vmatprep.subr.bf16.mxu0 %v8806_v5  ;;  %v8867_v35 = vld [vmem:[#allocation26 + $0x748] ss:$28 sps:$4 sm:$0xff]  }
 0x79b   :  { %8038 = vmatprep.subr.bf16.mxu1 %v8807_v7  ;;  %v8872_v5 = vld [vmem:[#allocation26 + $0x784] ss:$28 sps:$4 sm:$0xff]  }
 0x79c   :  { %v8870_v7 = vld [vmem:[#allocation26 + $0x780] ss:$28 sps:$4 sm:$0xff]  }
 0x79d   :  { %6873 = vmatpush1.bf16.msra.mxu0 %v8804_v13  ;;  %v8875_v13 = vld [vmem:[#allocation26 + $0x7bc] ss:$28 sps:$4 sm:$0xff]  }
 0x79e   :  { %8039 = vmatpush3.bf16.msra.mxu1 %v8808_v21  ;;  %6874 = vmatprep.subr.bf16.mxu0 %v8811_v2  ;;  %v8873_v21 = vld [vmem:[#allocation26 + $0x7b8] ss:$28 sps:$4 sm:$0xff]  }
 0x79f   :  { %8040 = vmatprep.subr.bf16.mxu1 %v8812_v17  ;;  %v8878_v2 = vld [vmem:[#allocation26 + $0x7f4] ss:$28 sps:$4 sm:$0xff]  }
 0x7a0   :  { %v8876_v17 = vld [vmem:[#allocation26 + $0x7f0] ss:$28 sps:$4 sm:$0xff]  }
 0x7a1   :  { %6875 = vmatpush1.bf16.msra.mxu0 %v8809_v18  ;;  %v8879_v18 = vld [vmem:[#allocation26 + $0x828] ss:$28 sps:$4 sm:$0xff]  }
 0x7a2   :  { %8041 = vmatpush3.bf16.msra.mxu1 %v8813_v19  ;;  %6876 = vmatprep.subr.bf16.mxu0 %v8816_v20  ;;  %v8884_v19 = vld [vmem:[#allocation26 + $0x864] ss:$28 sps:$4 sm:$0xff]   ;;  %v8887_v20 = vld [vmem:[#allocation26 + $0x89c] ss:$28 sps:$4 sm:$0xff]  }
 0x7a3   :  { %8042 = vmatprep.subr.bf16.mxu1 %v8817_v16  ;;  %v8885_v16 = vld [vmem:[#allocation26 + $0x898] ss:$28 sps:$4 sm:$0xff]  }
 0x7a5   :  { %6877 = vmatpush1.bf16.msra.mxu0 %v8814_v26  ;;  %v8890_v26 = vld [vmem:[#allocation26 + $0x8d4] ss:$28 sps:$4 sm:$0xff]  }
 0x7a6   :  { %8043 = vmatpush3.bf16.msra.mxu1 %v8818_v22  ;;  %6878 = vmatprep.subr.bf16.mxu0 %v8821_v45  ;;  %v8888_v22 = vld [vmem:[#allocation26 + $0x8d0] ss:$28 sps:$4 sm:$0xff]  }
 0x7a7   :  { %8044 = vmatprep.subr.bf16.mxu1 %v8822_v62  ;;  %v8893_v45 = vld [vmem:[#allocation26 + $0x90c] ss:$28 sps:$4 sm:$0xff]  }
 0x7a8   :  { %v8891_v62 = vld [vmem:[#allocation26 + $0x908] ss:$28 sps:$4 sm:$0xff]  }
 0x7a9   :  { %6879 = vmatpush1.bf16.msra.mxu0 %v8819_v27  ;;  %v8896_v27 = vld [vmem:[#allocation26 + $0x944] ss:$28 sps:$4 sm:$0xff]  }
 0x7aa   :  { %8045 = vmatpush3.bf16.msra.mxu1 %v8823_v39  ;;  %6880 = vmatprep.subr.bf16.mxu0 %v8826_v28  ;;  %v8894_v39 = vld [vmem:[#allocation26 + $0x940] ss:$28 sps:$4 sm:$0xff]  }
 0x7ab   :  { %8052 = vmatprep.subr.bf16.mxu1 %v8827_v29  ;;  %v8899_v28 = vld [vmem:[#allocation26 + $0x97c] ss:$28 sps:$4 sm:$0xff]  }
 0x7ac   :  { %v8897_v29 = vld [vmem:[#allocation26 + $0x978] ss:$28 sps:$4 sm:$0xff]  }
 0x7ad   :  { %7100 = vmatmul.mubr.bf16.vlgmr.msra.gmra.mrb[32].mxu1 %v10082_v59  ;;  %6881 = vmatpush1.bf16.msra.mxu0 %v8824_v33  ;;  %v8902_v33 = vld [vmem:[#allocation26 + $0x9b4] ss:$28 sps:$4 sm:$0xff]  }
 0x7ae   :  { %8053 = vmatpush3.bf16.msra.mxu1 %v8828_v57  ;;  %7139 = vmatprep.mubr.bf16.mxu1 %v10085_v52  ;;  %v8900_v57 = vld [vmem:[#allocation26 + $0x9b0] ss:$28 sps:$4 sm:$0xff]  }
 0x7af   :  { %6882 = vmatprep.subr.bf16.mxu0 %v8831_v15  ;;  %8054 = vmatprep.subr.bf16.mxu1 %v8832_v34  ;;  %v8905_v15 = vld [vmem:[#allocation26 + $0x9ec] ss:$28 sps:$4 sm:$0xff]  }
 0x7b0   :  { %v8903_v34 = vld [vmem:[#allocation26 + $0x9e8] ss:$28 sps:$4 sm:$0xff]  }
 0x7b1   :  { %6883 = vmatpush1.bf16.msra.mxu0 %v8829_v36  ;;  %v8908_v36 = vld [vmem:[#allocation26 + $0xa24] ss:$28 sps:$4 sm:$0xff]  }
 0x7b2   :  { %8055 = vmatpush3.bf16.msra.mxu1 %v8833_v47  ;;  %6884 = vmatprep.subr.bf16.mxu0 %v8836_v49  ;;  %v8906_v47 = vld [vmem:[#allocation26 + $0xa20] ss:$28 sps:$4 sm:$0xff]  }
 0x7b3   :  { %8056 = vmatprep.subr.bf16.mxu1 %v8837_v6  ;;  %v8911_v49 = vld [vmem:[#allocation26 + $0xa5c] ss:$28 sps:$4 sm:$0xff]  }
 0x7b4   :  { %v8909_v6 = vld [vmem:[#allocation26 + $0xa58] ss:$28 sps:$4 sm:$0xff]  }
 0x7b5   :  { %6885 = vmatpush1.bf16.msra.mxu0 %v8834_v4  ;;  %v8914_v4 = vld [vmem:[#allocation26 + $0xa94] ss:$28 sps:$4 sm:$0xff]  }
 0x7b6   :  { %8057 = vmatpush3.bf16.msra.mxu1 %v8838_v37  ;;  %6886 = vmatprep.subr.bf16.mxu0 %v8841_v38  ;;  %v8912_v37 = vld [vmem:[#allocation26 + $0xa90] ss:$28 sps:$4 sm:$0xff]  }
 0x7b7   :  { %8058 = vmatprep.subr.bf16.mxu1 %v8842_v25  ;;  %v8917_v38 = vld [vmem:[#allocation26 + $0xacc] ss:$28 sps:$4 sm:$0xff]  }
 0x7b8   :  { %v8915_v25 = vld [vmem:[#allocation26 + $0xac8] ss:$28 sps:$4 sm:$0xff]  }
 0x7b9   :  { %6887 = vmatpush1.bf16.msra.mxu0 %v8839_v40  ;;  %v8920_v40 = vld [vmem:[#allocation26 + $0xb04] ss:$28 sps:$4 sm:$0xff]  }
 0x7ba   :  { %8059 = vmatpush3.bf16.msra.mxu1 %v8843_v41  ;;  %6888 = vmatprep.subr.bf16.mxu0 %v8846_v51  ;;  %v8918_v41 = vld [vmem:[#allocation26 + $0xb00] ss:$28 sps:$4 sm:$0xff]  }
 0x7bb   :  { %8060 = vmatprep.subr.bf16.mxu1 %v8847_v56  ;;  %v8923_v51 = vld [vmem:[#allocation26 + $0xb3c] ss:$28 sps:$4 sm:$0xff]  }
 0x7bc   :  { %v8921_v56 = vld [vmem:[#allocation26 + $0xb38] ss:$28 sps:$4 sm:$0xff]  }
 0x7bd   :  { %6889 = vmatpush1.bf16.msra.mxu0 %v8844_v3  ;;  %v8926_v3 = vld [vmem:[#allocation26 + $0xb74] ss:$28 sps:$4 sm:$0xff]  }
 0x7be   :  { %8061 = vmatpush3.bf16.msra.mxu1 %v8848_v58  ;;  %6890 = vmatprep.subr.bf16.mxu0 %v8851_v12  ;;  %v8924_v58 = vld [vmem:[#allocation26 + $0xb70] ss:$28 sps:$4 sm:$0xff]   ;;  %v10111_v12 = vld [vmem:[#allocation28] sm:$0xff] }
 0x7bf   :  { %8062 = vmatprep.subr.bf16.mxu1 %v8852_v60  ;;  %v4167_v60 = vrot.slane %v10111_v12, %v9833_v63 }
 0x7c1   :  { %6891 = vmatpush1.bf16.msra.mxu0 %v8849_v32  ;;  %v4163_v32 = vrot.slane %v10111_v12, %v9771_v10 }
 0x7c2   :  { %8063 = vmatpush3.bf16.msra.mxu1 %v8853_v48  ;;  %6892 = vmatprep.subr.bf16.mxu0 %v8856_v31  ;;  %v8927_v48 = vld [vmem:[#allocation26 + $0xba8] ss:$28 sps:$4 sm:$0xff]   ;;  %v4171_v31 = vrot.slane %v10111_v12, %v9836_v0 }
 0x7c3   :  { %8064 = vmatprep.subr.bf16.mxu1 %v8857_v9  ;;  %v8932_v9 = vld [vmem:[#allocation26 + $0xbe4] ss:$28 sps:$4 sm:$0xff]  }
 0x7c5   :  { %6893 = vmatpush1.bf16.msra.mxu0 %v8854_v46 }
 0x7c6   :  { %8065 = vmatpush3.bf16.msra.mxu1 %v8858_v14  ;;  %6894 = vmatprep.subr.bf16.mxu0 %v8861_v53 }
 0x7c7   :  { %8066 = vmatprep.subr.bf16.mxu1 %v8862_v44 }
 0x7c9   :  { %6895 = vmatpush1.bf16.msra.mxu0 %v8859_v50 }
 0x7ca   :  { %8067 = vmatpush3.bf16.msra.mxu1 %v8863_v61  ;;  %6905 = vmatprep.subr.bf16.mxu0 %v8866_v54 }
 0x7cc   :  { %6897 = vmatmul.mubr.bf16.vlgmr.msra.gmra.mrb[16].mxu0 %v10070_v30  ;;  %v8881_v30 = vld [vmem:[#allocation26 + $0x82c] ss:$28 sps:$4 sm:$0xff]  }
 0x7cd   :  { %7140 = vmatmul.mubr.bf16.vlgmr.msra.gmra.mrb[36].mxu1 %v10092_v11  ;;  %6906 = vmatpush1.bf16.msra.mxu0 %v8864_v55  ;;  %v8930_v55 = vld [vmem:[#allocation26 + $0xbe0] ss:$28 sps:$4 sm:$0xff]  }
 0x7ce   :  { %6937 = vmatprep.mubr.bf16.mxu0 %v10072_v24  ;;  %6907 = vmatprep.subr.bf16.mxu0 %v8869_v1  ;;  %v8882_v24 = vld [vmem:[#allocation26 + $0x860] ss:$28 sps:$4 sm:$0xff]  }
 0x7d1   :  { %6908 = vmatpush1.bf16.msra.mxu0 %v8867_v35  ;;  %v8935_v35 = vld [vmem:[#allocation26 + $0xc1c] ss:$28 sps:$4 sm:$0xff]  }
 0x7d2   :  { %6909 = vmatprep.subr.bf16.mxu0 %v8872_v5  ;;  %v8933_v5 = vld [vmem:[#allocation26 + $0xc18] ss:$28 sps:$4 sm:$0xff]  }
 0x7d5   :  { %6910 = vmatpush1.bf16.msra.mxu0 %v8870_v7  ;;  %v8938_v7 = vld [vmem:[#allocation26 + $0xc54] ss:$28 sps:$4 sm:$0xff]  }
 0x7d6   :  { %6911 = vmatprep.subr.bf16.mxu0 %v8875_v13  ;;  %v8936_v13 = vld [vmem:[#allocation26 + $0xc50] ss:$28 sps:$4 sm:$0xff]  }
 0x7d9   :  { %6912 = vmatpush1.bf16.msra.mxu0 %v8873_v21  ;;  %v8941_v21 = vld [vmem:[#allocation26 + $0xc8c] ss:$28 sps:$4 sm:$0xff]  }
 0x7da   :  { %6913 = vmatprep.subr.bf16.mxu0 %v8878_v2 }
 0x7dd   :  { %6914 = vmatpush1.bf16.msra.mxu0 %v8876_v17 }
 0x7de   :  { %6915 = vmatprep.subr.bf16.mxu0 %v8881_v30  ;;  %v8939_v30 = vld [vmem:[#allocation26 + $0xc88] ss:$28 sps:$4 sm:$0xff]  }
 0x7e1   :  { %6916 = vmatpush1.bf16.msra.mxu0 %v8879_v18 }
 0x7e2   :  { %6917 = vmatprep.subr.bf16.mxu0 %v8884_v19  ;;  %v8944_v19 = vld [vmem:[#allocation26 + $0xcc4] ss:$28 sps:$4 sm:$0xff]  }
 0x7e5   :  { %6918 = vmatpush1.bf16.msra.mxu0 %v8882_v24 }
 0x7e6   :  { %6919 = vmatprep.subr.bf16.mxu0 %v8887_v20  ;;  %v8942_v20 = vld [vmem:[#allocation26 + $0xcc0] ss:$28 sps:$4 sm:$0xff]  }
 0x7e9   :  { %6920 = vmatpush1.bf16.msra.mxu0 %v8885_v16  ;;  %v8947_v16 = vld [vmem:[#allocation26 + $0xcfc] ss:$28 sps:$4 sm:$0xff]  }
 0x7ea   :  { %6921 = vmatprep.subr.bf16.mxu0 %v8890_v26  ;;  %v8945_v26 = vld [vmem:[#allocation26 + $0xcf8] ss:$28 sps:$4 sm:$0xff]  }
 0x7ed   :  { %6922 = vmatpush1.bf16.msra.mxu0 %v8888_v22  ;;  %v8950_v22 = vld [vmem:[#allocation26 + $0xd34] ss:$28 sps:$4 sm:$0xff]  }
 0x7ee   :  { %6923 = vmatprep.subr.bf16.mxu0 %v8893_v45  ;;  %v8948_v45 = vld [vmem:[#allocation26 + $0xd30] ss:$28 sps:$4 sm:$0xff]  }
 0x7f1   :  { %6924 = vmatpush1.bf16.msra.mxu0 %v8891_v62  ;;  %v8953_v62 = vld [vmem:[#allocation26 + $0xd6c] ss:$28 sps:$4 sm:$0xff]  }
 0x7f2   :  { %6925 = vmatprep.subr.bf16.mxu0 %v8896_v27  ;;  %v8951_v27 = vld [vmem:[#allocation26 + $0xd68] ss:$28 sps:$4 sm:$0xff]  }
 0x7f5   :  { %6926 = vmatpush1.bf16.msra.mxu0 %v8894_v39  ;;  %v8956_v39 = vld [vmem:[#allocation26 + $0xda4] ss:$28 sps:$4 sm:$0xff]  }
 0x7f6   :  { %6927 = vmatprep.subr.bf16.mxu0 %v8899_v28 }
 0x7f9   :  { %6928 = vmatpush1.bf16.msra.mxu0 %v8897_v29 }
 0x7fa   :  { %6929 = vmatprep.subr.bf16.mxu0 %v8902_v33  ;;  %v8954_v33 = vld [vmem:[#allocation26 + $0xda0] ss:$28 sps:$4 sm:$0xff]  }
 0x7fd   :  { %6930 = vmatpush1.bf16.msra.mxu0 %v8900_v57 }
 0x7fe   :  { %6931 = vmatprep.subr.bf16.mxu0 %v8905_v15 }
 0x801   :  { %6932 = vmatpush1.bf16.msra.mxu0 %v8903_v34  ;;  %v8959_v34 = vld [vmem:[#allocation26 + $0xddc] ss:$28 sps:$4 sm:$0xff]  }
 0x802   :  { %6933 = vmatprep.subr.bf16.mxu0 %v8908_v36 }
 0x805   :  { %6934 = vmatpush1.bf16.msra.mxu0 %v8906_v47  ;;  %v8957_v47 = vld [vmem:[#allocation26 + $0xdd8] ss:$28 sps:$4 sm:$0xff]  }
 0x806   :  { %6935 = vmatprep.subr.bf16.mxu0 %v8911_v49  ;;  %v4183_v49 = vrot.slane %v10111_v12, %v9963_v43 }
 0x809   :  { %6936 = vmatpush1.bf16.msra.mxu0 %v8909_v6 }
 0x80a   :  { %6946 = vmatprep.subr.bf16.mxu0 %v8914_v4 }
 0x80c   :  { %6938 = vmatmul.mubr.bf16.vlgmr.msra.gmra.mrb[16].mxu0 %v10082_v59  ;;  %v8929_v59 = vld [vmem:[#allocation26 + $0xbac] ss:$28 sps:$4 sm:$0xff]  }
 0x80d   :  { %6947 = vmatpush1.bf16.msra.mxu0 %v8912_v37  ;;  %6978 = vmatprep.mubr.bf16.mxu0 %v10085_v52  ;;  %v4159_v52 = vrot.slane %v10111_v12, %v9768_v8 }
 0x80e   :  { %6948 = vmatprep.subr.bf16.mxu0 %v8917_v38 }
 0x811   :  { %6949 = vmatpush1.bf16.msra.mxu0 %v8915_v25 }
 0x812   :  { %6950 = vmatprep.subr.bf16.mxu0 %v8920_v40 }
 0x815   :  { %6951 = vmatpush1.bf16.msra.mxu0 %v8918_v41 }
 0x816   :  { %6952 = vmatprep.subr.bf16.mxu0 %v8923_v51 }
 0x819   :  { %6953 = vmatpush1.bf16.msra.mxu0 %v8921_v56 }
 0x81a   :  { %6954 = vmatprep.subr.bf16.mxu0 %v8926_v3 }
 0x81d   :  { %6955 = vmatpush1.bf16.msra.mxu0 %v8924_v58 }
 0x81e   :  { %6956 = vmatprep.subr.bf16.mxu0 %v8929_v59 }
 0x81f   :  { %v6652_v46 = vpop.f32.mrb[12].mxu0 }
 0x820   :  { %v8102_v14 = vadd.f32 %v6652_v46, %v4159_v52  ;;  %v6816_v53 = vpop.f32.mrb[20].mxu1  ;;  %v6654_v44 = vpop.f32.mrb[13].mxu0  ;;  %v4175_v46 = vrot.slane %v10111_v12, %v9960_v42 }
 0x821   :  { %v8104_v50 = vadd.f32 %v6816_v53, %v4167_v60  ;;  %v8103_v61 = vadd.f32 %v6654_v44, %v4163_v32  ;;  %v6818_v8 = vpop.f32.mrb[21].mxu1  ;;  %v6656_v54 = vpop.f32.mrb[14].mxu0  ;;  %6957 = vmatpush1.bf16.msra.mxu0 %v8927_v48 }
 0x822   :  { %8988 = vtanh.f32 %v8102_v14  ;;  %v8105_v63 = vadd.f32 %v6818_v8, %v4171_v31  ;;  %v6820_v1 = vpop.f32.mrb[22].mxu1  ;;  %v6657_v10 = vpop.f32.mrb[15].mxu0  ;;  %6958 = vmatprep.subr.bf16.mxu0 %v8932_v9  ;;  %v4179_v14 = vrot.slane %v10111_v12, %v9966_v23 }
 0x823   :  { %8990 = vtanh.f32 %v8104_v50  ;;  %v6821_v0 = vpop.f32.mrb[23].mxu1 }
 0x824   :  { %8992 = vtanh.f32 %v8103_v61 }
 0x825   :  { %8994 = vtanh.f32 %v8105_v63  ;;  %6959 = vmatpush1.bf16.msra.mxu0 %v8930_v55 }
 0x826   :  { %6960 = vmatprep.subr.bf16.mxu0 %v8935_v35 }
 0x829   :  { %6961 = vmatpush1.bf16.msra.mxu0 %v8933_v5 }
 0x82a   :  { %6962 = vmatprep.subr.bf16.mxu0 %v8938_v7 }
 0x82c   :  { %v8989_v2 = vpop.eup %8988 }
 0x82d   :  { %v8991_v17 = vpop.eup %8990  ;;  %7154 = vst [vmem:[#allocation29] sm:$0xff] %v8989_v2  ;;  %6963 = vmatpush1.bf16.msra.mxu0 %v8936_v13 }
 0x82e   :  { %v8993_v18 = vpop.eup %8992  ;;  %7156 = vst [vmem:[#allocation29 + $0x10] sm:$0xff] %v8991_v17  ;;  %6964 = vmatprep.subr.bf16.mxu0 %v8941_v21 }
 0x82f   :  { %v8995_v24 = vpop.eup %8994  ;;  %7155 = vst [vmem:[#allocation29 + $0x8] sm:$0xff] %v8993_v18 }
 0x830   :  { %7157 = vst [vmem:[#allocation29 + $0x18] sm:$0xff] %v8995_v24 }
 0x831   :  { %6965 = vmatpush1.bf16.msra.mxu0 %v8939_v30 }
 0x832   :  { %6966 = vmatprep.subr.bf16.mxu0 %v8944_v19 }
 0x835   :  { %6967 = vmatpush1.bf16.msra.mxu0 %v8942_v20 }
 0x836   :  { %6968 = vmatprep.subr.bf16.mxu0 %v8947_v16 }
 0x839   :  { %6969 = vmatpush1.bf16.msra.mxu0 %v8945_v26 }
 0x83a   :  { %6970 = vmatprep.subr.bf16.mxu0 %v8950_v22 }
 0x83d   :  { %6971 = vmatpush1.bf16.msra.mxu0 %v8948_v45 }
 0x83e   :  { %6972 = vmatprep.subr.bf16.mxu0 %v8953_v62 }
 0x840   :  { %v8002_v28 = vpop.f32.mrb[24].mxu1 }
 0x841   :  { %v8003_v29 = vpop.f32.mrb[25].mxu1  ;;  %6973 = vmatpush1.bf16.msra.mxu0 %v8951_v27 }
 0x842   :  { %v8004_v57 = vadd.f32 %v8003_v29, %v8002_v28  ;;  %v8005_v15 = vpop.f32.mrb[26].mxu1  ;;  %6974 = vmatprep.subr.bf16.mxu0 %v8956_v39 }
 0x843   :  { %v8006_v36 = vpop.f32.mrb[27].mxu1 }
 0x844   :  { %v7022_v37 = vadd.f32 %v8004_v57, %v4183_v49 }
 0x845   :  { %6975 = vmatpush1.bf16.msra.mxu0 %v8954_v33 }
 0x846   :  { %6976 = vmatprep.subr.bf16.mxu0 %v8959_v34 }
 0x849   :  { %6977 = vmatpush1.bf16.msra.mxu0 %v8957_v47 }
 0x84c   :  { %6979 = vmatmul.mubr.bf16.vlgmr.msra.gmra.mrb[16].mxu0 %v10092_v11 }
 0x860   :  { %v8024_v6 = vpop.f32.mrb[28].mxu1 }
 0x861   :  { %v8025_v4 = vpop.f32.mrb[29].mxu1 }
 0x862   :  { %v8026_v38 = vadd.f32 %v8025_v4, %v8024_v6  ;;  %v8027_v25 = vpop.f32.mrb[30].mxu1 }
 0x863   :  { %v8028_v40 = vpop.f32.mrb[31].mxu1 }
 0x864   :  { %v7062_v41 = vadd.f32 %v8026_v38, %v7022_v37 }
 0x880   :  { %v8046_v51 = vpop.f32.mrb[32].mxu1 }
 0x881   :  { %v8047_v56 = vpop.f32.mrb[33].mxu1 }
 0x882   :  { %v8048_v3 = vadd.f32 %v8047_v56, %v8046_v51  ;;  %v8049_v58 = vpop.f32.mrb[34].mxu1 }
 0x883   :  { %v8050_v59 = vpop.f32.mrb[35].mxu1 }
 0x884   :  { %v7102_v52 = vadd.f32 %v8048_v3, %v7062_v41 }
 0x8a0   :  { %v8068_v60 = vpop.f32.mrb[36].mxu1 }
 0x8a1   :  { %v8069_v32 = vpop.f32.mrb[37].mxu1 }
 0x8a2   :  { %v8070_v48 = vadd.f32 %v8069_v32, %v8068_v60  ;;  %v8071_v11 = vpop.f32.mrb[38].mxu1 }
 0x8a3   :  { %v8072_v31 = vpop.f32.mrb[39].mxu1 }
 0x8a4   :  { %v7142_v9 = vadd.f32 %v8070_v48, %v7102_v52 }
 0x8a6   :  { %8996 = vtanh.f32 %v7142_v9 }
 0x8b0   :  { %v8997_v43 = vpop.eup %8996 }
 0x8b1   :  { %7160 = vst [vmem:[#allocation29 + $0x30] sm:$0xff] %v8997_v43 }
 0x91f   :  { %v6980_v53 = vpop.f32.mrb[16].mxu0 }
 0x920   :  { %v8106_v44 = vadd.f32 %v6980_v53, %v4175_v46  ;;  %v6982_v50 = vpop.f32.mrb[17].mxu0 }
 0x921   :  { %v8107_v61 = vadd.f32 %v6982_v50, %v4179_v14  ;;  %v6984_v8 = vpop.f32.mrb[18].mxu0 }
 0x922   :  { %8998 = vtanh.f32 %v8106_v44  ;;  %v6985_v54 = vpop.f32.mrb[19].mxu0 }
 0x923   :  { %9000 = vtanh.f32 %v8107_v61 }
 0x92c   :  { %v8999_v55 = vpop.eup %8998 }
 0x92d   :  { %v9001_v63 = vpop.eup %9000  ;;  %7158 = vst [vmem:[#allocation29 + $0x20] sm:$0xff] %v8999_v55 }
 0x92e   :  { %7159 = vst [vmem:[#allocation29 + $0x28] sm:$0xff] %v9001_v63 }
 0x92f   :  { %9387 = shalt.err (!%p9384_p0)
}
 0x930   :  { %s10166_s10 = sld [smem:[#allocation42_spill]] }
 0x936   :  { %s9388_s11 = scalar_lea.hbm %s10166_s10, 896 }
 0x937   :  { %p9389_p1 = scmp.ne.s32.totalorder %s10166_s10, %s9388_s11  ;;  %p9392_p2 = scmp.lt.u32.totalorder %s9388_s11, %s10166_s10 }
 0x939   :  { %p9394_p3 = pnand %p9392_p2, %p9389_p1 }
 0x93b   :  { %9397 = shalt.err (!%p9394_p3)
}
 0x93c   :  { %7170 = dma.vmem_to_hbm [thread:$0]  %s7168_s19, 896, %s10166_s10, [#allocation4]  }
 0x93d   :  { %9416 = dma.done.wait [#allocation4], 896  }
 0x93e   :  { %9417 = vsyncadd [#allocation4], 4294966400 }
 0x93f   :  { %7174 = vsyncpa [#allocation3], 1 }
 0x940   :  { %7175 = vsyncpa [#allocation6], 1 }
 0x941   :  { %7176 = vsyncpa [#allocation9], 1 }
 0x942   :  { %7177 = vsyncpa [#allocation12], 1 }
 0x943   :  { %7178 = vsyncpa [#allocation15], 1 }
 0x944   :  { %7179 = vsyncpa [#allocation18], 1 }
 0x945   :  { %7180 = vsyncpa [#allocation21], 1 }
 0x946   :  { %7181 = vsyncpa [#allocation24], 1 }
 0x947   :  { %7182 = vsyncpa [#allocation27], 1 }
 0x948   :  { %7183 = vsyncpa [#allocation4], 1 }

</bundles_post_ra>
